<compile_context>
chip_gen: v6e
topology: v6e:2x2x1
jax: 0.10.0
libtpu: 0.0.40
codegen_flags: <defaults>
</compile_context>

<pallas_src>
import jax
import jax.numpy as jnp
from jax.experimental import pallas as pl
from jax.experimental.pallas import tpu as pltpu


def _round_up(a, b):
    return (a + b - 1) // b * b


# --------------------------------------------------------------------------- #
# Kernel
# --------------------------------------------------------------------------- #
def sppelan_kernel(x_top_ref, x_cur_ref, x_bot_ref, w1_ref, b1_ref, w5_ref,
                   b5_ref, o_ref, pad_ref):
    # x_top_ref : (1, HB*W, Cin)  bf16  halo slab above the tile (clamped)
    # x_cur_ref : (1, TH*W, Cin)  bf16  current TH-row slab
    # x_bot_ref : (1, HB*W, Cin)  bf16  halo slab below the tile (clamped)
    # w1_ref    : (Cin, Cn_p)     bf16  BN-folded conv1 weight (Cn padded to 128)
    # b1_ref    : (1, Cn_p)       f32
    # w5_ref    : (4*Cn_p, Cout_p)bf16  BN-folded conv5 weight (blocked per input)
    # b5_ref    : (1, Cout_p)     f32
    # o_ref     : (1, TH*W, Cout_p) f32 lane-dense output tile
    # pad_ref   : VMEM (TH+16, Wp, Cn_p) f32 pooling scratch with -inf halo
    Hs, Wp, cn = pad_ref.shape
    TH = Hs - 16                     # output rows of this tile
    ER = TH + 12                     # extended rows (6-row halo per side)
    thw = o_ref.shape[1]             # TH * W
    W = thw // TH
    cout = o_ref.shape[2]
    hbw = x_top_ref.shape[1]         # HB * W
    NEG = jnp.float32(-1e30)

    t_idx = pl.program_id(1)
    n_tiles = pl.num_programs(1)

    w1 = w1_ref[...]
    b1 = b1_ref[...]

    # ---- conv1 (1x1) + folded BN + SiLU: bf16 MXU, f32 accum/VPU ------------
    def conv1(xv):                   # (R, Cin) bf16 -> (R, cn) f32
        z = jnp.dot(xv, w1, preferred_element_type=jnp.float32) + b1
        return z * jax.nn.sigmoid(z)

    y_cur = conv1(x_cur_ref[0])                           # (TH*W, cn)
    y_top = conv1(x_top_ref[0, hbw - 6 * W:hbw, :])       # (6*W, cn) halo rows
    y_bot = conv1(x_bot_ref[0, 0:6 * W, :])               # (6*W, cn) halo rows

    # ---- scratch: init ONLY the -inf halo strips (interior overwritten) -----
    neg_cap = jnp.full((2, Wp, cn), NEG, jnp.float32)
    pad_ref[0:2, :, :] = neg_cap
    pad_ref[2 + ER:Hs, :, :] = neg_cap
    pad_ref[2:2 + ER, 0:2, :] = jnp.full((ER, 2, cn), NEG, jnp.float32)
    pad_ref[2:2 + ER, W + 2:Wp, :] = jnp.full((ER, Wp - W - 2, cn), NEG,
                                              jnp.float32)

    neg6 = jnp.full((6, W, cn), NEG, jnp.float32)

    def mask_oob():
        # rows outside the real image must be -inf before every pooling pass
        @pl.when(t_idx == 0)
        def _():
            pad_ref[2:8, 2:2 + W, :] = neg6

        @pl.when(t_idx == n_tiles - 1)
        def _():
            pad_ref[2 + ER - 6:2 + ER, 2:2 + W, :] = neg6

    # ---- separable 5x5 max-pool (W pass then H pass) on the extended region --
    def pool5():
        wmax = pad_ref[2:2 + ER, 0:W, :]
        for s in range(1, 5):
            wmax = jnp.maximum(wmax, pad_ref[2:2 + ER, s:s + W, :])
        pad_ref[2:2 + ER, 2:2 + W, :] = wmax
        hmax = pad_ref[0:ER, 2:2 + W, :]
        for s in range(1, 5):
            hmax = jnp.maximum(hmax, pad_ref[s:s + ER, 2:2 + W, :])
        return hmax                                       # (ER, W, cn)

    # write y (top halo / current / bottom halo) into the scratch interior
    pad_ref[2:8, 2:2 + W, :] = y_top.reshape(6, W, cn)
    pad_ref[8:8 + TH, 2:2 + W, :] = y_cur.reshape(TH, W, cn)
    pad_ref[8 + TH:2 + ER, 2:2 + W, :] = y_bot.reshape(6, W, cn)
    mask_oob()
    p1 = pool5()

    pad_ref[2:2 + ER, 2:2 + W, :] = p1
    mask_oob()
    p2 = pool5()

    pad_ref[2:2 + ER, 2:2 + W, :] = p2
    mask_oob()
    p3 = pool5()

    # ---- conv5 (1x1 on channel-concat) + BN + SiLU; concat never materialized.
    # Split-K into one f32 accumulator (MRB accumulates in place on v7x).
    def mm(v, k):                    # v: (TH*W, cn) f32 -> bf16 -> MXU
        return jnp.dot(v.astype(jnp.bfloat16),
                       w5_ref[k * cn:(k + 1) * cn, :],
                       preferred_element_type=jnp.float32)

    acc = mm(y_cur, 0)
    acc = acc + mm(p1[6:6 + TH].reshape(thw, cn), 1)
    acc = acc + mm(p2[6:6 + TH].reshape(thw, cn), 2)
    acc = acc + mm(p3[6:6 + TH].reshape(thw, cn), 3)
    acc = acc + b5_ref[...]
    out = acc * jax.nn.sigmoid(acc)                       # SiLU, full-lane vregs
    o_ref[...] = out.reshape(1, thw, cout).astype(o_ref.dtype)


# --------------------------------------------------------------------------- #
# Wrapper
# --------------------------------------------------------------------------- #
def _fold_bn_1x1(w_oihw, gamma, beta, mean, var, eps=1e-3):
    """Fold eval-mode BatchNorm (eps=0.001 per SPPELAN) into a bias-free 1x1 conv."""
    scale = gamma / jnp.sqrt(var + eps)                   # (Cout,)
    w_mat = (w_oihw[:, :, 0, 0] * scale[:, None]).T       # (Cin, Cout)
    bias = beta - mean * scale                            # (Cout,)
    return w_mat.astype(jnp.float32), bias.astype(jnp.float32)


def _pick_row_tile(H, requested=None, target_rows=32):
    """Choose (TH, HB): TH output rows per grid step, HB halo-fetch block rows."""
    if H % 8 != 0:
        return H, H                  # odd/tiny heights: single row tile
    if requested is not None:
        if requested % 8 != 0 or H % requested != 0:
            raise ValueError("row_tile must be a multiple of 8 that divides H")
        return requested, 8
    th = H
    for cand in range(8, H + 1, 8):  # largest multiple-of-8 divisor <= target
        if H % cand == 0 and cand <= target_rows:
            th = cand
    return th, 8


def _vmem_budget_bytes(TH, HB, W, Cin, Cn_p, Cout_p):
    ER = TH + 12
    Wp = _round_up(W + 4, 8)
    x_blocks = 2 * (TH + 2 * HB) * W * Cin * 2            # bf16, double buffered
    out_block = 2 * TH * W * Cout_p * 4                   # f32, double buffered
    weights = 2 * (Cin * Cn_p * 2 + Cn_p * 4 + 4 * Cn_p * Cout_p * 2 + Cout_p * 4)
    scratch = (TH + 16) * Wp * Cn_p * 4
    live = 4 * ER * W * Cn_p * 4 + 2 * TH * W * Cout_p * 4
    return x_blocks + out_block + weights + scratch + live


def sppelan_forward(x_nchw, params, row_tile=None):
    """SPPELAN forward. x_nchw: (N, Cin, H, W) f32 -> (N, Cout, H, W) f32."""
    (w1, g1, b1, m1, v1, w5, g5, b5, m5, v5) = params
    N, Cin, H, W = x_nchw.shape
    if H < 6:
        raise ValueError("SPPELAN kernel requires H >= 6")
    Cn = w1.shape[0]
    Cout = w5.shape[0]

    w1_mat, bias1 = _fold_bn_1x1(w1, g1, b1, m1, v1)
    w5_mat, bias5 = _fold_bn_1x1(w5, g5, b5, m5, v5)

    # 128-multiple channel padding (zero weights/bias): padded lanes are
    # SiLU(0)=0, survive the pools as 0 and are killed by the zero w5 rows.
    Cn_p = _round_up(Cn, 128)
    Cout_p = _round_up(Cout, 128)
    w1_p = (jnp.zeros((Cin, Cn_p), jnp.float32).at[:, :Cn].set(w1_mat)
            .astype(jnp.bfloat16))
    b1_p = jnp.zeros((1, Cn_p), jnp.float32).at[:, :Cn].set(bias1[None, :])
    w5_p = jnp.zeros((4 * Cn_p, Cout_p), jnp.float32)
    for k in range(4):               # K blocks ordered like cat([y,p1,p2,p3])
        w5_p = w5_p.at[k * Cn_p:k * Cn_p + Cn, :Cout].set(
            w5_mat[k * Cn:(k + 1) * Cn, :])
    w5_p = w5_p.astype(jnp.bfloat16)
    b5_p = jnp.zeros((1, Cout_p), jnp.float32).at[:, :Cout].set(bias5[None, :])

    TH, HB = _pick_row_tile(H, row_tile)
    n_row_tiles = H // TH
    Wp = _round_up(W + 4, 8)
    hblk = TH // HB                  # current-tile size in halo-block units
    last_hb = H // HB - 1

    # NCHW -> NHWC (channels on lanes), flattened over space, bf16 MXU operands.
    # TODO(synk): keep the surrounding graph in NHWC to avoid this extra HBM
    # read+write of the activation outside the kernel.
    x_flat = (jnp.transpose(x_nchw, (0, 2, 3, 1))
              .astype(jnp.bfloat16).reshape(N, H * W, Cin))

    vmem_limit = int(min(64 * 1024 * 1024,
                         max(2 * _vmem_budget_bytes(TH, HB, W, Cin, Cn_p, Cout_p),
                             16 * 1024 * 1024)))

    cost = pl.CostEstimate(
        flops=2 * N * H * W * (Cin * Cn_p + 4 * Cn_p * Cout_p),
        transcendentals=N * H * W * (Cn_p + Cout_p),
        bytes_accessed=(N * H * W * Cin * 2 + N * H * W * Cout_p * 4
                        + (Cin * Cn_p + 4 * Cn_p * Cout_p) * 2
                        + (Cn_p + Cout_p) * 4),
    )

    out_flat = pl.pallas_call(
        sppelan_kernel,
        out_shape=jax.ShapeDtypeStruct((N, H * W, Cout_p), jnp.float32),
        grid_spec=pltpu.PrefetchScalarGridSpec(
            num_scalar_prefetch=0,
            grid=(N, n_row_tiles),
            in_specs=[
                # halo slabs above/below the current tile (clamped at the image
                # border; out-of-image rows are re-masked to -inf in-kernel)
                pl.BlockSpec((1, HB * W, Cin),
                             lambda n, t: (n, jnp.maximum(t * hblk - 1, 0), 0)),
                pl.BlockSpec((1, TH * W, Cin), lambda n, t: (n, t, 0)),
                pl.BlockSpec((1, HB * W, Cin),
                             lambda n, t: (n, jnp.minimum((t + 1) * hblk, last_hb), 0)),
                # folded weights/biases: constant index_map -> fetched once,
                # not re-DMA'd per grid step
                pl.BlockSpec((Cin, Cn_p), lambda n, t: (0, 0)),
                pl.BlockSpec((1, Cn_p), lambda n, t: (0, 0)),
                pl.BlockSpec((4 * Cn_p, Cout_p), lambda n, t: (0, 0)),
                pl.BlockSpec((1, Cout_p), lambda n, t: (0, 0)),
            ],
            out_specs=pl.BlockSpec((1, TH * W, Cout_p), lambda n, t: (n, t, 0)),
            scratch_shapes=[pltpu.VMEM((TH + 16, Wp, Cn_p), jnp.float32)],
        ),
        compiler_params=pltpu.CompilerParams(
            dimension_semantics=("parallel", "parallel"),
            vmem_limit_bytes=vmem_limit),
        cost_estimate=cost,
    )(x_flat, x_flat, x_flat, w1_p, b1_p, w5_p, b5_p)

    out_nhwc = out_flat.reshape(N, H, W, Cout_p)[..., :Cout]
    return jnp.transpose(out_nhwc, (0, 3, 1, 2))


# --------------------------------------------------------------------------- #
# Pure-JAX references
# --------------------------------------------------------------------------- #
def reference_forward(x_nchw, params, emulate_bf16=False):
    """Reference: folded-BN 1x1 convs (einsum) + lax.reduce_window max pools.

    With emulate_bf16=True the matmul operands are rounded to bf16 exactly like
    the kernel does, giving a tight comparison; with False it is the plain f32
    module semantics (loose tolerance vs the bf16 kernel).
    """
    (w1, g1, b1, m1, v1, w5, g5, b5, m5, v5) = params
    x = jnp.transpose(x_nchw, (0, 2, 3, 1)).astype(jnp.float32)     # NHWC
    w1_mat, bias1 = _fold_bn_1x1(w1, g1, b1, m1, v1)
    w5_mat, bias5 = _fold_bn_1x1(w5, g5, b5, m5, v5)

    def cbs(v, wm, bias):
        if emulate_bf16:
            v, wm = v.astype(jnp.bfloat16), wm.astype(jnp.bfloat16)
        y = jnp.einsum("nhwc,cd->nhwd", v, wm,
                       preferred_element_type=jnp.float32) + bias
        return y * jax.nn.sigmoid(y)

    def pool(v):                                 # MaxPool2d(5, 1, 2)
        return jax.lax.reduce_window(
            v, -jnp.inf, jax.lax.max,
            (1, 5, 5, 1), (1, 1, 1, 1),
            [(0, 0), (2, 2), (2, 2), (0, 0)])

    y = cbs(x, w1_mat, bias1)
    p1 = pool(y)
    p2 = pool(p1)
    p3 = pool(p2)
    z = jnp.concatenate([y, p1, p2, p3], axis=-1)
    out = cbs(z, w5_mat, bias5)
    return jnp.transpose(out, (0, 3, 1, 2))


# --------------------------------------------------------------------------- #
if __name__ == "__main__":
    N, Cin, Cout, H, W = 2, 4, 8, 16, 16
    Cn = Cout // 2                               # neck_channels = out_channels // 2

    key = jax.random.PRNGKey(0)
    ks = jax.random.split(key, 11)
    # conv weights in PyTorch OIHW layout (bias-free, BN follows); BN params per Cout.
    w1 = jax.random.normal(ks[0], (Cn, Cin, 1, 1), jnp.float32) * 0.3
    g1 = jax.random.uniform(ks[1], (Cn,), jnp.float32, 0.5, 1.5)
    b1 = jax.random.normal(ks[2], (Cn,), jnp.float32) * 0.1
    m1 = jax.random.normal(ks[3], (Cn,), jnp.float32) * 0.1
    v1 = jax.random.uniform(ks[4], (Cn,), jnp.float32, 0.5, 1.5)
    w5 = jax.random.normal(ks[5], (Cout, 4 * Cn, 1, 1), jnp.float32) * 0.2
    g5 = jax.random.uniform(ks[6], (Cout,), jnp.float32, 0.5, 1.5)
    b5 = jax.random.normal(ks[7], (Cout,), jnp.float32) * 0.1
    m5 = jax.random.normal(ks[8], (Cout,), jnp.float32) * 0.1
    v5 = jax.random.uniform(ks[9], (Cout,), jnp.float32, 0.5, 1.5)
    params = (w1, g1, b1, m1, v1, w5, g5, b5, m5, v5)

    x = jax.random.normal(ks[10], (N, Cin, H, W), jnp.float32)

    # row_tile=8 -> grid (N, 2): exercises the halo'd row tiling.
    out = jax.block_until_ready(sppelan_forward(x, params, row_tile=8))
    ref_f32 = jax.block_until_ready(reference_forward(x, params))
    ref_emu = jax.block_until_ready(reference_forward(x, params, emulate_bf16=True))

    assert out.shape == (N, Cout, H, W), out.shape
    err_emu = float(jnp.max(jnp.abs(out - ref_emu)))
    err_f32 = float(jnp.max(jnp.abs(out - ref_f32)))
    # bf16 MXU operands vs pure-f32 module semantics -> loosened f32 tolerance;
    # the bf16-emulating reference pins the kernel much tighter.
    assert err_emu < 5e-3, ("bf16-emulated mismatch", err_emu, err_f32)
    assert err_f32 < 1e-1, ("f32 reference mismatch", err_emu, err_f32)
    print("KERNEL_OK")
</pallas_src>

<mosaic_0001>
module attributes {stable_mosaic.version = 11 : i64} {
  func.func @sppelan_kernel(%arg0: i32, %arg1: i32, %arg2: memref<1x128x4xbf16, #tpu.memory_space<vmem>>, %arg3: memref<1x128x4xbf16, #tpu.memory_space<vmem>>, %arg4: memref<1x128x4xbf16, #tpu.memory_space<vmem>>, %arg5: memref<4x128xbf16, #tpu.memory_space<vmem>>, %arg6: memref<1x128xf32, #tpu.memory_space<vmem>>, %arg7: memref<512x128xbf16, #tpu.memory_space<vmem>>, %arg8: memref<1x128xf32, #tpu.memory_space<vmem>>, %arg9: memref<1x128x128xf32, #tpu.memory_space<vmem>>, %arg10: memref<24x24x128xf32, #tpu.memory_space<vmem>>) attributes {dimension_semantics = [#tpu.dimension_semantics<parallel>, #tpu.dimension_semantics<parallel>], iteration_bounds = array<i64: 2, 2>, scalar_prefetch = 0 : i64, scratch_operands = 1 : i64, tpu.core_type = #tpu.core_type<tc>, window_params = [{transform_indices = @transform_0, window_bounds = array<i64: 1, 128, 4>}, {transform_indices = @transform_1, window_bounds = array<i64: 1, 128, 4>}, {transform_indices = @transform_2, window_bounds = array<i64: 1, 128, 4>}, {pipeline_mode = #tpu.pipeline_mode<synchronous>, transform_indices = @transform_3, window_bounds = array<i64: 4, 128>}, {pipeline_mode = #tpu.pipeline_mode<synchronous>, transform_indices = @transform_4, window_bounds = array<i64: 1, 128>}, {pipeline_mode = #tpu.pipeline_mode<synchronous>, transform_indices = @transform_5, window_bounds = array<i64: 512, 128>}, {pipeline_mode = #tpu.pipeline_mode<synchronous>, transform_indices = @transform_6, window_bounds = array<i64: 1, 128>}, {transform_indices = @transform_7, window_bounds = array<i64: 1, 128, 128>}]} {
    %c0 = arith.constant 0 : index
    %c0_0 = arith.constant 0 : index
    %0 = vector.load %arg5[%c0, %c0_0] : memref<4x128xbf16, #tpu.memory_space<vmem>>, vector<4x128xbf16>
    %c0_1 = arith.constant 0 : index
    %c0_2 = arith.constant 0 : index
    %1 = vector.load %arg6[%c0_1, %c0_2] : memref<1x128xf32, #tpu.memory_space<vmem>>, vector<1x128xf32>
    %c0_3 = arith.constant 0 : index
    %c0_4 = arith.constant 0 : index
    %c0_5 = arith.constant 0 : index
    %2 = vector.load %arg3[%c0_3, %c0_4, %c0_5] : memref<1x128x4xbf16, #tpu.memory_space<vmem>>, vector<1x128x4xbf16>
    %3 = vector.shape_cast %2 : vector<1x128x4xbf16> to vector<128x4xbf16>
    %cst = arith.constant dense<0.000000e+00> : vector<128x128xf32>
    %4 = tpu.matmul %3, %0, %cst {dimension_numbers = #tpu.dot_dimension_numbers<[1], [0], [0], [1], [0, 0, 1, 1], [], []>} : vector<128x4xbf16>, vector<4x128xbf16>, vector<128x128xf32> -> vector<128x128xf32>
    %5 = vector.broadcast %1 : vector<1x128xf32> to vector<128x128xf32>
    %6 = arith.addf %4, %5 : vector<128x128xf32>
    %7 = arith.negf %6 : vector<128x128xf32>
    %8 = math.exp %7 : vector<128x128xf32>
    %cst_6 = arith.constant 1.000000e+00 : f32
    %9 = vector.broadcast %cst_6 : f32 to vector<128x128xf32>
    %10 = arith.addf %9, %8 : vector<128x128xf32>
    %11 = arith.divf %9, %10 : vector<128x128xf32>
    %12 = arith.mulf %6, %11 : vector<128x128xf32>
    %c0_7 = arith.constant 0 : index
    %c32 = arith.constant 32 : index
    %c0_8 = arith.constant 0 : index
    %13 = vector.load %arg2[%c0_7, %c32, %c0_8] : memref<1x128x4xbf16, #tpu.memory_space<vmem>>, vector<1x96x4xbf16>
    %14 = vector.shape_cast %13 : vector<1x96x4xbf16> to vector<96x4xbf16>
    %cst_9 = arith.constant dense<0.000000e+00> : vector<96x128xf32>
    %15 = tpu.matmul %14, %0, %cst_9 {dimension_numbers = #tpu.dot_dimension_numbers<[1], [0], [0], [1], [0, 0, 1, 1], [], []>} : vector<96x4xbf16>, vector<4x128xbf16>, vector<96x128xf32> -> vector<96x128xf32>
    %16 = vector.broadcast %1 : vector<1x128xf32> to vector<96x128xf32>
    %17 = arith.addf %15, %16 : vector<96x128xf32>
    %18 = arith.negf %17 : vector<96x128xf32>
    %19 = math.exp %18 : vector<96x128xf32>
    %cst_10 = arith.constant 1.000000e+00 : f32
    %20 = vector.broadcast %cst_10 : f32 to vector<96x128xf32>
    %21 = arith.addf %20, %19 : vector<96x128xf32>
    %22 = arith.divf %20, %21 : vector<96x128xf32>
    %23 = arith.mulf %17, %22 : vector<96x128xf32>
    %c0_11 = arith.constant 0 : index
    %c0_12 = arith.constant 0 : index
    %c0_13 = arith.constant 0 : index
    %24 = vector.load %arg4[%c0_11, %c0_12, %c0_13] : memref<1x128x4xbf16, #tpu.memory_space<vmem>>, vector<1x96x4xbf16>
    %25 = vector.shape_cast %24 : vector<1x96x4xbf16> to vector<96x4xbf16>
    %cst_14 = arith.constant dense<0.000000e+00> : vector<96x128xf32>
    %26 = tpu.matmul %25, %0, %cst_14 {dimension_numbers = #tpu.dot_dimension_numbers<[1], [0], [0], [1], [0, 0, 1, 1], [], []>} : vector<96x4xbf16>, vector<4x128xbf16>, vector<96x128xf32> -> vector<96x128xf32>
    %27 = vector.broadcast %1 : vector<1x128xf32> to vector<96x128xf32>
    %28 = arith.addf %26, %27 : vector<96x128xf32>
    %29 = arith.negf %28 : vector<96x128xf32>
    %30 = math.exp %29 : vector<96x128xf32>
    %cst_15 = arith.constant 1.000000e+00 : f32
    %31 = vector.broadcast %cst_15 : f32 to vector<96x128xf32>
    %32 = arith.addf %31, %30 : vector<96x128xf32>
    %33 = arith.divf %31, %32 : vector<96x128xf32>
    %34 = arith.mulf %28, %33 : vector<96x128xf32>
    %cst_16 = arith.constant -1.000000e+30 : f32
    %35 = vector.broadcast %cst_16 : f32 to vector<2x24x128xf32>
    %c0_17 = arith.constant 0 : index
    %c0_18 = arith.constant 0 : index
    %c0_19 = arith.constant 0 : index
    %36 = vector.load %arg10[%c0_17, %c0_18, %c0_19] : memref<24x24x128xf32, #tpu.memory_space<vmem>>, vector<2x24x128xf32>
    tpu.vector_store %arg10[%c0_17, %c0_18, %c0_19], %35 {strides = array<i32>} : memref<24x24x128xf32, #tpu.memory_space<vmem>>, vector<2x24x128xf32>,
    %c22 = arith.constant 22 : index
    %c0_20 = arith.constant 0 : index
    %c0_21 = arith.constant 0 : index
    %37 = vector.load %arg10[%c22, %c0_20, %c0_21] : memref<24x24x128xf32, #tpu.memory_space<vmem>>, vector<2x24x128xf32>
    tpu.vector_store %arg10[%c22, %c0_20, %c0_21], %35 {strides = array<i32>} : memref<24x24x128xf32, #tpu.memory_space<vmem>>, vector<2x24x128xf32>,
    %cst_22 = arith.constant -1.000000e+30 : f32
    %38 = vector.broadcast %cst_22 : f32 to vector<20x2x128xf32>
    %c2 = arith.constant 2 : index
    %c0_23 = arith.constant 0 : index
    %c0_24 = arith.constant 0 : index
    %39 = vector.load %arg10[%c2, %c0_23, %c0_24] : memref<24x24x128xf32, #tpu.memory_space<vmem>>, vector<20x2x128xf32>
    tpu.vector_store %arg10[%c2, %c0_23, %c0_24], %38 {strides = array<i32>} : memref<24x24x128xf32, #tpu.memory_space<vmem>>, vector<20x2x128xf32>,
    %cst_25 = arith.constant -1.000000e+30 : f32
    %40 = vector.broadcast %cst_25 : f32 to vector<20x6x128xf32>
    %c2_26 = arith.constant 2 : index
    %c18 = arith.constant 18 : index
    %c0_27 = arith.constant 0 : index
    %41 = vector.load %arg10[%c2_26, %c18, %c0_27] : memref<24x24x128xf32, #tpu.memory_space<vmem>>, vector<20x6x128xf32>
    tpu.vector_store %arg10[%c2_26, %c18, %c0_27], %40 {strides = array<i32>} : memref<24x24x128xf32, #tpu.memory_space<vmem>>, vector<20x6x128xf32>,
    %cst_28 = arith.constant -1.000000e+30 : f32
    %42 = vector.broadcast %cst_28 : f32 to vector<6x16x128xf32>
    %43 = vector.shape_cast %23 : vector<96x128xf32> to vector<6x16x128xf32>
    %c2_29 = arith.constant 2 : index
    %c2_30 = arith.constant 2 : index
    %c0_31 = arith.constant 0 : index
    %44 = vector.load %arg10[%c2_29, %c2_30, %c0_31] : memref<24x24x128xf32, #tpu.memory_space<vmem>>, vector<6x16x128xf32>
    tpu.vector_store %arg10[%c2_29, %c2_30, %c0_31], %43 {strides = array<i32>} : memref<24x24x128xf32, #tpu.memory_space<vmem>>, vector<6x16x128xf32>,
    %45 = vector.shape_cast %12 : vector<128x128xf32> to vector<8x16x128xf32>
    %c8 = arith.constant 8 : index
    %c2_32 = arith.constant 2 : index
    %c0_33 = arith.constant 0 : index
    %46 = vector.load %arg10[%c8, %c2_32, %c0_33] : memref<24x24x128xf32, #tpu.memory_space<vmem>>, vector<8x16x128xf32>
    tpu.vector_store %arg10[%c8, %c2_32, %c0_33], %45 {strides = array<i32>} : memref<24x24x128xf32, #tpu.memory_space<vmem>>, vector<8x16x128xf32>,
    %47 = vector.shape_cast %34 : vector<96x128xf32> to vector<6x16x128xf32>
    %c16 = arith.constant 16 : index
    %c2_34 = arith.constant 2 : index
    %c0_35 = arith.constant 0 : index
    %48 = vector.load %arg10[%c16, %c2_34, %c0_35] : memref<24x24x128xf32, #tpu.memory_space<vmem>>, vector<6x16x128xf32>
    tpu.vector_store %arg10[%c16, %c2_34, %c0_35], %47 {strides = array<i32>} : memref<24x24x128xf32, #tpu.memory_space<vmem>>, vector<6x16x128xf32>,
    %c0_i32 = arith.constant 0 : i32
    %49 = arith.cmpi eq, %arg1, %c0_i32 : i32
    %50 = arith.extui %49 : i1 to i32
    %c0_i32_36 = arith.constant 0 : i32
    %51 = arith.cmpi ne, %50, %c0_i32_36 : i32
    scf.if %51 {
      %c2_163 = arith.constant 2 : index
      %c2_164 = arith.constant 2 : index
      %c0_165 = arith.constant 0 : index
      %158 = vector.load %arg10[%c2_163, %c2_164, %c0_165] : memref<24x24x128xf32, #tpu.memory_space<vmem>>, vector<6x16x128xf32>
      tpu.vector_store %arg10[%c2_163, %c2_164, %c0_165], %42 {strides = array<i32>} : memref<24x24x128xf32, #tpu.memory_space<vmem>>, vector<6x16x128xf32>,
    } else {
    }
    %c1_i32 = arith.constant 1 : i32
    %52 = arith.cmpi eq, %arg1, %c1_i32 : i32
    %53 = arith.extui %52 : i1 to i32
    %c0_i32_37 = arith.constant 0 : i32
    %54 = arith.cmpi ne, %53, %c0_i32_37 : i32
    scf.if %54 {
      %c16_163 = arith.constant 16 : index
      %c2_164 = arith.constant 2 : index
      %c0_165 = arith.constant 0 : index
      %158 = vector.load %arg10[%c16_163, %c2_164, %c0_165] : memref<24x24x128xf32, #tpu.memory_space<vmem>>, vector<6x16x128xf32>
      tpu.vector_store %arg10[%c16_163, %c2_164, %c0_165], %42 {strides = array<i32>} : memref<24x24x128xf32, #tpu.memory_space<vmem>>, vector<6x16x128xf32>,
    } else {
    }
    %c2_38 = arith.constant 2 : index
    %c0_39 = arith.constant 0 : index
    %c0_40 = arith.constant 0 : index
    %55 = vector.load %arg10[%c2_38, %c0_39, %c0_40] : memref<24x24x128xf32, #tpu.memory_space<vmem>>, vector<20x16x128xf32>
    %c2_41 = arith.constant 2 : index
    %c1 = arith.constant 1 : index
    %c0_42 = arith.constant 0 : index
    %56 = vector.load %arg10[%c2_41, %c1, %c0_42] : memref<24x24x128xf32, #tpu.memory_space<vmem>>, vector<20x16x128xf32>
    %57 = arith.maximumf %55, %56 : vector<20x16x128xf32>
    %c2_43 = arith.constant 2 : index
    %c2_44 = arith.constant 2 : index
    %c0_45 = arith.constant 0 : index
    %58 = vector.load %arg10[%c2_43, %c2_44, %c0_45] : memref<24x24x128xf32, #tpu.memory_space<vmem>>, vector<20x16x128xf32>
    %59 = arith.maximumf %57, %58 : vector<20x16x128xf32>
    %c2_46 = arith.constant 2 : index
    %c3 = arith.constant 3 : index
    %c0_47 = arith.constant 0 : index
    %60 = vector.load %arg10[%c2_46, %c3, %c0_47] : memref<24x24x128xf32, #tpu.memory_space<vmem>>, vector<20x16x128xf32>
    %61 = arith.maximumf %59, %60 : vector<20x16x128xf32>
    %c2_48 = arith.constant 2 : index
    %c4 = arith.constant 4 : index
    %c0_49 = arith.constant 0 : index
    %62 = vector.load %arg10[%c2_48, %c4, %c0_49] : memref<24x24x128xf32, #tpu.memory_space<vmem>>, vector<20x16x128xf32>
    %63 = arith.maximumf %61, %62 : vector<20x16x128xf32>
    %c2_50 = arith.constant 2 : index
    %c2_51 = arith.constant 2 : index
    %c0_52 = arith.constant 0 : index
    %64 = vector.load %arg10[%c2_50, %c2_51, %c0_52] : memref<24x24x128xf32, #tpu.memory_space<vmem>>, vector<20x16x128xf32>
    tpu.vector_store %arg10[%c2_50, %c2_51, %c0_52], %63 {strides = array<i32>} : memref<24x24x128xf32, #tpu.memory_space<vmem>>, vector<20x16x128xf32>,
    %c0_53 = arith.constant 0 : index
    %c2_54 = arith.constant 2 : index
    %c0_55 = arith.constant 0 : index
    %65 = vector.load %arg10[%c0_53, %c2_54, %c0_55] : memref<24x24x128xf32, #tpu.memory_space<vmem>>, vector<20x16x128xf32>
    %c1_56 = arith.constant 1 : index
    %c2_57 = arith.constant 2 : index
    %c0_58 = arith.constant 0 : index
    %66 = vector.load %arg10[%c1_56, %c2_57, %c0_58] : memref<24x24x128xf32, #tpu.memory_space<vmem>>, vector<20x16x128xf32>
    %67 = arith.maximumf %65, %66 : vector<20x16x128xf32>
    %c2_59 = arith.constant 2 : index
    %c2_60 = arith.constant 2 : index
    %c0_61 = arith.constant 0 : index
    %68 = vector.load %arg10[%c2_59, %c2_60, %c0_61] : memref<24x24x128xf32, #tpu.memory_space<vmem>>, vector<20x16x128xf32>
    %69 = arith.maximumf %67, %68 : vector<20x16x128xf32>
    %c3_62 = arith.constant 3 : index
    %c2_63 = arith.constant 2 : index
    %c0_64 = arith.constant 0 : index
    %70 = vector.load %arg10[%c3_62, %c2_63, %c0_64] : memref<24x24x128xf32, #tpu.memory_space<vmem>>, vector<20x16x128xf32>
    %71 = arith.maximumf %69, %70 : vector<20x16x128xf32>
    %c4_65 = arith.constant 4 : index
    %c2_66 = arith.constant 2 : index
    %c0_67 = arith.constant 0 : index
    %72 = vector.load %arg10[%c4_65, %c2_66, %c0_67] : memref<24x24x128xf32, #tpu.memory_space<vmem>>, vector<20x16x128xf32>
    %73 = arith.maximumf %71, %72 : vector<20x16x128xf32>
    %c2_68 = arith.constant 2 : index
    %c2_69 = arith.constant 2 : index
    %c0_70 = arith.constant 0 : index
    %74 = vector.load %arg10[%c2_68, %c2_69, %c0_70] : memref<24x24x128xf32, #tpu.memory_space<vmem>>, vector<20x16x128xf32>
    tpu.vector_store %arg10[%c2_68, %c2_69, %c0_70], %73 {strides = array<i32>} : memref<24x24x128xf32, #tpu.memory_space<vmem>>, vector<20x16x128xf32>,
    %c0_i32_71 = arith.constant 0 : i32
    %75 = arith.cmpi eq, %arg1, %c0_i32_71 : i32
    %76 = arith.extui %75 : i1 to i32
    %c0_i32_72 = arith.constant 0 : i32
    %77 = arith.cmpi ne, %76, %c0_i32_72 : i32
    scf.if %77 {
      %c2_163 = arith.constant 2 : index
      %c2_164 = arith.constant 2 : index
      %c0_165 = arith.constant 0 : index
      %158 = vector.load %arg10[%c2_163, %c2_164, %c0_165] : memref<24x24x128xf32, #tpu.memory_space<vmem>>, vector<6x16x128xf32>
      tpu.vector_store %arg10[%c2_163, %c2_164, %c0_165], %42 {strides = array<i32>} : memref<24x24x128xf32, #tpu.memory_space<vmem>>, vector<6x16x128xf32>,
    } else {
    }
    %c1_i32_73 = arith.constant 1 : i32
    %78 = arith.cmpi eq, %arg1, %c1_i32_73 : i32
    %79 = arith.extui %78 : i1 to i32
    %c0_i32_74 = arith.constant 0 : i32
    %80 = arith.cmpi ne, %79, %c0_i32_74 : i32
    scf.if %80 {
      %c16_163 = arith.constant 16 : index
      %c2_164 = arith.constant 2 : index
      %c0_165 = arith.constant 0 : index
      %158 = vector.load %arg10[%c16_163, %c2_164, %c0_165] : memref<24x24x128xf32, #tpu.memory_space<vmem>>, vector<6x16x128xf32>
      tpu.vector_store %arg10[%c16_163, %c2_164, %c0_165], %42 {strides = array<i32>} : memref<24x24x128xf32, #tpu.memory_space<vmem>>, vector<6x16x128xf32>,
    } else {
    }
    %c2_75 = arith.constant 2 : index
    %c0_76 = arith.constant 0 : index
    %c0_77 = arith.constant 0 : index
    %81 = vector.load %arg10[%c2_75, %c0_76, %c0_77] : memref<24x24x128xf32, #tpu.memory_space<vmem>>, vector<20x16x128xf32>
    %c2_78 = arith.constant 2 : index
    %c1_79 = arith.constant 1 : index
    %c0_80 = arith.constant 0 : index
    %82 = vector.load %arg10[%c2_78, %c1_79, %c0_80] : memref<24x24x128xf32, #tpu.memory_space<vmem>>, vector<20x16x128xf32>
    %83 = arith.maximumf %81, %82 : vector<20x16x128xf32>
    %c2_81 = arith.constant 2 : index
    %c2_82 = arith.constant 2 : index
    %c0_83 = arith.constant 0 : index
    %84 = vector.load %arg10[%c2_81, %c2_82, %c0_83] : memref<24x24x128xf32, #tpu.memory_space<vmem>>, vector<20x16x128xf32>
    %85 = arith.maximumf %83, %84 : vector<20x16x128xf32>
    %c2_84 = arith.constant 2 : index
    %c3_85 = arith.constant 3 : index
    %c0_86 = arith.constant 0 : index
    %86 = vector.load %arg10[%c2_84, %c3_85, %c0_86] : memref<24x24x128xf32, #tpu.memory_space<vmem>>, vector<20x16x128xf32>
    %87 = arith.maximumf %85, %86 : vector<20x16x128xf32>
    %c2_87 = arith.constant 2 : index
    %c4_88 = arith.constant 4 : index
    %c0_89 = arith.constant 0 : index
    %88 = vector.load %arg10[%c2_87, %c4_88, %c0_89] : memref<24x24x128xf32, #tpu.memory_space<vmem>>, vector<20x16x128xf32>
    %89 = arith.maximumf %87, %88 : vector<20x16x128xf32>
    %c2_90 = arith.constant 2 : index
    %c2_91 = arith.constant 2 : index
    %c0_92 = arith.constant 0 : index
    %90 = vector.load %arg10[%c2_90, %c2_91, %c0_92] : memref<24x24x128xf32, #tpu.memory_space<vmem>>, vector<20x16x128xf32>
    tpu.vector_store %arg10[%c2_90, %c2_91, %c0_92], %89 {strides = array<i32>} : memref<24x24x128xf32, #tpu.memory_space<vmem>>, vector<20x16x128xf32>,
    %c0_93 = arith.constant 0 : index
    %c2_94 = arith.constant 2 : index
    %c0_95 = arith.constant 0 : index
    %91 = vector.load %arg10[%c0_93, %c2_94, %c0_95] : memref<24x24x128xf32, #tpu.memory_space<vmem>>, vector<20x16x128xf32>
    %c1_96 = arith.constant 1 : index
    %c2_97 = arith.constant 2 : index
    %c0_98 = arith.constant 0 : index
    %92 = vector.load %arg10[%c1_96, %c2_97, %c0_98] : memref<24x24x128xf32, #tpu.memory_space<vmem>>, vector<20x16x128xf32>
    %93 = arith.maximumf %91, %92 : vector<20x16x128xf32>
    %c2_99 = arith.constant 2 : index
    %c2_100 = arith.constant 2 : index
    %c0_101 = arith.constant 0 : index
    %94 = vector.load %arg10[%c2_99, %c2_100, %c0_101] : memref<24x24x128xf32, #tpu.memory_space<vmem>>, vector<20x16x128xf32>
    %95 = arith.maximumf %93, %94 : vector<20x16x128xf32>
    %c3_102 = arith.constant 3 : index
    %c2_103 = arith.constant 2 : index
    %c0_104 = arith.constant 0 : index
    %96 = vector.load %arg10[%c3_102, %c2_103, %c0_104] : memref<24x24x128xf32, #tpu.memory_space<vmem>>, vector<20x16x128xf32>
    %97 = arith.maximumf %95, %96 : vector<20x16x128xf32>
    %c4_105 = arith.constant 4 : index
    %c2_106 = arith.constant 2 : index
    %c0_107 = arith.constant 0 : index
    %98 = vector.load %arg10[%c4_105, %c2_106, %c0_107] : memref<24x24x128xf32, #tpu.memory_space<vmem>>, vector<20x16x128xf32>
    %99 = arith.maximumf %97, %98 : vector<20x16x128xf32>
    %c2_108 = arith.constant 2 : index
    %c2_109 = arith.constant 2 : index
    %c0_110 = arith.constant 0 : index
    %100 = vector.load %arg10[%c2_108, %c2_109, %c0_110] : memref<24x24x128xf32, #tpu.memory_space<vmem>>, vector<20x16x128xf32>
    tpu.vector_store %arg10[%c2_108, %c2_109, %c0_110], %99 {strides = array<i32>} : memref<24x24x128xf32, #tpu.memory_space<vmem>>, vector<20x16x128xf32>,
    %c0_i32_111 = arith.constant 0 : i32
    %101 = arith.cmpi eq, %arg1, %c0_i32_111 : i32
    %102 = arith.extui %101 : i1 to i32
    %c0_i32_112 = arith.constant 0 : i32
    %103 = arith.cmpi ne, %102, %c0_i32_112 : i32
    scf.if %103 {
      %c2_163 = arith.constant 2 : index
      %c2_164 = arith.constant 2 : index
      %c0_165 = arith.constant 0 : index
      %158 = vector.load %arg10[%c2_163, %c2_164, %c0_165] : memref<24x24x128xf32, #tpu.memory_space<vmem>>, vector<6x16x128xf32>
      tpu.vector_store %arg10[%c2_163, %c2_164, %c0_165], %42 {strides = array<i32>} : memref<24x24x128xf32, #tpu.memory_space<vmem>>, vector<6x16x128xf32>,
    } else {
    }
    %c1_i32_113 = arith.constant 1 : i32
    %104 = arith.cmpi eq, %arg1, %c1_i32_113 : i32
    %105 = arith.extui %104 : i1 to i32
    %c0_i32_114 = arith.constant 0 : i32
    %106 = arith.cmpi ne, %105, %c0_i32_114 : i32
    scf.if %106 {
      %c16_163 = arith.constant 16 : index
      %c2_164 = arith.constant 2 : index
      %c0_165 = arith.constant 0 : index
      %158 = vector.load %arg10[%c16_163, %c2_164, %c0_165] : memref<24x24x128xf32, #tpu.memory_space<vmem>>, vector<6x16x128xf32>
      tpu.vector_store %arg10[%c16_163, %c2_164, %c0_165], %42 {strides = array<i32>} : memref<24x24x128xf32, #tpu.memory_space<vmem>>, vector<6x16x128xf32>,
    } else {
    }
    %c2_115 = arith.constant 2 : index
    %c0_116 = arith.constant 0 : index
    %c0_117 = arith.constant 0 : index
    %107 = vector.load %arg10[%c2_115, %c0_116, %c0_117] : memref<24x24x128xf32, #tpu.memory_space<vmem>>, vector<20x16x128xf32>
    %c2_118 = arith.constant 2 : index
    %c1_119 = arith.constant 1 : index
    %c0_120 = arith.constant 0 : index
    %108 = vector.load %arg10[%c2_118, %c1_119, %c0_120] : memref<24x24x128xf32, #tpu.memory_space<vmem>>, vector<20x16x128xf32>
    %109 = arith.maximumf %107, %108 : vector<20x16x128xf32>
    %c2_121 = arith.constant 2 : index
    %c2_122 = arith.constant 2 : index
    %c0_123 = arith.constant 0 : index
    %110 = vector.load %arg10[%c2_121, %c2_122, %c0_123] : memref<24x24x128xf32, #tpu.memory_space<vmem>>, vector<20x16x128xf32>
    %111 = arith.maximumf %109, %110 : vector<20x16x128xf32>
    %c2_124 = arith.constant 2 : index
    %c3_125 = arith.constant 3 : index
    %c0_126 = arith.constant 0 : index
    %112 = vector.load %arg10[%c2_124, %c3_125, %c0_126] : memref<24x24x128xf32, #tpu.memory_space<vmem>>, vector<20x16x128xf32>
    %113 = arith.maximumf %111, %112 : vector<20x16x128xf32>
    %c2_127 = arith.constant 2 : index
    %c4_128 = arith.constant 4 : index
    %c0_129 = arith.constant 0 : index
    %114 = vector.load %arg10[%c2_127, %c4_128, %c0_129] : memref<24x24x128xf32, #tpu.memory_space<vmem>>, vector<20x16x128xf32>
    %115 = arith.maximumf %113, %114 : vector<20x16x128xf32>
    %c2_130 = arith.constant 2 : index
    %c2_131 = arith.constant 2 : index
    %c0_132 = arith.constant 0 : index
    %116 = vector.load %arg10[%c2_130, %c2_131, %c0_132] : memref<24x24x128xf32, #tpu.memory_space<vmem>>, vector<20x16x128xf32>
    tpu.vector_store %arg10[%c2_130, %c2_131, %c0_132], %115 {strides = array<i32>} : memref<24x24x128xf32, #tpu.memory_space<vmem>>, vector<20x16x128xf32>,
    %c0_133 = arith.constant 0 : index
    %c2_134 = arith.constant 2 : index
    %c0_135 = arith.constant 0 : index
    %117 = vector.load %arg10[%c0_133, %c2_134, %c0_135] : memref<24x24x128xf32, #tpu.memory_space<vmem>>, vector<20x16x128xf32>
    %c1_136 = arith.constant 1 : index
    %c2_137 = arith.constant 2 : index
    %c0_138 = arith.constant 0 : index
    %118 = vector.load %arg10[%c1_136, %c2_137, %c0_138] : memref<24x24x128xf32, #tpu.memory_space<vmem>>, vector<20x16x128xf32>
    %119 = arith.maximumf %117, %118 : vector<20x16x128xf32>
    %c2_139 = arith.constant 2 : index
    %c2_140 = arith.constant 2 : index
    %c0_141 = arith.constant 0 : index
    %120 = vector.load %arg10[%c2_139, %c2_140, %c0_141] : memref<24x24x128xf32, #tpu.memory_space<vmem>>, vector<20x16x128xf32>
    %121 = arith.maximumf %119, %120 : vector<20x16x128xf32>
    %c3_142 = arith.constant 3 : index
    %c2_143 = arith.constant 2 : index
    %c0_144 = arith.constant 0 : index
    %122 = vector.load %arg10[%c3_142, %c2_143, %c0_144] : memref<24x24x128xf32, #tpu.memory_space<vmem>>, vector<20x16x128xf32>
    %123 = arith.maximumf %121, %122 : vector<20x16x128xf32>
    %c4_145 = arith.constant 4 : index
    %c2_146 = arith.constant 2 : index
    %c0_147 = arith.constant 0 : index
    %124 = vector.load %arg10[%c4_145, %c2_146, %c0_147] : memref<24x24x128xf32, #tpu.memory_space<vmem>>, vector<20x16x128xf32>
    %125 = arith.maximumf %123, %124 : vector<20x16x128xf32>
    %126 = arith.truncf %12 : vector<128x128xf32> to vector<128x128xbf16>
    %c0_148 = arith.constant 0 : index
    %c0_149 = arith.constant 0 : index
    %127 = vector.load %arg7[%c0_148, %c0_149] : memref<512x128xbf16, #tpu.memory_space<vmem>>, vector<128x128xbf16>
    %cst_150 = arith.constant dense<0.000000e+00> : vector<128x128xf32>
    %128 = tpu.matmul %126, %127, %cst_150 {dimension_numbers = #tpu.dot_dimension_numbers<[1], [0], [0], [1], [0, 0, 1, 1], [], []>} : vector<128x128xbf16>, vector<128x128xbf16>, vector<128x128xf32> -> vector<128x128xf32>
    %129 = vector.extract_strided_slice %73 {offsets = [6, 0, 0], sizes = [8, 16, 128], strides = [1, 1, 1]} : vector<20x16x128xf32> to vector<8x16x128xf32>
    %130 = vector.shape_cast %129 : vector<8x16x128xf32> to vector<128x128xf32>
    %131 = arith.truncf %130 : vector<128x128xf32> to vector<128x128xbf16>
    %c128 = arith.constant 128 : index
    %c0_151 = arith.constant 0 : index
    %132 = vector.load %arg7[%c128, %c0_151] : memref<512x128xbf16, #tpu.memory_space<vmem>>, vector<128x128xbf16>
    %cst_152 = arith.constant dense<0.000000e+00> : vector<128x128xf32>
    %133 = tpu.matmul %131, %132, %cst_152 {dimension_numbers = #tpu.dot_dimension_numbers<[1], [0], [0], [1], [0, 0, 1, 1], [], []>} : vector<128x128xbf16>, vector<128x128xbf16>, vector<128x128xf32> -> vector<128x128xf32>
    %134 = arith.addf %128, %133 : vector<128x128xf32>
    %135 = vector.extract_strided_slice %99 {offsets = [6, 0, 0], sizes = [8, 16, 128], strides = [1, 1, 1]} : vector<20x16x128xf32> to vector<8x16x128xf32>
    %136 = vector.shape_cast %135 : vector<8x16x128xf32> to vector<128x128xf32>
    %137 = arith.truncf %136 : vector<128x128xf32> to vector<128x128xbf16>
    %c256 = arith.constant 256 : index
    %c0_153 = arith.constant 0 : index
    %138 = vector.load %arg7[%c256, %c0_153] : memref<512x128xbf16, #tpu.memory_space<vmem>>, vector<128x128xbf16>
    %cst_154 = arith.constant dense<0.000000e+00> : vector<128x128xf32>
    %139 = tpu.matmul %137, %138, %cst_154 {dimension_numbers = #tpu.dot_dimension_numbers<[1], [0], [0], [1], [0, 0, 1, 1], [], []>} : vector<128x128xbf16>, vector<128x128xbf16>, vector<128x128xf32> -> vector<128x128xf32>
    %140 = arith.addf %134, %139 : vector<128x128xf32>
    %141 = vector.extract_strided_slice %125 {offsets = [6, 0, 0], sizes = [8, 16, 128], strides = [1, 1, 1]} : vector<20x16x128xf32> to vector<8x16x128xf32>
    %142 = vector.shape_cast %141 : vector<8x16x128xf32> to vector<128x128xf32>
    %143 = arith.truncf %142 : vector<128x128xf32> to vector<128x128xbf16>
    %c384 = arith.constant 384 : index
    %c0_155 = arith.constant 0 : index
    %144 = vector.load %arg7[%c384, %c0_155] : memref<512x128xbf16, #tpu.memory_space<vmem>>, vector<128x128xbf16>
    %cst_156 = arith.constant dense<0.000000e+00> : vector<128x128xf32>
    %145 = tpu.matmul %143, %144, %cst_156 {dimension_numbers = #tpu.dot_dimension_numbers<[1], [0], [0], [1], [0, 0, 1, 1], [], []>} : vector<128x128xbf16>, vector<128x128xbf16>, vector<128x128xf32> -> vector<128x128xf32>
    %146 = arith.addf %140, %145 : vector<128x128xf32>
    %c0_157 = arith.constant 0 : index
    %c0_158 = arith.constant 0 : index
    %147 = vector.load %arg8[%c0_157, %c0_158] : memref<1x128xf32, #tpu.memory_space<vmem>>, vector<1x128xf32>
    %148 = vector.broadcast %147 : vector<1x128xf32> to vector<128x128xf32>
    %149 = arith.addf %146, %148 : vector<128x128xf32>
    %150 = arith.negf %149 : vector<128x128xf32>
    %151 = math.exp %150 : vector<128x128xf32>
    %cst_159 = arith.constant 1.000000e+00 : f32
    %152 = vector.broadcast %cst_159 : f32 to vector<128x128xf32>
    %153 = arith.addf %152, %151 : vector<128x128xf32>
    %154 = arith.divf %152, %153 : vector<128x128xf32>
    %155 = arith.mulf %149, %154 : vector<128x128xf32>
    %156 = vector.shape_cast %155 : vector<128x128xf32> to vector<1x128x128xf32>
    %c0_160 = arith.constant 0 : index
    %c0_161 = arith.constant 0 : index
    %c0_162 = arith.constant 0 : index
    %157 = vector.load %arg9[%c0_160, %c0_161, %c0_162] : memref<1x128x128xf32, #tpu.memory_space<vmem>>, vector<1x128x128xf32>
    tpu.vector_store %arg9[%c0_160, %c0_161, %c0_162], %156 {strides = array<i32>} : memref<1x128x128xf32, #tpu.memory_space<vmem>>, vector<1x128x128xf32>,
    return
  }
  func.func @transform_0(%arg0: i32, %arg1: i32) -> (i32, i32, i32) {
    %c1_i32 = arith.constant 1 : i32
    %0 = arith.muli %arg1, %c1_i32 : i32
    %c1_i32_0 = arith.constant 1 : i32
    %1 = arith.subi %0, %c1_i32_0 : i32
    %c0_i32 = arith.constant 0 : i32
    %2 = arith.maxsi %1, %c0_i32 : i32
    %c0_i32_1 = arith.constant 0 : i32
    %c0_i32_2 = arith.constant 0 : i32
    return %arg0, %2, %c0_i32_1 : i32, i32, i32
  }
  func.func @transform_1(%arg0: i32, %arg1: i32) -> (i32, i32, i32) {
    %c0_i32 = arith.constant 0 : i32
    %c0_i32_0 = arith.constant 0 : i32
    return %arg0, %arg1, %c0_i32 : i32, i32, i32
  }
  func.func @transform_2(%arg0: i32, %arg1: i32) -> (i32, i32, i32) {
    %c1_i32 = arith.constant 1 : i32
    %0 = arith.addi %arg1, %c1_i32 : i32
    %c1_i32_0 = arith.constant 1 : i32
    %1 = arith.muli %0, %c1_i32_0 : i32
    %c1_i32_1 = arith.constant 1 : i32
    %2 = arith.minsi %1, %c1_i32_1 : i32
    %c0_i32 = arith.constant 0 : i32
    %c0_i32_2 = arith.constant 0 : i32
    return %arg0, %2, %c0_i32 : i32, i32, i32
  }
  func.func @transform_3(%arg0: i32, %arg1: i32) -> (i32, i32) {
    %c0_i32 = arith.constant 0 : i32
    %c0_i32_0 = arith.constant 0 : i32
    %c0_i32_1 = arith.constant 0 : i32
    return %c0_i32, %c0_i32_0 : i32, i32
  }
  func.func @transform_4(%arg0: i32, %arg1: i32) -> (i32, i32) {
    %c0_i32 = arith.constant 0 : i32
    %c0_i32_0 = arith.constant 0 : i32
    %c0_i32_1 = arith.constant 0 : i32
    return %c0_i32, %c0_i32_0 : i32, i32
  }
  func.func @transform_5(%arg0: i32, %arg1: i32) -> (i32, i32) {
    %c0_i32 = arith.constant 0 : i32
    %c0_i32_0 = arith.constant 0 : i32
    %c0_i32_1 = arith.constant 0 : i32
    return %c0_i32, %c0_i32_0 : i32, i32
  }
  func.func @transform_6(%arg0: i32, %arg1: i32) -> (i32, i32) {
    %c0_i32 = arith.constant 0 : i32
    %c0_i32_0 = arith.constant 0 : i32
    %c0_i32_1 = arith.constant 0 : i32
    return %c0_i32, %c0_i32_0 : i32, i32
  }
  func.func @transform_7(%arg0: i32, %arg1: i32) -> (i32, i32, i32) {
    %c0_i32 = arith.constant 0 : i32
    %c0_i32_0 = arith.constant 0 : i32
    return %arg0, %arg1, %c0_i32 : i32, i32, i32
  }
}

</mosaic_0001>

<bundles_post_ra>
// kernel: tpu_custom_call.1
= control target key start
LH: loop header
LB: loop body
LE: loop exit
PB: predicated region body
PF: predicated region fallthrough
CT: control target
= control target key end

     0   :  { %s7049_s0 = inlined_call_operand.vmem [shape: bf16[2,256,4], index: 0, kind: input, shape index: {}]   ;;  %s7050_s1 = inlined_call_operand.vmem [shape: bf16[2,256,4], index: 1, kind: input, shape index: {}]   ;;  %s7051_s2 = inlined_call_operand.vmem [shape: bf16[2,256,4], index: 2, kind: input, shape index: {}]   ;;  %s7052_s3 = inlined_call_operand.vmem [shape: bf16[4,128], index: 3, kind: input, shape index: {}]   ;;  %s7053_s4 = inlined_call_operand.vmem [shape: f32[1,128], index: 4, kind: input, shape index: {}]   ;;  %s7054_s5 = inlined_call_operand.vmem [shape: bf16[512,128], index: 5, kind: input, shape index: {}]   ;;  %s7055_s6 = inlined_call_operand.vmem [shape: f32[1,128], index: 6, kind: input, shape index: {}]   ;;  %s7056_s7 = inlined_call_operand.hbm [shape: f32[2,256,128], index: 7, kind: output, shape index: {}]  }
   0x1   :  { %7119 = sst [smem:[#allocation39_spill]] %s7052_s3 }
   0x2   :  { %12 = vsyncpa [#allocation4], 0 }
   0x3   :  { %14 = vsyncpa [#allocation4 + $0x1], 0  ;;  %s5443_s24 = smov 0   ;;  %s5445_s25 = smov 0  }
   0x4   :  { %s5447_s26 = smov 0   ;;  %s5449_s27 = smov 0  }
   0x5   :  { %s5451_s28 = smov 0   ;;  %s5453_s29 = smov 0  }
   0x6   :  { %s5455_s30 = smov 0   ;;  %s5457_s8 = smov 0  }
   0x7 LB: > { %s4503_s9 = sadd.s32 4294967295, %s5391_s8   ;;  %s4504_s10 = sadd.s32 4294967294, %s5391_s8   ;;  %s5391_s8 = sphi %s5457_s8, %s20_s8   ;;  %s5387_s30 = sphi %s5455_s30, %s7209_s30   ;;  %s5383_s29 = sphi %s5453_s29, %s7208_s29   ;;  %s5379_s28 = sphi %s5451_s28, %s7207_s28   ;;  %s5375_s27 = sphi %s5449_s27, %s7206_s27   ;;  %s5371_s26 = sphi %s5447_s26, %s7205_s26   ;;  %s5367_s25 = sphi %s5445_s25, %s7204_s25   ;;  %s5363_s24 = sphi %s5443_s24, %s7203_s24  }
   0x8   : > { %s29_s11 = sadd.s32 1, %s5383_s29  ;;  %s32_s12 = sadd.s32 1, %s5387_s30 }
   0x9   : > { %p30_p0 = scmp.ge.s32.totalorder %s29_s11, 2  ;;  %p231_p1 = scmp.ne.s32.totalorder %s5371_s26, %s5367_s25 }
   0xa   : > { %p232_p2 = scmp.eq.s32.totalorder %s4503_s9, 3  ;;  %p237_p5 = scmp.ne.s32.totalorder %s5367_s25, %s5363_s24 }
   0xb   : > { %s7211_s11 = smov (%p30_p0, %s29_s11), 0  ;;  %s7213_s12 = smov (!%p30_p0, %s32_s12), %s5387_s30 }
   0xc   : > { %s217_s13 = ssub.s32 %s5383_s29, %s7211_s11  ;;  %p5494_p3 = por %p232_p2, %p231_p1 }
   0xd   : > { %p34_p4 = scmp.ge.s32.totalorder %s7213_s12, 2  ;;  %p238_p6 = scmp.eq.s32.totalorder %s4504_s10, 3 }
   0xe   : > { %p4509_p7 = scmp.ge.s32.totalorder %s5391_s8, 1  ;;  %p319_p9 = scmp.lt.s32.totalorder %s5391_s8, 5 }
   0xf   : > { %s7215_s12 = smov (%p34_p4, %s7213_s12), 0  ;;  %p5503_p8 = por %p238_p6, %p237_p5 }
  0x10   : > { %7121 = sst [smem:[#allocation6_spill]] %s7215_s12  ;;  %s216_s16 = ssub.s32 %s5387_s30, %s7215_s12 }
  0x11   : > { %s221_s17 = sadd.s32 1, %s5371_s26  ;;  %s218_s18 = sor.u32 %s217_s13, %s216_s16 }
  0x12   : > { %p320_p10 = pnand %p4509_p7, %p319_p9  ;;  %p219_p11 = scmp.eq.s32.totalorder %s218_s18, 0 }
  0x14   : > { %s5512_s19 = scalar_select %p219_p11, %s5371_s26, %s221_s17  }
  0x15   : > { %323 = sbr.rel (%p320_p10) target bundleno = 979 (0x3d3), region = 48 }
  0x1a   : > { %s7057_s20 = sand.u32 1, %s5367_s25   ;;  %s7123_s3 = sld [smem:[#allocation39_spill]]  ;;  %vm512_vm0 = vcmask 1041408   ;;  %vm487_vm1 = vcmask 31744   ;;  %v5393_v22 = vmov -1e+30  }
  0x1b   : > { %p383_p12 = scmp.lt.s32.totalorder %s5379_s28, 1  ;;  %s5521_s23 = sshll.u32 %s7057_s20, 7  ;;  %1175 = vst [vmem:[#allocation2] sm:$0xff] %v5393_v22  ;;  %1176 = vst [vmem:[#allocation2 + $0x8] sm:$0xff] %v5393_v22  ;;  %v5578_v23 = vld [vmem:[%s7053_s4] ss:$0 sm:$0xff] }
  0x1c   : > { %s5524_s9 = sshll.u32 %s5375_s27, 4  ;;  %s4511_s17 = sadd.s32 4294967295, %s5375_s27  ;;  %1177 = vst [vmem:[#allocation2 + $0x10] sm:$0xff] %v5393_v22  ;;  %1178 = vst [vmem:[#allocation2 + $0x18] sm:$0xff] %v5393_v22 }
  0x1d   : > { %p398_p13 = scmp.lt.s32.totalorder %s5524_s9, 31  ;;  %p380_p0 = scmp.gt.s32.totalorder %s4511_s17, 0  ;;  %1179 = vst [vmem:[#allocation2 + $0x20] sm:$0xff] %v5393_v22  ;;  %1180 = vst [vmem:[#allocation2 + $0x28] sm:$0xff] %v5393_v22 }
  0x1e   : > { %s384_s10 = scalar_select %p383_p12, %s5379_s28, 1  ;;  %1182 = vst [vmem:[#allocation2 + $0x210] sm:$0xff] %v5393_v22  ;;  %1183 = vst [vmem:[#allocation2 + $0x218] sm:$0xff] %v5393_v22 }
  0x1f   : > { %s399_s13 = scalar_select %p398_p13, %s5524_s9, 31  ;;  %1184 = vst [vmem:[#allocation2 + $0x220] sm:$0xff] %v5393_v22  ;;  %1185 = vst [vmem:[#allocation2 + $0x228] sm:$0xff] %v5393_v22 }
  0x20   : > { %v423_v0 = vld [vmem:[%s7123_s3] sm:$0x3]  ;;  %s5529_s16 = sshll.u32 %s384_s10, 5  ;;  %s405_s22 = sadd.s32 1, %s5375_s27  ;;  %1186 = vst [vmem:[#allocation2 + $0x230] sm:$0xff] %v5393_v22  ;;  %1187 = vst [vmem:[#allocation2 + $0x238] sm:$0xff] %v5393_v22 }
  0x21   : > { %4940 = vmatprep.subr.msk.bf16.mxu0 %vm512_vm0, %v423_v0  ;;  %v514_v1 = vsel %vm512_vm0, %v423_v0, 0  ;;  %4941 = vmatprep.subr.msk.bf16.mxu1 %vm512_vm0, %v423_v0  ;;  %s401_s18 = sadd.s32 %s5529_s16, %s399_s13  ;;  %p406_p1 = scmp.lt.s32.totalorder %s405_s22, 1  ;;  %1189 = vst [vmem:[#allocation2 + $0x30] sm:$0x3] %v5393_v22  ;;  %1190 = vst [vmem:[#allocation2 + $0x48] sm:$0x3] %v5393_v22 }
  0x22   : > { %4751 = vmatpush3.bf16.msra.mxu0 %v514_v1  ;;  %4769 = vmatpush3.bf16.msra.mxu1 %v514_v1  ;;  %s4517_s21 = sshll.u32 %s401_s18, 2  ;;  %s7217_s17 = smov (!%p380_p0, %s4511_s17), 0  ;;  %1191 = vst [vmem:[#allocation2 + $0x60] sm:$0x3] %v5393_v22  ;;  %1192 = vst [vmem:[#allocation2 + $0x78] sm:$0x3] %v5393_v22 }
  0x23   : > { %4942 = vmatprep.subr.msk.bf16.mxu1 %vm512_vm0, %v423_v0  ;;  %s5537_s12 = scalar_lea.vmem %s7050_s1, %s4517_s21  ;;  %s7219_s22 = smov (!%p406_p1, %s405_s22), 1  ;;  %1193 = vst [vmem:[#allocation2 + $0x90] sm:$0x3] %v5393_v22  ;;  %1194 = vst [vmem:[#allocation2 + $0xa8] sm:$0x3] %v5393_v22 }
  0x24   : > { %v5023_v2 = vld [vmem:[%s5537_s12] sm:$0xff]   ;;  %v5024_v3 = vld [vmem:[%s5537_s12 + $0x8] sm:$0xff]   ;;  %s4512_s10 = sshll.u32 %s7217_s17, 4  ;;  %v5027_v4 = vld [vmem:[%s5537_s12 + $0x10] sm:$0xff]   ;;  %s4518_s3 = sshll.u32 %s7219_s22, 4 }
  0x25   : > { %4752 = vmatprep.mubr.msk.bf16.mxu0 %vm487_vm1, %v5023_v2  ;;  %p385_p2 = scmp.lt.s32.totalorder %s4512_s10, 31  ;;  %p411_p4 = scmp.lt.s32.totalorder %s4518_s3, 31  ;;  %v5028_v5 = vld [vmem:[%s5537_s12 + $0x18] sm:$0xff]   ;;  %v5031_v6 = vld [vmem:[%s5537_s12 + $0x20] sm:$0xff]   ;;  %v5032_v10 = vld [vmem:[%s5537_s12 + $0x28] sm:$0xff]  }
  0x26   : > { %4753 = vmatmul.mubr.msk.bf16.vlgmr.msra.gmra.mxu0 %vm487_vm1, %v5024_v3  ;;  %v5035_v11 = vld [vmem:[%s5537_s12 + $0x30] sm:$0xff]   ;;  %v5036_v14 = vld [vmem:[%s5537_s12 + $0x38] sm:$0xff]   ;;  %1195 = vst [vmem:[#allocation2 + $0xc0] sm:$0x3] %v5393_v22  ;;  %1196 = vst [vmem:[#allocation2 + $0xd8] sm:$0x3] %v5393_v22 }
  0x27   : > { %4756 = vmatprep.mubr.msk.bf16.mxu0 %vm487_vm1, %v5027_v4  ;;  %s7221_s10 = smov (!%p385_p2, %s4512_s10), 31  ;;  %s7223_s3 = smov (!%p411_p4, %s4518_s3), 31  ;;  %1197 = vst [vmem:[#allocation2 + $0xf0] sm:$0x3] %v5393_v22  ;;  %1198 = vst [vmem:[#allocation2 + $0x108] sm:$0x3] %v5393_v22 }
  0x28   : > { %s388_s20 = sadd.s32 %s5529_s16, %s7221_s10  ;;  %s414_s22 = sadd.s32 %s5529_s16, %s7223_s3  ;;  %1199 = vst [vmem:[#allocation2 + $0x120] sm:$0x3] %v5393_v22  ;;  %1200 = vst [vmem:[#allocation2 + $0x138] sm:$0x3] %v5393_v22 }
  0x29   : > { %s4514_s13 = sshll.u32 %s388_s20, 2  ;;  %s4520_s10 = sshll.u32 %s414_s22, 2  ;;  %1201 = vst [vmem:[#allocation2 + $0x150] sm:$0x3] %v5393_v22  ;;  %1202 = vst [vmem:[#allocation2 + $0x168] sm:$0x3] %v5393_v22 }
  0x2a   : > { %s390_s17 = scalar_lea.vmem %s7049_s0, %s4514_s13  ;;  %s416_s18 = scalar_lea.vmem %s7051_s2, %s4520_s10  ;;  %1203 = vst [vmem:[#allocation2 + $0x180] sm:$0x3] %v5393_v22  ;;  %1204 = vst [vmem:[#allocation2 + $0x198] sm:$0x3] %v5393_v22 }
  0x2b   : > { %v5025_v7 = vld [vmem:[%s390_s17 + $0x10] sm:$0xff]   ;;  %v5026_v8 = vld [vmem:[%s390_s17 + $0x18] sm:$0xff]   ;;  %v5029_v9 = vld [vmem:[%s390_s17 + $0x20] sm:$0xff]   ;;  %1205 = vst [vmem:[#allocation2 + $0x1b0] sm:$0x3] %v5393_v22  ;;  %s5850_s3 = scalar_lea.vmem [#allocation3], %s5521_s23 }
  0x2c   : > { %4770 = vmatprep.mubr.msk.bf16.mxu1 %vm487_vm1, %v5025_v7  ;;  %v5030_v12 = vld [vmem:[%s390_s17 + $0x28] sm:$0xff]   ;;  %v5033_v13 = vld [vmem:[%s390_s17 + $0x30] sm:$0xff]   ;;  %v5034_v15 = vld [vmem:[%s390_s17 + $0x38] sm:$0xff]   ;;  %1206 = vst [vmem:[#allocation2 + $0x1c8] sm:$0x3] %v5393_v22  ;;  %p4602_p5 = scmp.ne.s32.totalorder %s5375_s27, 0 }
  0x2d   : > { %4771 = vmatmul.mubr.msk.bf16.vlgmr.msra.gmra.mxu1 %vm487_vm1, %v5026_v8  ;;  %v5037_v16 = vld [vmem:[%s416_s18] sm:$0xff]   ;;  %v5038_v17 = vld [vmem:[%s416_s18 + $0x8] sm:$0xff]   ;;  %v5039_v18 = vld [vmem:[%s416_s18 + $0x10] sm:$0xff]   ;;  %1207 = vst [vmem:[#allocation2 + $0x1e0] sm:$0x3] %v5393_v22 }
  0x2e   : > { %4757 = vmatmul.mubr.msk.bf16.gmra.mxu0 %vm487_vm1, %v5028_v5  ;;  %4783 = vmatpush3.bf16.msra.mxu1 %v514_v1  ;;  %v5040_v19 = vld [vmem:[%s416_s18 + $0x18] sm:$0xff]   ;;  %v5041_v20 = vld [vmem:[%s416_s18 + $0x20] sm:$0xff]   ;;  %v5042_v21 = vld [vmem:[%s416_s18 + $0x28] sm:$0xff]   ;;  %1208 = vst [vmem:[#allocation2 + $0x1f8] sm:$0x3] %v5393_v22 }
  0x2f   : > { %4760 = vmatprep.mubr.msk.bf16.mxu0 %vm487_vm1, %v5031_v6  ;;  %4774 = vmatprep.mubr.msk.bf16.mxu1 %vm487_vm1, %v5029_v9  ;;  %1209 = vst [vmem:[#allocation2 + $0x42] sm:$0x3f] %v5393_v22  ;;  %1210 = vst [vmem:[#allocation2 + $0x5a] sm:$0x3f] %v5393_v22 }
  0x30   : > { %1211 = vst [vmem:[#allocation2 + $0x72] sm:$0x3f] %v5393_v22  ;;  %1212 = vst [vmem:[#allocation2 + $0x8a] sm:$0x3f] %v5393_v22 }
  0x31   : > { %1213 = vst [vmem:[#allocation2 + $0xa2] sm:$0x3f] %v5393_v22  ;;  %1214 = vst [vmem:[#allocation2 + $0xba] sm:$0x3f] %v5393_v22 }
  0x32   : > { %1215 = vst [vmem:[#allocation2 + $0xd2] sm:$0x3f] %v5393_v22  ;;  %1216 = vst [vmem:[#allocation2 + $0xea] sm:$0x3f] %v5393_v22 }
  0x33   : > { %1217 = vst [vmem:[#allocation2 + $0x102] sm:$0x3f] %v5393_v22  ;;  %1218 = vst [vmem:[#allocation2 + $0x11a] sm:$0x3f] %v5393_v22 }
  0x34   : > { %1219 = vst [vmem:[#allocation2 + $0x132] sm:$0x3f] %v5393_v22  ;;  %1220 = vst [vmem:[#allocation2 + $0x14a] sm:$0x3f] %v5393_v22 }
  0x35   : > { %4775 = vmatmul.mubr.msk.bf16.gmra.mxu1 %vm487_vm1, %v5030_v12  ;;  %1221 = vst [vmem:[#allocation2 + $0x162] sm:$0x3f] %v5393_v22  ;;  %1222 = vst [vmem:[#allocation2 + $0x17a] sm:$0x3f] %v5393_v22 }
  0x36   : > { %4761 = vmatmul.mubr.msk.bf16.gmra.mxu0 %vm487_vm1, %v5032_v10  ;;  %4778 = vmatprep.mubr.msk.bf16.mxu1 %vm487_vm1, %v5033_v13  ;;  %1223 = vst [vmem:[#allocation2 + $0x192] sm:$0x3f] %v5393_v22  ;;  %1224 = vst [vmem:[#allocation2 + $0x1aa] sm:$0x3f] %v5393_v22 }
  0x37   : > { %4764 = vmatprep.mubr.msk.bf16.mxu0 %vm487_vm1, %v5035_v11  ;;  %1225 = vst [vmem:[#allocation2 + $0x1c2] sm:$0x3f] %v5393_v22  ;;  %1226 = vst [vmem:[#allocation2 + $0x1da] sm:$0x3f] %v5393_v22 }
  0x38   : > { %1227 = vst [vmem:[#allocation2 + $0x1f2] sm:$0x3f] %v5393_v22  ;;  %1228 = vst [vmem:[#allocation2 + $0x20a] sm:$0x3f] %v5393_v22 }
  0x3d   : > { %4779 = vmatmul.mubr.msk.bf16.gmra.mxu1 %vm487_vm1, %v5034_v15 }
  0x3e   : > { %4765 = vmatmul.mubr.msk.bf16.gmra.mxu0 %vm487_vm1, %v5036_v14  ;;  %4784 = vmatprep.mubr.msk.bf16.mxu1 %vm487_vm1, %v5037_v16 }
  0x45   : > { %4785 = vmatmul.mubr.msk.bf16.vlgmr.msra.gmra.mxu1 %vm487_vm1, %v5038_v17 }
  0x46   : > { %4788 = vmatprep.mubr.msk.bf16.mxu1 %vm487_vm1, %v5039_v18 }
  0x4d   : > { %4789 = vmatmul.mubr.msk.bf16.gmra.mxu1 %vm487_vm1, %v5040_v19 }
  0x4e   : > { %4792 = vmatprep.mubr.msk.bf16.mxu1 %vm487_vm1, %v5041_v20 }
  0x55   : > { %4793 = vmatmul.mubr.msk.bf16.gmra.mxu1 %vm487_vm1, %v5042_v21 }
  0xe6   : > { %v4754_v24 = vpop.f32.mrf.mxu0 }
  0xe7   : > { %v5581_v25 = vadd.f32 %v4754_v24, %v5578_v23 }
  0xe8   : > { %v550_v26 = vpop.f32.mrf.mxu0 }
  0xe9   : > { %v4540_v27 = vmul.f32 -1.442695, %v5581_v25  ;;  %v5585_v28 = vadd.f32 %v5578_v23, %v550_v26 }
  0xea   : > { %v4755_v29 = vpop.f32.mrf.mxu0 }
  0xeb   : > { %5043 = vpow2.f32 %v4540_v27  ;;  %v4538_v30 = vmul.f32 -1.442695, %v5585_v28  ;;  %v5589_v31 = vadd.f32 %v4755_v29, %v5578_v23 }
  0xec   : > { %v553_v32 = vpop.f32.mrf.mxu0 }
  0xed   : > { %5045 = vpow2.f32 %v4538_v30  ;;  %v4541_v33 = vmul.f32 -1.442695, %v5589_v31  ;;  %v5593_v34 = vadd.f32 %v5578_v23, %v553_v32  ;;  %v4772_v38 = vpop.f32.mrf.mxu1 }
  0xee   : > { %v4758_v35 = vpop.f32.mrf.mxu0  ;;  %v5600_v40 = vadd.f32 %v4772_v38, %v5578_v23 }
  0xef   : > { %5047 = vpow2.f32 %v4541_v33  ;;  %v4539_v36 = vmul.f32 -1.442695, %v5593_v34  ;;  %v5597_v37 = vadd.f32 %v4758_v35, %v5578_v23  ;;  %v819_v43 = vpop.f32.mrf.mxu1 }
  0xf0   : > { %v566_v39 = vpop.f32.mrf.mxu0  ;;  %v4568_v45 = vmul.f32 -1.442695, %v5600_v40  ;;  %v5608_v46 = vadd.f32 %v5578_v23, %v819_v43 }
  0xf1   : > { %5049 = vpow2.f32 %v4539_v36  ;;  %v4544_v41 = vmul.f32 -1.442695, %v5597_v37  ;;  %v5604_v42 = vadd.f32 %v5578_v23, %v566_v39  ;;  %v4773_v48 = vpop.f32.mrf.mxu1 }
  0xf2   : > { %v4759_v44 = vpop.f32.mrf.mxu0  ;;  %v4566_v51 = vmul.f32 -1.442695, %v5608_v46  ;;  %v5616_v52 = vadd.f32 %v4773_v48, %v5578_v23 }
  0xf3   : > { %5051 = vpow2.f32 %v4544_v41  ;;  %v4542_v47 = vmul.f32 -1.442695, %v5604_v42  ;;  %v5612_v49 = vadd.f32 %v4759_v44, %v5578_v23  ;;  %v822_v54 = vpop.f32.mrf.mxu1 }
  0xf4   : > { %v569_v50 = vpop.f32.mrf.mxu0  ;;  %5053 = vpow2.f32 %v4568_v45  ;;  %v4569_v56 = vmul.f32 -1.442695, %v5616_v52  ;;  %v5624_v57 = vadd.f32 %v5578_v23, %v822_v54 }
  0xf5   : > { %v5619_v53 = vadd.f32 %v5578_v23, %v569_v50  ;;  %5055 = vpow2.f32 %v4542_v47  ;;  %v4545_v55 = vmul.f32 -1.442695, %v5612_v49  ;;  %v4776_v61 = vpop.f32.mrf.mxu1 }
  0xf6   : > { %5057 = vpow2.f32 %v4566_v51  ;;  %v4762_v59 = vpop.f32.mrf.mxu0  ;;  %v4567_v63 = vmul.f32 -1.442695, %v5624_v57  ;;  %v5629_v0 = vadd.f32 %v4776_v61, %v5578_v23 }
  0xf7   : > { %v4543_v58 = vmul.f32 -1.442695, %v5619_v53  ;;  %5059 = vpow2.f32 %v4545_v55  ;;  %v835_v2 = vpop.f32.mrf.mxu1  ;;  %v5632_v3 = vadd.f32 %v4762_v59, %v5578_v23 }
  0xf8   : > { %v5044_v60 = vpop.eup %5043  ;;  %5061 = vpow2.f32 %v4569_v56  ;;  %v4572_v5 = vmul.f32 -1.442695, %v5629_v0  ;;  %v5636_v6 = vadd.f32 %v5578_v23, %v835_v2  ;;  %v582_v7 = vpop.f32.mrf.mxu0 }
  0xf9   : > { %v663_v62 = vadd.f32 1.0, %v5044_v60  ;;  %5063 = vpow2.f32 %v4543_v58  ;;  %v4777_v9 = vpop.f32.mrf.mxu1  ;;  %v4548_v14 = vmul.f32 -1.442695, %v5632_v3  ;;  %v5645_v29 = vadd.f32 %v5578_v23, %v582_v7 }
  0xfa   : > { %v5046_v1 = vpop.eup %5045  ;;  %v4570_v11 = vmul.f32 -1.442695, %v5636_v6  ;;  %v5640_v12 = vadd.f32 %v4777_v9, %v5578_v23  ;;  %v4763_v17 = vpop.f32.mrf.mxu0 }
  0xfb   : > { %5065 = vrcp.f32 %v663_v62  ;;  %v661_v4 = vadd.f32 1.0, %v5046_v1  ;;  %v838_v15 = vpop.f32.mrf.mxu1  ;;  %v4546_v48 = vmul.f32 -1.442695, %v5645_v29  ;;  %v5652_v50 = vadd.f32 %v4763_v17, %v5578_v23 }
  0xfc   : > { %v5048_v8 = vpop.eup %5047  ;;  %5067 = vpow2.f32 %v4567_v63  ;;  %v4573_v19 = vmul.f32 -1.442695, %v5640_v12  ;;  %v585_v30 = vpop.f32.mrf.mxu0  ;;  %v5648_v39 = vadd.f32 %v5578_v23, %v838_v15 }
  0xfd   : > { %5069 = vrcp.f32 %v661_v4  ;;  %v664_v10 = vadd.f32 1.0, %v5048_v8  ;;  %v4780_v20 = vpop.f32.mrf.mxu1 }
  0xfe   : > { %v5050_v13 = vpop.eup %5049  ;;  %5071 = vpow2.f32 %v4572_v5  ;;  %v4766_v51 = vpop.f32.mrf.mxu0  ;;  %v4571_v60 = vmul.f32 -1.442695, %v5648_v39  ;;  %v5661_v61 = vadd.f32 %v4780_v20, %v5578_v23  ;;  %v5671_v5 = vadd.f32 %v5578_v23, %v585_v30 }
  0xff   : > { %5073 = vrcp.f32 %v664_v10  ;;  %v662_v16 = vadd.f32 1.0, %v5050_v13  ;;  %v851_v24 = vpop.f32.mrf.mxu1  ;;  %v5684_v17 = vadd.f32 %v4766_v51, %v5578_v23 }
 0x100   : > { %v5052_v18 = vpop.eup %5051  ;;  %5075 = vpow2.f32 %v4570_v11  ;;  %v598_v7 = vpop.f32.mrf.mxu0  ;;  %v4547_v20 = vmul.f32 -1.442695, %v5671_v5 }
 0x101   : > { %5077 = vrcp.f32 %v662_v16  ;;  %v667_v21 = vadd.f32 1.0, %v5052_v18  ;;  %v5054_v22 = vpop.eup %5053  ;;  %v4781_v35 = vpop.f32.mrf.mxu1 }
 0x102   : > { %5079 = vpow2.f32 %v4548_v14  ;;  %v5056_v26 = vpop.eup %5055  ;;  %v904_v27 = vadd.f32 1.0, %v5054_v22  ;;  %v5681_v14 = vadd.f32 %v5578_v23, %v851_v24  ;;  %v4767_v22 = vpop.f32.mrf.mxu0 }
 0x103   : > { %5081 = vrcp.f32 %v667_v21  ;;  %v5058_v32 = vpop.eup %5057  ;;  %v665_v33 = vadd.f32 1.0, %v5056_v26  ;;  %v854_v44 = vpop.f32.mrf.mxu1  ;;  %v5694_v21 = vadd.f32 %v4781_v35, %v5578_v23 }
 0x104   : > { %5083 = vpow2.f32 %v4573_v19  ;;  %v5060_v36 = vpop.eup %5059  ;;  %v902_v38 = vadd.f32 1.0, %v5058_v32  ;;  %v5707_v35 = vadd.f32 %v5578_v23, %v854_v44 }
 0x105   : > { %5085 = vrcp.f32 %v904_v27  ;;  %v5062_v41 = vpop.eup %5061  ;;  %v668_v43 = vadd.f32 1.0, %v5060_v36  ;;  %v5654_v56 = vpop.f32.mrf.mxu1  ;;  %v5697_v27 = vadd.f32 %v5578_v23, %v598_v7 }
 0x106   : > { %5087 = vrcp.f32 %v665_v33  ;;  %v5064_v45 = vpop.eup %5063  ;;  %v905_v47 = vadd.f32 1.0, %v5062_v41  ;;  %v4574_v33 = vmul.f32 -1.442695, %v5681_v14  ;;  %v4552_v41 = vmul.f32 -1.442695, %v5684_v17 }
 0x107   : > { %5089 = vrcp.f32 %v902_v38  ;;  %v666_v55 = vadd.f32 1.0, %v5064_v45  ;;  %v5663_v1 = vpop.f32.mrf.mxu1 }
 0x108   : > { %v5066_v54 = vpop.eup %5065  ;;  %5091 = vrcp.f32 %v668_v43  ;;  %v5711_v43 = vadd.f32 %v4767_v22, %v5578_v23 }
 0x109   : > { %v5068_v58 = vpop.eup %5067  ;;  %v5657_v59 = vmul.f32 %v5066_v54, %v5581_v25  ;;  %5093 = vrcp.f32 %v905_v47  ;;  %v4549_v25 = vmul.f32 -1.442695, %v5652_v50  ;;  %v5673_v10 = vpop.f32.mrf.mxu1  ;;  %v4550_v54 = vmul.f32 -1.442695, %v5697_v27 }
 0x10a   : > { %v5070_v62 = vpop.eup %5069  ;;  %v903_v63 = vadd.f32 1.0, %v5068_v58  ;;  %5095 = vrcp.f32 %v666_v55  ;;  %v5722_v55 = vadd.f32 %v5654_v56, %v5578_v23 }
 0x10b   : > { %v5072_v2 = vpop.eup %5071  ;;  %1244 = vst [vmem:[#allocation2 + $0xda] sm:$0xff] %v5657_v59  ;;  %v5667_v4 = vmul.f32 %v5070_v62, %v5585_v28  ;;  %5097 = vpow2.f32 %v4546_v48  ;;  %v4576_v28 = vmul.f32 -1.442695, %v5661_v61  ;;  %v5686_v18 = vpop.f32.mrf.mxu1  ;;  %v4575_v62 = vmul.f32 -1.442695, %v5707_v35 }
 0x10c   : > { %v5074_v8 = vpop.eup %5073  ;;  %5099 = vrcp.f32 %v903_v63  ;;  %v908_v9 = vadd.f32 1.0, %v5072_v2  ;;  %v601_v48 = vpop.f32.mrf.mxu0  ;;  %v4553_v2 = vmul.f32 -1.442695, %v5711_v43 }
 0x10d   : > { %v5076_v11 = vpop.eup %5075  ;;  %1242 = vst [vmem:[#allocation2 + $0xc2] sm:$0xff] %v5667_v4  ;;  %v5677_v13 = vmul.f32 %v5074_v8, %v5589_v31  ;;  %5101 = vpow2.f32 %v4571_v60  ;;  %v5699_v30 = vpop.f32.mrf.mxu1  ;;  %v5734_v56 = vadd.f32 %v5578_v23, %v601_v48 }
 0x10e   : > { %v5078_v15 = vpop.eup %5077  ;;  %5103 = vrcp.f32 %v908_v9  ;;  %v906_v16 = vadd.f32 1.0, %v5076_v11  ;;  %v5744_v9 = vadd.f32 %v5578_v23, %v5663_v1 }
 0x10f   : > { %v5080_v19 = vpop.eup %5079  ;;  %1245 = vst [vmem:[#allocation2 + $0xe2] sm:$0xff] %v5677_v13  ;;  %v5690_v31 = vmul.f32 %v5078_v15, %v5593_v34  ;;  %5105 = vpow2.f32 %v4549_v25  ;;  %v5724_v58 = vpop.f32.mrf.mxu1 }
 0x110   : > { %v5082_v24 = vpop.eup %5081  ;;  %5107 = vrcp.f32 %v906_v16  ;;  %v671_v26 = vadd.f32 1.0, %v5080_v19  ;;  %v5753_v19 = vadd.f32 %v5673_v10, %v5578_v23 }
 0x111   : > { %v5084_v32 = vpop.eup %5083  ;;  %1243 = vst [vmem:[#allocation2 + $0xca] sm:$0xff] %v5690_v31  ;;  %v5703_v34 = vmul.f32 %v5082_v24, %v5597_v37  ;;  %5109 = vpow2.f32 %v4576_v28  ;;  %v4577_v37 = vmul.f32 -1.442695, %v5694_v21  ;;  %v5746_v11 = vpop.f32.mrf.mxu1 }
 0x112   : > { %v5086_v36 = vpop.eup %5085  ;;  %5111 = vrcp.f32 %v671_v26  ;;  %v909_v38 = vadd.f32 1.0, %v5084_v32  ;;  %v4590_v26 = vmul.f32 -1.442695, %v5744_v9 }
 0x113   : > { %7124 = vst [vmem:[#allocation7_spill] sm:$0xff] %v5703_v34  ;;  %v5088_v45 = vpop.eup %5087  ;;  %v940_v47 = vmul.f32 %v5086_v36, %v5600_v40  ;;  %1248 = vst [vmem:[#allocation2 + $0x10a] sm:$0xff] %v5703_v34  ;;  %5113 = vpow2.f32 %v4547_v20  ;;  %v1063_v32 = vpop.f32.mrf.mxu1 }
 0x114   : > { %v5090_v51 = vpop.eup %5089  ;;  %v5717_v44 = vmul.f32 %v5088_v45, %v5604_v42  ;;  %5115 = vrcp.f32 %v909_v38 }
 0x115   : > { %v5092_v40 = vpop.eup %5091  ;;  %1231 = vst [vmem:[#allocation2 + $0x4a] sm:$0xff] %v940_v47  ;;  %v938_v60 = vmul.f32 %v5090_v51, %v5608_v46  ;;  %5117 = vpow2.f32 %v4574_v33  ;;  %v4794_v48 = vpop.f32.mrf.mxu1 }
 0x116   : > { %v5094_v63 = vpop.eup %5093  ;;  %1246 = vst [vmem:[#allocation2 + $0xf2] sm:$0xff] %v5717_v44  ;;  %v5730_v42 = vmul.f32 %v5092_v40, %v5612_v49  ;;  %5119 = vpow2.f32 %v4552_v41  ;;  %v4592_v49 = vmul.f32 -1.442695, %v5722_v55  ;;  %v4593_v41 = vmul.f32 -1.442695, %v5753_v19 }
 0x117   : > { %v5096_v25 = vpop.eup %5095  ;;  %1229 = vst [vmem:[#allocation2 + $0x32] sm:$0xff] %v938_v60  ;;  %v941_v7 = vmul.f32 %v5094_v63, %v5616_v52  ;;  %5121 = vpow2.f32 %v4577_v37 }
 0x118   : > { %7125 = vst [vmem:[#allocation8_spill] sm:$0xff] %v5730_v42  ;;  %v5098_v46 = vpop.eup %5097  ;;  %1249 = vst [vmem:[#allocation2 + $0x112] sm:$0xff] %v5730_v42  ;;  %v5739_v8 = vmul.f32 %v5096_v25, %v5619_v53  ;;  %5123 = vpow2.f32 %v4550_v54  ;;  %v4551_v53 = vmul.f32 -1.442695, %v5734_v56  ;;  %v1076_v25 = vpop.f32.mrf.mxu1 }
 0x119   : > { %v5100_v28 = vpop.eup %5099  ;;  %1232 = vst [vmem:[#allocation2 + $0x52] sm:$0xff] %v941_v7  ;;  %v669_v15 = vadd.f32 1.0, %v5098_v46  ;;  %5125 = vpow2.f32 %v4575_v62 }
 0x11a   : > { %v5102_v52 = vpop.eup %5101  ;;  %v939_v16 = vmul.f32 %v5100_v28, %v5624_v57  ;;  %1247 = vst [vmem:[#allocation2 + $0xfa] sm:$0xff] %v5739_v8  ;;  %5127 = vpow2.f32 %v4553_v2  ;;  %v5759_v57 = vadd.f32 %v5578_v23, %v5686_v18 }
 0x11b   : > { %v5104_v1 = vpop.eup %5103  ;;  %5129 = vrcp.f32 %v669_v15  ;;  %v907_v20 = vadd.f32 1.0, %v5102_v52 }
 0x11c   : > { %v5106_v22 = vpop.eup %5105  ;;  %1230 = vst [vmem:[#allocation2 + $0x3a] sm:$0xff] %v939_v16  ;;  %v944_v24 = vmul.f32 %v5104_v1, %v5629_v0  ;;  %5131 = vpow2.f32 %v4592_v49  ;;  %v4591_v18 = vmul.f32 -1.442695, %v5759_v57  ;;  %v5775_v49 = vadd.f32 %v5578_v23, %v5724_v58 }
 0x11d   : > { %v5108_v33 = vpop.eup %5107  ;;  %5133 = vrcp.f32 %v907_v20  ;;  %v672_v36 = vadd.f32 1.0, %v5106_v22  ;;  %v5780_v16 = vadd.f32 %v5746_v11, %v5578_v23  ;;  %v4795_v20 = vpop.f32.mrf.mxu1 }
 0x11e   : > { %v5110_v10 = vpop.eup %5109  ;;  %1235 = vst [vmem:[#allocation2 + $0x7a] sm:$0xff] %v944_v24  ;;  %v942_v38 = vmul.f32 %v5108_v33, %v5636_v6  ;;  %5135 = vpow2.f32 %v4551_v53  ;;  %v4594_v24 = vmul.f32 -1.442695, %v5775_v49 }
 0x11f   : > { %v5112_v45 = vpop.eup %5111  ;;  %5137 = vrcp.f32 %v672_v36  ;;  %v912_v0 = vadd.f32 1.0, %v5110_v10 }
 0x120   : > { %v5114_v47 = vpop.eup %5113  ;;  %1233 = vst [vmem:[#allocation2 + $0x62] sm:$0xff] %v942_v38  ;;  %v5764_v37 = vmul.f32 %v5112_v45, %v5632_v3  ;;  %5139 = vpow2.f32 %v4590_v26  ;;  %v5771_v3 = vadd.f32 %v5699_v30, %v5578_v23  ;;  %v5787_v26 = vadd.f32 %v5578_v23, %v1063_v32 }
 0x121   : > { %v5116_v51 = vpop.eup %5115  ;;  %5141 = vrcp.f32 %v912_v0  ;;  %v670_v54 = vadd.f32 1.0, %v5114_v47  ;;  %v4597_v38 = vmul.f32 -1.442695, %v5780_v16  ;;  %v1079_v0 = vpop.f32.mrf.mxu1 }
 0x122   : > { %7126 = vst [vmem:[#allocation9_spill] sm:$0xff] %v5764_v37  ;;  %v5118_v40 = vpop.eup %5117  ;;  %1252 = vst [vmem:[#allocation2 + $0x13a] sm:$0xff] %v5764_v37  ;;  %v945_v6 = vmul.f32 %v5116_v51, %v5640_v12  ;;  %5143 = vpow2.f32 %v4593_v41  ;;  %v4596_v30 = vmul.f32 -1.442695, %v5771_v3 }
 0x123   : > { %v5120_v60 = vpop.eup %5119  ;;  %5145 = vrcp.f32 %v670_v54  ;;  %v910_v62 = vadd.f32 1.0, %v5118_v40 }
 0x124   : > { %v5122_v63 = vpop.eup %5121  ;;  %1236 = vst [vmem:[#allocation2 + $0x82] sm:$0xff] %v945_v6  ;;  %v675_v2 = vadd.f32 1.0, %v5120_v60  ;;  %5147 = vpow2.f32 %v4591_v18  ;;  %v4595_v18 = vmul.f32 -1.442695, %v5787_v26  ;;  %v5809_v60 = vadd.f32 %v5578_v23, %v1079_v0 }
 0x125   : > { %v5124_v7 = vpop.eup %5123  ;;  %5149 = vrcp.f32 %v910_v62  ;;  %v913_v46 = vadd.f32 1.0, %v5122_v63 }
 0x126   : > { %v5126_v12 = vpop.eup %5125  ;;  %5151 = vrcp.f32 %v675_v2  ;;  %v673_v28 = vadd.f32 1.0, %v5124_v7 }
 0x127   : > { %v5128_v15 = vpop.eup %5127  ;;  %5153 = vrcp.f32 %v913_v46  ;;  %v911_v52 = vadd.f32 1.0, %v5126_v12 }
 0x128   : > { %v5130_v53 = vpop.eup %5129  ;;  %5155 = vrcp.f32 %v673_v28  ;;  %v676_v1 = vadd.f32 1.0, %v5128_v15  ;;  %v4599_v15 = vmul.f32 -1.442695, %v5809_v60 }
 0x129   : > { %v5132_v22 = vpop.eup %5131  ;;  %v5783_v58 = vmul.f32 %v5130_v53, %v5645_v29  ;;  %5157 = vrcp.f32 %v911_v52  ;;  %v5793_v29 = vadd.f32 %v4794_v48, %v5578_v23  ;;  %v5803_v48 = vadd.f32 %v4795_v20, %v5578_v23 }
 0x12a   : > { %v5134_v33 = vpop.eup %5133  ;;  %5159 = vrcp.f32 %v676_v1  ;;  %v1129_v36 = vadd.f32 1.0, %v5132_v22 }
 0x12b   : > { %7127 = vst [vmem:[#allocation10_spill] sm:$0xff] %v5783_v58  ;;  %v5136_v10 = vpop.eup %5135  ;;  %1250 = vst [vmem:[#allocation2 + $0x122] sm:$0xff] %v5783_v58  ;;  %v943_v11 = vmul.f32 %v5134_v33, %v5648_v39  ;;  %5161 = vpow2.f32 %v4596_v30  ;;  %v5800_v39 = vadd.f32 %v5578_v23, %v1076_v25  ;;  %v4601_v12 = vmul.f32 -1.442695, %v5803_v48 }
 0x12c   : > { %v5138_v41 = vpop.eup %5137  ;;  %5163 = vrcp.f32 %v1129_v36  ;;  %v674_v45 = vadd.f32 1.0, %v5136_v10 }
 0x12d   : > { %v5140_v32 = vpop.eup %5139  ;;  %1234 = vst [vmem:[#allocation2 + $0x6a] sm:$0xff] %v943_v11  ;;  %v5796_v47 = vmul.f32 %v5138_v41, %v5652_v50  ;;  %5165 = vpow2.f32 %v4594_v24  ;;  %v4600_v50 = vmul.f32 -1.442695, %v5793_v29  ;;  %v4598_v7 = vmul.f32 -1.442695, %v5800_v39 }
 0x12e   : > { %v5142_v51 = vpop.eup %5141  ;;  %5167 = vrcp.f32 %v674_v45  ;;  %v1127_v54 = vadd.f32 1.0, %v5140_v32 }
 0x12f   : > { %7128 = vst [vmem:[#allocation11_spill] sm:$0xff] %v5796_v47  ;;  %v5144_v40 = vpop.eup %5143  ;;  %1253 = vst [vmem:[#allocation2 + $0x142] sm:$0xff] %v5796_v47  ;;  %v948_v6 = vmul.f32 %v5142_v51, %v5661_v61  ;;  %5169 = vpow2.f32 %v4597_v38 }
 0x130   : > { %v5146_v62 = vpop.eup %5145  ;;  %5171 = vrcp.f32 %v1127_v54  ;;  %v1130_v63 = vadd.f32 1.0, %v5144_v40 }
 0x131   : > { %v5148_v2 = vpop.eup %5147  ;;  %1239 = vst [vmem:[#allocation2 + $0xaa] sm:$0xff] %v948_v6  ;;  %v5812_v25 = vmul.f32 %v5146_v62, %v5671_v5  ;;  %5173 = vpow2.f32 %v4595_v18 }
 0x132   : > { %v5150_v46 = vpop.eup %5149  ;;  %5175 = vrcp.f32 %v1130_v63  ;;  %v1128_v61 = vadd.f32 1.0, %v5148_v2 }
 0x133   : > { %7129 = vst [vmem:[#allocation12_spill] sm:$0xff] %v5812_v25  ;;  %v5152_v28 = vpop.eup %5151  ;;  %1251 = vst [vmem:[#allocation2 + $0x12a] sm:$0xff] %v5812_v25  ;;  %v946_v23 = vmul.f32 %v5150_v46, %v5681_v14  ;;  %5177 = vpow2.f32 %v4600_v50 }
 0x134   : > { %v5154_v52 = vpop.eup %5153  ;;  %v5820_v5 = vmul.f32 %v5152_v28, %v5684_v17  ;;  %5179 = vrcp.f32 %v1128_v61 }
 0x135   : > { %v5156_v30 = vpop.eup %5155  ;;  %1237 = vst [vmem:[#allocation2 + $0x92] sm:$0xff] %v946_v23  ;;  %v949_v53 = vmul.f32 %v5154_v52, %v5694_v21  ;;  %5181 = vpow2.f32 %v4598_v7 }
 0x136   : > { %7130 = vst [vmem:[#allocation13_spill] sm:$0xff] %v5820_v5  ;;  %v5158_v1 = vpop.eup %5157  ;;  %1256 = vst [vmem:[#allocation2 + $0x16a] sm:$0xff] %v5820_v5  ;;  %v5825_v20 = vmul.f32 %v5156_v30, %v5697_v27  ;;  %5183 = vpow2.f32 %v4601_v12 }
 0x137   : > { %v5160_v14 = vpop.eup %5159  ;;  %1240 = vst [vmem:[#allocation2 + $0xb2] sm:$0xff] %v949_v53  ;;  %v947_v22 = vmul.f32 %v5158_v1, %v5707_v35  ;;  %5185 = vpow2.f32 %v4599_v15 }
 0x138   : > { %7131 = vst [vmem:[#allocation14_spill] sm:$0xff] %v5825_v20  ;;  %v5162_v17 = vpop.eup %5161  ;;  %1254 = vst [vmem:[#allocation2 + $0x152] sm:$0xff] %v5825_v20  ;;  %v5830_v24 = vmul.f32 %v5160_v14, %v5711_v43 }
 0x139   : > { %v5164_v21 = vpop.eup %5163  ;;  %1238 = vst [vmem:[#allocation2 + $0x9a] sm:$0xff] %v947_v22  ;;  %v1133_v33 = vadd.f32 1.0, %v5162_v17 }
 0x13a   : > { %7132 = vst [vmem:[#allocation15_spill] sm:$0xff] %v5830_v24  ;;  %v5166_v36 = vpop.eup %5165  ;;  %1257 = vst [vmem:[#allocation2 + $0x172] sm:$0xff] %v5830_v24  ;;  %v1165_v27 = vmul.f32 %v5164_v21, %v5722_v55 }
 0x13b   : > { %v5168_v10 = vpop.eup %5167  ;;  %5187 = vrcp.f32 %v1133_v33  ;;  %v1131_v11 = vadd.f32 1.0, %v5166_v36 }
 0x13c   : > { %v5170_v38 = vpop.eup %5169  ;;  %1261 = vst [vmem:[#allocation2 + $0x19a] sm:$0xff] %v1165_v27  ;;  %v5835_v35 = vmul.f32 %v5168_v10, %v5734_v56 }
 0x13d   : > { %v5172_v41 = vpop.eup %5171  ;;  %5189 = vrcp.f32 %v1131_v11  ;;  %v1134_v43 = vadd.f32 1.0, %v5170_v38 }
 0x13e   : > { %7133 = vst [vmem:[#allocation16_spill] sm:$0xff] %v5835_v35  ;;  %v5174_v45 = vpop.eup %5173  ;;  %1255 = vst [vmem:[#allocation2 + $0x15a] sm:$0xff] %v5835_v35  ;;  %v1163_v0 = vmul.f32 %v5172_v41, %v5744_v9 }
 0x13f   : > { %v5176_v32 = vpop.eup %5175  ;;  %5191 = vrcp.f32 %v1134_v43  ;;  %v1132_v18 = vadd.f32 1.0, %v5174_v45 }
 0x140   : > { %v5178_v55 = vpop.eup %5177  ;;  %1259 = vst [vmem:[#allocation2 + $0x182] sm:$0xff] %v1163_v0  ;;  %v1166_v51 = vmul.f32 %v5176_v32, %v5753_v19 }
 0x141   : > { %v5180_v54 = vpop.eup %5179  ;;  %5193 = vrcp.f32 %v1132_v18  ;;  %v1137_v40 = vadd.f32 1.0, %v5178_v55 }
 0x142   : > { %v5182_v56 = vpop.eup %5181  ;;  %1262 = vst [vmem:[#allocation2 + $0x1a2] sm:$0xff] %v1166_v51  ;;  %v1164_v6 = vmul.f32 %v5180_v54, %v5759_v57 }
 0x143   : > { %v5184_v50 = vpop.eup %5183  ;;  %5195 = vrcp.f32 %v1137_v40  ;;  %v1135_v62 = vadd.f32 1.0, %v5182_v56 }
 0x144   : > { %v5186_v63 = vpop.eup %5185  ;;  %1260 = vst [vmem:[#allocation2 + $0x18a] sm:$0xff] %v1164_v6  ;;  %v1138_v9 = vadd.f32 1.0, %v5184_v50 }
 0x145   : > { %5197 = vrcp.f32 %v1135_v62  ;;  %v1136_v2 = vadd.f32 1.0, %v5186_v63 }
 0x146   : > { %5199 = vrcp.f32 %v1138_v9 }
 0x147   : > { %5201 = vrcp.f32 %v1136_v2 }
 0x148   : > { %v5188_v7 = vpop.eup %5187 }
 0x149   : > { %v1169_v19 = vmul.f32 %v5188_v7, %v5771_v3 }
 0x14a   : > { %v5190_v46 = vpop.eup %5189 }
 0x14b   : > { %1265 = vst [vmem:[#allocation2 + $0x1ca] sm:$0xff] %v1169_v19  ;;  %v1167_v61 = vmul.f32 %v5190_v46, %v5775_v49 }
 0x14c   : > { %v5192_v12 = vpop.eup %5191 }
 0x14d   : > { %1263 = vst [vmem:[#allocation2 + $0x1b2] sm:$0xff] %v1167_v61  ;;  %v1170_v57 = vmul.f32 %v5192_v12, %v5780_v16 }
 0x14e   : > { %v5194_v28 = vpop.eup %5193 }
 0x14f   : > { %1266 = vst [vmem:[#allocation2 + $0x1d2] sm:$0xff] %v1170_v57  ;;  %v1168_v23 = vmul.f32 %v5194_v28, %v5787_v26 }
 0x150   : > { %v5196_v15 = vpop.eup %5195 }
 0x151   : > { %1264 = vst [vmem:[#allocation2 + $0x1ba] sm:$0xff] %v1168_v23  ;;  %v1173_v52 = vmul.f32 %v5196_v15, %v5793_v29 }
 0x152   : > { %v5198_v30 = vpop.eup %5197 }
 0x153   : > { %v5200_v53 = vpop.eup %5199  ;;  %1269 = vst [vmem:[#allocation2 + $0x1fa] sm:$0xff] %v1173_v52  ;;  %v1171_v3 = vmul.f32 %v5198_v30, %v5800_v39  ;;  %1274 = sbr.rel (%p4602_p5) target bundleno = 351 (0x15f), region = 52 }
 0x154   : > { %v5202_v1 = vpop.eup %5201  ;;  %v1174_v49 = vmul.f32 %v5200_v53, %v5803_v48 }
 0x155   : > { %1267 = vst [vmem:[#allocation2 + $0x1e2] sm:$0xff] %v1171_v3  ;;  %v1172_v16 = vmul.f32 %v5202_v1, %v5809_v60 }
 0x156   : > { %1270 = vst [vmem:[#allocation2 + $0x202] sm:$0xff] %v1174_v49 }
 0x157   : > { %1268 = vst [vmem:[#allocation2 + $0x1ea] sm:$0xff] %v1172_v16 }
 0x158   : > { %v5394_v26 = vmov -1e+30  }
 0x159   : > { %1275 = vst [vmem:[#allocation2 + $0x32] sm:$0xff] %v5394_v26  ;;  %1276 = vst [vmem:[#allocation2 + $0x3a] sm:$0xff] %v5394_v26 }
 0x15a   : > { %1277 = vst [vmem:[#allocation2 + $0x4a] sm:$0xff] %v5394_v26  ;;  %1278 = vst [vmem:[#allocation2 + $0x52] sm:$0xff] %v5394_v26 }
 0x15b   : > { %1279 = vst [vmem:[#allocation2 + $0x62] sm:$0xff] %v5394_v26  ;;  %1280 = vst [vmem:[#allocation2 + $0x6a] sm:$0xff] %v5394_v26 }
 0x15c   : > { %1281 = vst [vmem:[#allocation2 + $0x7a] sm:$0xff] %v5394_v26  ;;  %1282 = vst [vmem:[#allocation2 + $0x82] sm:$0xff] %v5394_v26 }
 0x15d   : > { %1283 = vst [vmem:[#allocation2 + $0x92] sm:$0xff] %v5394_v26  ;;  %1284 = vst [vmem:[#allocation2 + $0x9a] sm:$0xff] %v5394_v26 }
 0x15e   : > { %1285 = vst [vmem:[#allocation2 + $0xaa] sm:$0xff] %v5394_v26  ;;  %1286 = vst [vmem:[#allocation2 + $0xb2] sm:$0xff] %v5394_v26 }
 0x15f PF: > { %p4603_p6 = scmp.ne.s32.totalorder %s5375_s27, 1 }
 0x161   : > { %1290 = sbr.rel (%p4603_p6) target bundleno = 365 (0x16d), region = 56 }
 0x166   : > { %v5395_v29 = vmov -1e+30  }
 0x167   : > { %1291 = vst [vmem:[#allocation2 + $0x182] sm:$0xff] %v5395_v29  ;;  %1292 = vst [vmem:[#allocation2 + $0x18a] sm:$0xff] %v5395_v29 }
 0x168   : > { %1293 = vst [vmem:[#allocation2 + $0x19a] sm:$0xff] %v5395_v29  ;;  %1294 = vst [vmem:[#allocation2 + $0x1a2] sm:$0xff] %v5395_v29 }
 0x169   : > { %1295 = vst [vmem:[#allocation2 + $0x1b2] sm:$0xff] %v5395_v29  ;;  %1296 = vst [vmem:[#allocation2 + $0x1ba] sm:$0xff] %v5395_v29 }
 0x16a   : > { %1297 = vst [vmem:[#allocation2 + $0x1ca] sm:$0xff] %v5395_v29  ;;  %1298 = vst [vmem:[#allocation2 + $0x1d2] sm:$0xff] %v5395_v29 }
 0x16b   : > { %1299 = vst [vmem:[#allocation2 + $0x1e2] sm:$0xff] %v5395_v29  ;;  %1300 = vst [vmem:[#allocation2 + $0x1ea] sm:$0xff] %v5395_v29 }
 0x16c   : > { %1301 = vst [vmem:[#allocation2 + $0x1fa] sm:$0xff] %v5395_v29  ;;  %1302 = vst [vmem:[#allocation2 + $0x202] sm:$0xff] %v5395_v29 }
 0x16d PF: > { %v1303_v39 = vld [vmem:[#allocation2 + $0x30] sm:$0xff]  ;;  %v1304_v48 = vld [vmem:[#allocation2 + $0x38] sm:$0xff]  ;;  %v1305_v38 = vld [vmem:[#allocation2 + $0x48] sm:$0xff] }
 0x16e   : > { %v1343_v60 = vld [vmem:[#allocation2 + $0x31] sm:$0xff]  ;;  %v1344_v14 = vld [vmem:[#allocation2 + $0x39] sm:$0xff]  ;;  %v1345_v45 = vld [vmem:[#allocation2 + $0x49] sm:$0xff] }
 0x16f   : > { %v1383_v22 = vmax.f32 %v1303_v39, %v1343_v60  ;;  %v1423_v17 = vld [vmem:[#allocation2 + $0x32] sm:$0xff]  ;;  %v1384_v36 = vmax.f32 %v1304_v48, %v1344_v14  ;;  %v1424_v27 = vld [vmem:[#allocation2 + $0x3a] sm:$0xff]  ;;  %v1425_v32 = vld [vmem:[#allocation2 + $0x4a] sm:$0xff]  ;;  %v1385_v51 = vmax.f32 %v1305_v38, %v1345_v45 }
 0x170   : > { %v1503_v21 = vld [vmem:[#allocation2 + $0x33] sm:$0xff]  ;;  %v1504_v11 = vld [vmem:[#allocation2 + $0x3b] sm:$0xff]  ;;  %v1505_v54 = vld [vmem:[#allocation2 + $0x4b] sm:$0xff] }
 0x171   : > { %v1583_v33 = vld [vmem:[#allocation2 + $0x34] sm:$0xff]  ;;  %v1463_v10 = vmax.f32 %v1383_v22, %v1423_v17  ;;  %v1464_v43 = vmax.f32 %v1384_v36, %v1424_v27  ;;  %v1584_v55 = vld [vmem:[#allocation2 + $0x3c] sm:$0xff]  ;;  %v1585_v50 = vld [vmem:[#allocation2 + $0x4c] sm:$0xff]  ;;  %v1465_v2 = vmax.f32 %v1385_v51, %v1425_v32 }
 0x172   : > { %v1306_v41 = vld [vmem:[#allocation2 + $0x50] sm:$0xff]  ;;  %v1307_v63 = vld [vmem:[#allocation2 + $0x60] sm:$0xff]  ;;  %v1308_v19 = vld [vmem:[#allocation2 + $0x68] sm:$0xff] }
 0x173   : > { %v1346_v0 = vld [vmem:[#allocation2 + $0x51] sm:$0xff]  ;;  %v1543_v18 = vmax.f32 %v1463_v10, %v1503_v21  ;;  %v1544_v6 = vmax.f32 %v1464_v43, %v1504_v11  ;;  %v1347_v46 = vld [vmem:[#allocation2 + $0x61] sm:$0xff]  ;;  %v1348_v61 = vld [vmem:[#allocation2 + $0x69] sm:$0xff]  ;;  %v1545_v30 = vmax.f32 %v1465_v2, %v1505_v54 }
 0x174   : > { %v1386_v40 = vmax.f32 %v1306_v41, %v1346_v0  ;;  %v1426_v56 = vld [vmem:[#allocation2 + $0x52] sm:$0xff]  ;;  %v1387_v28 = vmax.f32 %v1307_v63, %v1347_v46  ;;  %v1427_v23 = vld [vmem:[#allocation2 + $0x62] sm:$0xff]  ;;  %v1388_v52 = vmax.f32 %v1308_v19, %v1348_v61  ;;  %v1428_v1 = vld [vmem:[#allocation2 + $0x6a] sm:$0xff] }
 0x175   : > { %v1506_v62 = vld [vmem:[#allocation2 + $0x53] sm:$0xff]  ;;  %v1623_v9 = vmax.f32 %v1543_v18, %v1583_v33  ;;  %v1624_v12 = vmax.f32 %v1544_v6, %v1584_v55  ;;  %v1507_v15 = vld [vmem:[#allocation2 + $0x63] sm:$0xff]  ;;  %v1508_v49 = vld [vmem:[#allocation2 + $0x6b] sm:$0xff]  ;;  %v5858_v60 = vmax.f32 %v1545_v30, %v1585_v50 }
 0x176   : > { %v1466_v7 = vmax.f32 %v1386_v40, %v1426_v56  ;;  %v1586_v57 = vld [vmem:[#allocation2 + $0x54] sm:$0xff]  ;;  %v1587_v3 = vld [vmem:[#allocation2 + $0x64] sm:$0xff]  ;;  %v1467_v16 = vmax.f32 %v1387_v28, %v1427_v23  ;;  %v1468_v26 = vmax.f32 %v1388_v52, %v1428_v1  ;;  %v1588_v14 = vld [vmem:[#allocation2 + $0x6c] sm:$0xff] }
 0x177   : > { %1663 = vst [vmem:[#allocation2 + $0x32] sm:$0xff] %v1623_v9  ;;  %1664 = vst [vmem:[#allocation2 + $0x3a] sm:$0xff] %v1624_v12  ;;  %v1309_v29 = vld [vmem:[#allocation2 + $0x78] sm:$0xff]  ;;  %v1310_v39 = vld [vmem:[#allocation2 + $0x80] sm:$0xff] }
 0x178   : > { %v1546_v53 = vmax.f32 %v1466_v7, %v1506_v62  ;;  %v1349_v48 = vld [vmem:[#allocation2 + $0x79] sm:$0xff]  ;;  %v1350_v22 = vld [vmem:[#allocation2 + $0x81] sm:$0xff]  ;;  %v1547_v36 = vmax.f32 %v1467_v16, %v1507_v15  ;;  %v1548_v27 = vmax.f32 %v1468_v26, %v1508_v49  ;;  %v1311_v0 = vld [vmem:[#allocation2 + $0x90] sm:$0xff] }
 0x179   : > { %v1389_v17 = vmax.f32 %v1309_v29, %v1349_v48  ;;  %v1429_v21 = vld [vmem:[#allocation2 + $0x7a] sm:$0xff]  ;;  %v1390_v38 = vmax.f32 %v1310_v39, %v1350_v22  ;;  %v1430_v41 = vld [vmem:[#allocation2 + $0x82] sm:$0xff]  ;;  %v1351_v54 = vld [vmem:[#allocation2 + $0x91] sm:$0xff] }
 0x17a   : > { %v5860_v33 = vmax.f32 %v1546_v53, %v1586_v57  ;;  %v1509_v10 = vld [vmem:[#allocation2 + $0x7b] sm:$0xff]  ;;  %v1510_v45 = vld [vmem:[#allocation2 + $0x83] sm:$0xff]  ;;  %v5862_v18 = vmax.f32 %v1547_v36, %v1587_v3  ;;  %v5864_v55 = vmax.f32 %v1548_v27, %v1588_v14  ;;  %v1431_v56 = vld [vmem:[#allocation2 + $0x92] sm:$0xff]  ;;  %v1391_v62 = vmax.f32 %v1311_v0, %v1351_v54 }
 0x17b   : > { %v1589_v11 = vld [vmem:[#allocation2 + $0x7c] sm:$0xff]  ;;  %v1469_v43 = vmax.f32 %v1389_v17, %v1429_v21  ;;  %v1470_v51 = vmax.f32 %v1390_v38, %v1430_v41  ;;  %v1590_v50 = vld [vmem:[#allocation2 + $0x84] sm:$0xff]  ;;  %v1511_v46 = vld [vmem:[#allocation2 + $0x93] sm:$0xff] }
 0x17c   : > { %v1312_v32 = vld [vmem:[#allocation2 + $0x98] sm:$0xff]  ;;  %v1790_v2 = vmax.f32 %v5858_v60, %v5862_v18  ;;  %v1791_v7 = vmax.f32 %v5860_v33, %v5864_v55  ;;  %v1313_v12 = vld [vmem:[#allocation2 + $0xa8] sm:$0xff]  ;;  %v1471_v28 = vmax.f32 %v1391_v62, %v1431_v56  ;;  %v1314_v15 = vld [vmem:[#allocation2 + $0xb0] sm:$0xff] }
 0x17d   : > { %v1352_v40 = vld [vmem:[#allocation2 + $0x99] sm:$0xff]  ;;  %v1549_v6 = vmax.f32 %v1469_v43, %v1509_v10  ;;  %v1550_v19 = vmax.f32 %v1470_v51, %v1510_v45  ;;  %v1353_v52 = vld [vmem:[#allocation2 + $0xa9] sm:$0xff]  ;;  %v1354_v30 = vld [vmem:[#allocation2 + $0xb1] sm:$0xff] }
 0x17e   : > { %v1392_v63 = vmax.f32 %v1312_v32, %v1352_v40  ;;  %v1432_v9 = vld [vmem:[#allocation2 + $0x9a] sm:$0xff]  ;;  %v1393_v49 = vmax.f32 %v1313_v12, %v1353_v52  ;;  %v1433_v16 = vld [vmem:[#allocation2 + $0xaa] sm:$0xff]  ;;  %v1394_v26 = vmax.f32 %v1314_v15, %v1354_v30  ;;  %v1551_v48 = vmax.f32 %v1471_v28, %v1511_v46  ;;  %v1434_v17 = vld [vmem:[#allocation2 + $0xb2] sm:$0xff] }
 0x17f   : > { %v1512_v61 = vld [vmem:[#allocation2 + $0x9b] sm:$0xff]  ;;  %v5870_v57 = vmax.f32 %v1549_v6, %v1589_v11  ;;  %v5872_v53 = vmax.f32 %v1550_v19, %v1590_v50  ;;  %v1513_v22 = vld [vmem:[#allocation2 + $0xab] sm:$0xff]  ;;  %v1514_v21 = vld [vmem:[#allocation2 + $0xb3] sm:$0xff] }
 0x180   : > { %v1472_v23 = vmax.f32 %v1392_v63, %v1432_v9  ;;  %v1591_v3 = vld [vmem:[#allocation2 + $0x94] sm:$0xff]  ;;  %v1592_v1 = vld [vmem:[#allocation2 + $0x9c] sm:$0xff]  ;;  %v1473_v10 = vmax.f32 %v1393_v49, %v1433_v16  ;;  %v1474_v11 = vmax.f32 %v1394_v26, %v1434_v17  ;;  %v1316_v41 = vld [vmem:[#allocation2 + $0xc8] sm:$0xff] }
 0x181   : > { %v1792_v29 = vmax.f32 %v5862_v18, %v5870_v57  ;;  %v1870_v39 = vmax.f32 %v1790_v2, %v5870_v57  ;;  %v1793_v36 = vmax.f32 %v5864_v55, %v5872_v53  ;;  %v1871_v27 = vmax.f32 %v1791_v7, %v5872_v53  ;;  %v1315_v38 = vld [vmem:[#allocation2 + $0xc0] sm:$0xff]  ;;  %v1593_v32 = vld [vmem:[#allocation2 + $0xac] sm:$0xff]  ;;  %v1594_v51 = vld [vmem:[#allocation2 + $0xb4] sm:$0xff] }
 0x182   : > { %v1552_v14 = vmax.f32 %v1472_v23, %v1512_v61  ;;  %v1355_v43 = vld [vmem:[#allocation2 + $0xc1] sm:$0xff]  ;;  %v5880_v45 = vmax.f32 %v1551_v48, %v1591_v3  ;;  %v1356_v54 = vld [vmem:[#allocation2 + $0xc9] sm:$0xff]  ;;  %v1553_v56 = vmax.f32 %v1473_v10, %v1513_v22  ;;  %v1554_v6 = vmax.f32 %v1474_v11, %v1514_v21  ;;  %v1317_v61 = vld [vmem:[#allocation2 + $0xd8] sm:$0xff] }
 0x183   : > { %v1395_v40 = vmax.f32 %v1315_v38, %v1355_v43  ;;  %v1435_v50 = vld [vmem:[#allocation2 + $0xc2] sm:$0xff]  ;;  %v1396_v62 = vmax.f32 %v1316_v41, %v1356_v54  ;;  %v1436_v63 = vld [vmem:[#allocation2 + $0xca] sm:$0xff]  ;;  %v1357_v3 = vld [vmem:[#allocation2 + $0xd9] sm:$0xff] }
 0x184   : > { %v5882_v0 = vmax.f32 %v1552_v14, %v1592_v1  ;;  %v1794_v9 = vmax.f32 %v5870_v57, %v5880_v45  ;;  %v1872_v2 = vmax.f32 %v1792_v29, %v5880_v45  ;;  %v1951_v7 = vmax.f32 %v1870_v39, %v5880_v45  ;;  %v1515_v46 = vld [vmem:[#allocation2 + $0xc3] sm:$0xff]  ;;  %v1516_v30 = vld [vmem:[#allocation2 + $0xcb] sm:$0xff]  ;;  %v1437_v48 = vld [vmem:[#allocation2 + $0xda] sm:$0xff] }
 0x185   : > { %v1318_v12 = vld [vmem:[#allocation2 + $0xe0] sm:$0xff]  ;;  %v5894_v15 = vmax.f32 %v1553_v56, %v1593_v32  ;;  %v5896_v52 = vmax.f32 %v1554_v6, %v1594_v51  ;;  %v1475_v49 = vmax.f32 %v1395_v40, %v1435_v50  ;;  %v1476_v26 = vmax.f32 %v1396_v62, %v1436_v63  ;;  %v1596_v29 = vld [vmem:[#allocation2 + $0xcc] sm:$0xff]  ;;  %v1320_v32 = vld [vmem:[#allocation2 + $0xf8] sm:$0xff] }
 0x186   : > { %v1795_v19 = vmax.f32 %v5872_v53, %v5882_v0  ;;  %v5891_v28 = vmax.f32 %v1793_v36, %v5882_v0  ;;  %v1952_v23 = vmax.f32 %v1871_v27, %v5882_v0  ;;  %v1358_v1 = vld [vmem:[#allocation2 + $0xe1] sm:$0xff]  ;;  %v1397_v39 = vmax.f32 %v1317_v61, %v1357_v3  ;;  %v1319_v10 = vld [vmem:[#allocation2 + $0xf0] sm:$0xff]  ;;  %v1360_v54 = vld [vmem:[#allocation2 + $0xf9] sm:$0xff] }
 0x187   : > { %v1595_v16 = vld [vmem:[#allocation2 + $0xc4] sm:$0xff]  ;;  %v1398_v14 = vmax.f32 %v1318_v12, %v1358_v1  ;;  %v1796_v17 = vmax.f32 %v5880_v45, %v5894_v15  ;;  %v2032_v21 = vmax.f32 %v1951_v7, %v5894_v15  ;;  %v1517_v36 = vld [vmem:[#allocation2 + $0xdb] sm:$0xff]  ;;  %v5902_v11 = vmax.f32 %v1794_v9, %v5894_v15  ;;  %v1359_v51 = vld [vmem:[#allocation2 + $0xf1] sm:$0xff] }
 0x188   : > { %v1438_v22 = vld [vmem:[#allocation2 + $0xe2] sm:$0xff]  ;;  %v1953_v38 = vmax.f32 %v1872_v2, %v5894_v15  ;;  %v1797_v41 = vmax.f32 %v5882_v0, %v5896_v52  ;;  %v2033_v43 = vmax.f32 %v1952_v23, %v5896_v52  ;;  %v1555_v40 = vmax.f32 %v1475_v49, %v1515_v46  ;;  %v1439_v62 = vld [vmem:[#allocation2 + $0xf2] sm:$0xff]  ;;  %v1440_v61 = vld [vmem:[#allocation2 + $0xfa] sm:$0xff] }
 0x189   : > { %v1518_v27 = vld [vmem:[#allocation2 + $0xe3] sm:$0xff]  ;;  %2072 = vst [vmem:[#allocation2 + $0x7a] sm:$0xff] %v2032_v21  ;;  %v1556_v56 = vmax.f32 %v1476_v26, %v1516_v30  ;;  %v1477_v6 = vmax.f32 %v1397_v39, %v1437_v48  ;;  %v1478_v50 = vmax.f32 %v1398_v14, %v1438_v22  ;;  %v1875_v63 = vmax.f32 %v1795_v19, %v5896_v52  ;;  %v1519_v48 = vld [vmem:[#allocation2 + $0xf3] sm:$0xff]  ;;  %v1520_v14 = vld [vmem:[#allocation2 + $0xfb] sm:$0xff] }
 0x18a   : > { %v1954_v9 = vmax.f32 %v5891_v28, %v5896_v52  ;;  %2073 = vst [vmem:[#allocation2 + $0x82] sm:$0xff] %v2033_v43  ;;  %v1399_v2 = vmax.f32 %v1319_v10, %v1359_v51  ;;  %v1400_v7 = vmax.f32 %v1320_v32, %v1360_v54  ;;  %v5911_v12 = vmax.f32 %v1555_v40, %v1595_v16  ;;  %v1597_v1 = vld [vmem:[#allocation2 + $0xdc] sm:$0xff]  ;;  %v1321_v30 = vld [vmem:[#allocation2 + $0x108] sm:$0xff]  ;;  %v1335_v25 = vld [vmem:[#allocation2 + $0x1b0] sm:$0xff] }
 0x18b   : > { %v5913_v23 = vmax.f32 %v1556_v56, %v1596_v29  ;;  %v1557_v3 = vmax.f32 %v1477_v6, %v1517_v36  ;;  %v1558_v46 = vmax.f32 %v1478_v50, %v1518_v27  ;;  %v1361_v49 = vld [vmem:[#allocation2 + $0x109] sm:$0xff]  ;;  %v1362_v27 = vld [vmem:[#allocation2 + $0x111] sm:$0xff]  ;;  %v1363_v50 = vld [vmem:[#allocation2 + $0x121] sm:$0xff] }
 0x18c   : > { %v1598_v26 = vld [vmem:[#allocation2 + $0xe4] sm:$0xff]  ;;  %v1479_v39 = vmax.f32 %v1399_v2, %v1439_v62  ;;  %v1480_v19 = vmax.f32 %v1400_v7, %v1440_v61  ;;  %v1401_v22 = vmax.f32 %v1321_v30, %v1361_v49  ;;  %v1798_v28 = vmax.f32 %v5894_v15, %v5911_v12  ;;  %v1322_v36 = vld [vmem:[#allocation2 + $0x110] sm:$0xff]  ;;  %v1448_v24 = vld [vmem:[#allocation2 + $0x15a] sm:$0xff] }
 0x18d   : > { %v1876_v21 = vmax.f32 %v1796_v17, %v5911_v12  ;;  %v1955_v16 = vmax.f32 %v5902_v11, %v5911_v12  ;;  %v2034_v29 = vmax.f32 %v1953_v38, %v5911_v12  ;;  %v1441_v10 = vld [vmem:[#allocation2 + $0x10a] sm:$0xff]  ;;  %v1799_v43 = vmax.f32 %v5896_v52, %v5913_v23  ;;  %v1323_v15 = vld [vmem:[#allocation2 + $0x120] sm:$0xff]  ;;  %v1599_v56 = vld [vmem:[#allocation2 + $0xf4] sm:$0xff] }
 0x18e   : > { %v1877_v32 = vmax.f32 %v1797_v41, %v5913_v23  ;;  %v1956_v51 = vmax.f32 %v1875_v63, %v5913_v23  ;;  %v2035_v54 = vmax.f32 %v1954_v9, %v5913_v23  ;;  %v1324_v40 = vld [vmem:[#allocation2 + $0x128] sm:$0xff]  ;;  %v5926_v17 = vmax.f32 %v1557_v3, %v1597_v1  ;;  %v1600_v52 = vld [vmem:[#allocation2 + $0xfc] sm:$0xff]  ;;  %v1442_v63 = vld [vmem:[#allocation2 + $0x112] sm:$0xff] }
 0x18f   : > { %2074 = vst [vmem:[#allocation2 + $0x92] sm:$0xff] %v2034_v29  ;;  %v5928_v11 = vmax.f32 %v1558_v46, %v1598_v26  ;;  %v1559_v38 = vmax.f32 %v1479_v39, %v1519_v48  ;;  %v1560_v6 = vmax.f32 %v1480_v19, %v1520_v14  ;;  %v1364_v62 = vld [vmem:[#allocation2 + $0x129] sm:$0xff]  ;;  %v1481_v2 = vmax.f32 %v1401_v22, %v1441_v10  ;;  %v1325_v39 = vld [vmem:[#allocation2 + $0x138] sm:$0xff]  ;;  %v1326_v22 = vld [vmem:[#allocation2 + $0x140] sm:$0xff] }
 0x190   : > { %2075 = vst [vmem:[#allocation2 + $0x9a] sm:$0xff] %v2035_v54  ;;  %v1521_v41 = vld [vmem:[#allocation2 + $0x10b] sm:$0xff]  ;;  %v1402_v7 = vmax.f32 %v1322_v36, %v1362_v27  ;;  %v1403_v61 = vmax.f32 %v1323_v15, %v1363_v50  ;;  %v1404_v9 = vmax.f32 %v1324_v40, %v1364_v62  ;;  %v1800_v30 = vmax.f32 %v5911_v12, %v5926_v17  ;;  %v1443_v49 = vld [vmem:[#allocation2 + $0x122] sm:$0xff]  ;;  %v1522_v54 = vld [vmem:[#allocation2 + $0x113] sm:$0xff] }
 0x191   : > { %v5933_v3 = vmax.f32 %v1798_v28, %v5926_v17  ;;  %v1957_v1 = vmax.f32 %v1876_v21, %v5926_v17  ;;  %v2036_v46 = vmax.f32 %v1955_v16, %v5926_v17  ;;  %v1444_v26 = vld [vmem:[#allocation2 + $0x12a] sm:$0xff]  ;;  %v1801_v48 = vmax.f32 %v5913_v23, %v5928_v11  ;;  %v1365_v28 = vld [vmem:[#allocation2 + $0x139] sm:$0xff]  ;;  %v1366_v29 = vld [vmem:[#allocation2 + $0x141] sm:$0xff] }
 0x192   : > { %v5940_v19 = vmax.f32 %v1799_v43, %v5928_v11  ;;  %v1958_v14 = vmax.f32 %v1877_v32, %v5928_v11  ;;  %v2037_v12 = vmax.f32 %v1956_v51, %v5928_v11  ;;  %v5944_v21 = vmax.f32 %v1559_v38, %v1599_v56  ;;  %v1601_v27 = vld [vmem:[#allocation2 + $0x10c] sm:$0xff]  ;;  %v1523_v23 = vld [vmem:[#allocation2 + $0x123] sm:$0xff]  ;;  %v1445_v50 = vld [vmem:[#allocation2 + $0x13a] sm:$0xff] }
 0x193   : > { %2076 = vst [vmem:[#allocation2 + $0xaa] sm:$0xff] %v2036_v46  ;;  %v5946_v16 = vmax.f32 %v1560_v6, %v1600_v52  ;;  %v1561_v36 = vmax.f32 %v1481_v2, %v1521_v41  ;;  %v1482_v10 = vmax.f32 %v1402_v7, %v1442_v63  ;;  %v1483_v43 = vmax.f32 %v1403_v61, %v1443_v49  ;;  %v1524_v40 = vld [vmem:[#allocation2 + $0x12b] sm:$0xff]  ;;  %v1446_v62 = vld [vmem:[#allocation2 + $0x142] sm:$0xff]  ;;  %v1328_v2 = vld [vmem:[#allocation2 + $0x158] sm:$0xff] }
 0x194   : > { %2077 = vst [vmem:[#allocation2 + $0xb2] sm:$0xff] %v2037_v12  ;;  %v1484_v15 = vmax.f32 %v1404_v9, %v1444_v26  ;;  %v1405_v32 = vmax.f32 %v1325_v39, %v1365_v28  ;;  %v1406_v51 = vmax.f32 %v1326_v22, %v1366_v29  ;;  %v1802_v46 = vmax.f32 %v5926_v17, %v5944_v21  ;;  %v1327_v52 = vld [vmem:[#allocation2 + $0x150] sm:$0xff]  ;;  %v1526_v22 = vld [vmem:[#allocation2 + $0x143] sm:$0xff]  ;;  %v1333_v47 = vld [vmem:[#allocation2 + $0x198] sm:$0xff] }
 0x195   : > { %v1880_v38 = vmax.f32 %v1800_v30, %v5944_v21  ;;  %v1959_v56 = vmax.f32 %v5933_v3, %v5944_v21  ;;  %v5954_v6 = vmax.f32 %v1957_v1, %v5944_v21  ;;  %v1367_v41 = vld [vmem:[#allocation2 + $0x151] sm:$0xff]  ;;  %v1803_v7 = vmax.f32 %v5928_v11, %v5946_v16  ;;  %v1603_v30 = vld [vmem:[#allocation2 + $0x124] sm:$0xff]  ;;  %v1368_v3 = vld [vmem:[#allocation2 + $0x159] sm:$0xff] }
 0x196   : > { %v1881_v63 = vmax.f32 %v1801_v48, %v5946_v16  ;;  %v1960_v61 = vmax.f32 %v5940_v19, %v5946_v16  ;;  %v5962_v17 = vmax.f32 %v1958_v14, %v5946_v16  ;;  %v1602_v9 = vld [vmem:[#allocation2 + $0x114] sm:$0xff]  ;;  %v5965_v1 = vmax.f32 %v1561_v36, %v1601_v27  ;;  %v1604_v12 = vld [vmem:[#allocation2 + $0x12c] sm:$0xff]  ;;  %v1454_v37 = vld [vmem:[#allocation2 + $0x1a2] sm:$0xff] }
 0x197   : > { %2078 = vst [vmem:[#allocation2 + $0xc2] sm:$0xff] %v5954_v6  ;;  %v1562_v49 = vmax.f32 %v1482_v10, %v1522_v54  ;;  %v1563_v26 = vmax.f32 %v1483_v43, %v1523_v23  ;;  %v1564_v39 = vmax.f32 %v1484_v15, %v1524_v40  ;;  %v1525_v11 = vld [vmem:[#allocation2 + $0x13b] sm:$0xff]  ;;  %v1485_v48 = vmax.f32 %v1405_v32, %v1445_v50  ;;  %v1447_v14 = vld [vmem:[#allocation2 + $0x152] sm:$0xff]  ;;  %v1329_v5 = vld [vmem:[#allocation2 + $0x168] sm:$0xff] }
 0x198   : > { %2079 = vst [vmem:[#allocation2 + $0xca] sm:$0xff] %v5962_v17  ;;  %v1486_v19 = vmax.f32 %v1406_v51, %v1446_v62  ;;  %v1407_v28 = vmax.f32 %v1327_v52, %v1367_v41  ;;  %v1408_v29 = vmax.f32 %v1328_v2, %v1368_v3  ;;  %v1804_v35 = vmax.f32 %v5944_v21, %v5965_v1  ;;  %v1369_v54 = vld [vmem:[#allocation2 + $0x169] sm:$0xff]  ;;  %v1605_v32 = vld [vmem:[#allocation2 + $0x13c] sm:$0xff]  ;;  %v1527_v62 = vld [vmem:[#allocation2 + $0x153] sm:$0xff] }
 0x199   : > { %v1882_v36 = vmax.f32 %v1802_v46, %v5965_v1  ;;  %v1961_v27 = vmax.f32 %v1880_v38, %v5965_v1  ;;  %v5973_v10 = vmax.f32 %v1959_v56, %v5965_v1  ;;  %v1642_v23 = vmax.f32 %v1562_v49, %v1602_v9  ;;  %v1606_v50 = vld [vmem:[#allocation2 + $0x144] sm:$0xff]  ;;  %v1528_v52 = vld [vmem:[#allocation2 + $0x15b] sm:$0xff]  ;;  %v1330_v38 = vld [vmem:[#allocation2 + $0x170] sm:$0xff] }
 0x19a   : > { %v5975_v43 = vmax.f32 %v1563_v26, %v1603_v30  ;;  %v5977_v15 = vmax.f32 %v1564_v39, %v1604_v12  ;;  %v1565_v40 = vmax.f32 %v1485_v48, %v1525_v11  ;;  %v1566_v51 = vmax.f32 %v1486_v19, %v1526_v22  ;;  %v1370_v3 = vld [vmem:[#allocation2 + $0x171] sm:$0xff]  ;;  %v1331_v26 = vld [vmem:[#allocation2 + $0x180] sm:$0xff]  ;;  %v1337_v34 = vld [vmem:[#allocation2 + $0x1c8] sm:$0xff] }
 0x19b   : > { %2080 = vst [vmem:[#allocation2 + $0xda] sm:$0xff] %v5973_v10  ;;  %v1487_v21 = vmax.f32 %v1407_v28, %v1447_v14  ;;  %v1488_v46 = vmax.f32 %v1408_v29, %v1448_v24  ;;  %v1409_v2 = vmax.f32 %v1329_v5, %v1369_v54  ;;  %v1805_v56 = vmax.f32 %v5946_v16, %v1642_v23  ;;  %v1449_v49 = vld [vmem:[#allocation2 + $0x16a] sm:$0xff]  ;;  %v1371_v22 = vld [vmem:[#allocation2 + $0x181] sm:$0xff] }
 0x19c   : > { %v1883_v41 = vmax.f32 %v1803_v7, %v1642_v23  ;;  %v1962_v9 = vmax.f32 %v1881_v63, %v1642_v23  ;;  %v5981_v30 = vmax.f32 %v1960_v61, %v1642_v23  ;;  %v1806_v39 = vmax.f32 %v5965_v1, %v5975_v43  ;;  %v1332_v5 = vld [vmem:[#allocation2 + $0x188] sm:$0xff]  ;;  %v1608_v29 = vld [vmem:[#allocation2 + $0x15c] sm:$0xff] }
 0x19d   : > { %v1884_v12 = vmax.f32 %v1804_v35, %v5975_v43  ;;  %v1963_v11 = vmax.f32 %v1882_v36, %v5975_v43  ;;  %v5988_v24 = vmax.f32 %v1961_v27, %v5975_v43  ;;  %v1372_v16 = vld [vmem:[#allocation2 + $0x189] sm:$0xff]  ;;  %v1807_v7 = vmax.f32 %v1642_v23, %v5977_v15  ;;  %v1607_v35 = vld [vmem:[#allocation2 + $0x154] sm:$0xff] }
 0x19e   : > { %2081 = vst [vmem:[#allocation2 + $0xe2] sm:$0xff] %v5981_v30  ;;  %v1885_v63 = vmax.f32 %v1805_v56, %v5977_v15  ;;  %v1964_v61 = vmax.f32 %v1883_v41, %v5977_v15  ;;  %v5995_v1 = vmax.f32 %v1962_v9, %v5977_v15  ;;  %v5998_v48 = vmax.f32 %v1565_v40, %v1605_v32  ;;  %v1529_v36 = vld [vmem:[#allocation2 + $0x16b] sm:$0xff]  ;;  %v1451_v41 = vld [vmem:[#allocation2 + $0x182] sm:$0xff]  ;;  %v1456_v42 = vld [vmem:[#allocation2 + $0x1ba] sm:$0xff] }
 0x19f   : > { %2082 = vst [vmem:[#allocation2 + $0xf2] sm:$0xff] %v5988_v24  ;;  %v6000_v19 = vmax.f32 %v1566_v51, %v1606_v50  ;;  %v1567_v28 = vmax.f32 %v1487_v21, %v1527_v62  ;;  %v1568_v14 = vmax.f32 %v1488_v46, %v1528_v52  ;;  %v1450_v27 = vld [vmem:[#allocation2 + $0x172] sm:$0xff]  ;;  %v1489_v54 = vmax.f32 %v1409_v2, %v1449_v49  ;;  %v1452_v20 = vld [vmem:[#allocation2 + $0x18a] sm:$0xff]  ;;  %v1334_v21 = vld [vmem:[#allocation2 + $0x1a0] sm:$0xff] }
 0x1a0   : > { %2083 = vst [vmem:[#allocation2 + $0xfa] sm:$0xff] %v5995_v1  ;;  %v1410_v23 = vmax.f32 %v1330_v38, %v1370_v3  ;;  %v1411_v56 = vmax.f32 %v1331_v26, %v1371_v22  ;;  %v1412_v9 = vmax.f32 %v1332_v5, %v1372_v16  ;;  %v1808_v40 = vmax.f32 %v5975_v43, %v5998_v48  ;;  %v1373_v62 = vld [vmem:[#allocation2 + $0x199] sm:$0xff]  ;;  %v1374_v46 = vld [vmem:[#allocation2 + $0x1a1] sm:$0xff]  ;;  %v1609_v3 = vld [vmem:[#allocation2 + $0x16c] sm:$0xff] }
 0x1a1   : > { %v1886_v32 = vmax.f32 %v1806_v39, %v5998_v48  ;;  %v1965_v50 = vmax.f32 %v1884_v12, %v5998_v48  ;;  %v6008_v51 = vmax.f32 %v1963_v11, %v5998_v48  ;;  %v1809_v52 = vmax.f32 %v5977_v15, %v6000_v19  ;;  %v1530_v11 = vld [vmem:[#allocation2 + $0x173] sm:$0xff]  ;;  %v1531_v5 = vld [vmem:[#allocation2 + $0x183] sm:$0xff]  ;;  %v1532_v15 = vld [vmem:[#allocation2 + $0x18b] sm:$0xff] }
 0x1a2   : > { %v6013_v38 = vmax.f32 %v1807_v7, %v6000_v19  ;;  %v1966_v2 = vmax.f32 %v1885_v63, %v6000_v19  ;;  %v6017_v43 = vmax.f32 %v1964_v61, %v6000_v19  ;;  %v6020_v49 = vmax.f32 %v1567_v28, %v1607_v35  ;;  %v1453_v63 = vld [vmem:[#allocation2 + $0x19a] sm:$0xff] }
 0x1a3   : > { %2084 = vst [vmem:[#allocation2 + $0x10a] sm:$0xff] %v6008_v51  ;;  %v6022_v26 = vmax.f32 %v1568_v14, %v1608_v29  ;;  %v1569_v39 = vmax.f32 %v1489_v54, %v1529_v36  ;;  %v1490_v12 = vmax.f32 %v1410_v23, %v1450_v27  ;;  %v1491_v22 = vmax.f32 %v1411_v56, %v1451_v41  ;;  %v1336_v36 = vld [vmem:[#allocation2 + $0x1b8] sm:$0xff]  ;;  %v1611_v41 = vld [vmem:[#allocation2 + $0x184] sm:$0xff] }
 0x1a4   : > { %7134 = vst [vmem:[#allocation17_spill] sm:$0xff] %v6017_v43  ;;  %2085 = vst [vmem:[#allocation2 + $0x112] sm:$0xff] %v6017_v43  ;;  %v1492_v16 = vmax.f32 %v1412_v9, %v1452_v20  ;;  %v1413_v7 = vmax.f32 %v1333_v47, %v1373_v62  ;;  %v1414_v61 = vmax.f32 %v1334_v21, %v1374_v46  ;;  %v1375_v27 = vld [vmem:[#allocation2 + $0x1b1] sm:$0xff]  ;;  %v1376_v54 = vld [vmem:[#allocation2 + $0x1b9] sm:$0xff] }
 0x1a5   : > { %v1810_v35 = vmax.f32 %v5998_v48, %v6020_v49  ;;  %v1888_v28 = vmax.f32 %v1808_v40, %v6020_v49  ;;  %v1967_v14 = vmax.f32 %v1886_v32, %v6020_v49  ;;  %v6030_v29 = vmax.f32 %v1965_v50, %v6020_v49  ;;  %v1610_v56 = vld [vmem:[#allocation2 + $0x174] sm:$0xff]  ;;  %v1612_v9 = vld [vmem:[#allocation2 + $0x18c] sm:$0xff] }
 0x1a6   : > { %v1811_v47 = vmax.f32 %v6000_v19, %v6022_v26  ;;  %v1889_v20 = vmax.f32 %v1809_v52, %v6022_v26  ;;  %v1968_v23 = vmax.f32 %v6013_v38, %v6022_v26  ;;  %v6038_v48 = vmax.f32 %v1966_v2, %v6022_v26  ;;  %v1533_v62 = vld [vmem:[#allocation2 + $0x19b] sm:$0xff]  ;;  %v1534_v19 = vld [vmem:[#allocation2 + $0x1a3] sm:$0xff]  ;;  %v1455_v46 = vld [vmem:[#allocation2 + $0x1b2] sm:$0xff] }
 0x1a7   : > { %7135 = vst [vmem:[#allocation18_spill] sm:$0xff] %v6030_v29  ;;  %2086 = vst [vmem:[#allocation2 + $0x122] sm:$0xff] %v6030_v29  ;;  %v6041_v40 = vmax.f32 %v1569_v39, %v1609_v3  ;;  %v1570_v32 = vmax.f32 %v1490_v12, %v1530_v11  ;;  %v1571_v50 = vmax.f32 %v1491_v22, %v1531_v5  ;;  %v1377_v43 = vld [vmem:[#allocation2 + $0x1c9] sm:$0xff] }
 0x1a8   : > { %7136 = vst [vmem:[#allocation19_spill] sm:$0xff] %v6038_v48  ;;  %v1572_v21 = vmax.f32 %v1492_v16, %v1532_v15  ;;  %2087 = vst [vmem:[#allocation2 + $0x12a] sm:$0xff] %v6038_v48  ;;  %v1493_v52 = vmax.f32 %v1413_v7, %v1453_v63  ;;  %v1494_v38 = vmax.f32 %v1414_v61, %v1454_v37  ;;  %v1614_v22 = vld [vmem:[#allocation2 + $0x1a4] sm:$0xff]  ;;  %v1536_v61 = vld [vmem:[#allocation2 + $0x1bb] sm:$0xff] }
 0x1a9   : > { %v1415_v58 = vmax.f32 %v1335_v25, %v1375_v27  ;;  %v1416_v2 = vmax.f32 %v1336_v36, %v1376_v54  ;;  %v1812_v29 = vmax.f32 %v6020_v49, %v6041_v40  ;;  %v1890_v3 = vmax.f32 %v1810_v35, %v6041_v40  ;;  %v1613_v25 = vld [vmem:[#allocation2 + $0x19c] sm:$0xff]  ;;  %v1535_v49 = vld [vmem:[#allocation2 + $0x1b3] sm:$0xff] }
 0x1aa   : > { %v1969_v39 = vmax.f32 %v1888_v28, %v6041_v40  ;;  %v6049_v12 = vmax.f32 %v1967_v14, %v6041_v40  ;;  %v1650_v11 = vmax.f32 %v1570_v32, %v1610_v56  ;;  %v6051_v5 = vmax.f32 %v1571_v50, %v1611_v41  ;;  %v1338_v35 = vld [vmem:[#allocation2 + $0x1d0] sm:$0xff] }
 0x1ab   : > { %v6053_v15 = vmax.f32 %v1572_v21, %v1612_v9  ;;  %v1573_v37 = vmax.f32 %v1493_v52, %v1533_v62  ;;  %v1574_v16 = vmax.f32 %v1494_v38, %v1534_v19  ;;  %v1495_v7 = vmax.f32 %v1415_v58, %v1455_v46  ;;  %v1378_v56 = vld [vmem:[#allocation2 + $0x1d1] sm:$0xff]  ;;  %v1339_v9 = vld [vmem:[#allocation2 + $0x1e0] sm:$0xff] }
 0x1ac   : > { %7137 = vst [vmem:[#allocation20_spill] sm:$0xff] %v6049_v12  ;;  %2088 = vst [vmem:[#allocation2 + $0x13a] sm:$0xff] %v6049_v12  ;;  %v1496_v63 = vmax.f32 %v1416_v2, %v1456_v42  ;;  %v1417_v28 = vmax.f32 %v1337_v34, %v1377_v43  ;;  %v1813_v14 = vmax.f32 %v6022_v26, %v1650_v11  ;;  %v1457_v41 = vld [vmem:[#allocation2 + $0x1ca] sm:$0xff]  ;;  %v1379_v43 = vld [vmem:[#allocation2 + $0x1e1] sm:$0xff] }
 0x1ad   : > { %v1891_v36 = vmax.f32 %v1811_v47, %v1650_v11  ;;  %v1970_v27 = vmax.f32 %v1889_v20, %v1650_v11  ;;  %v6057_v54 = vmax.f32 %v1968_v23, %v1650_v11  ;;  %v1814_v32 = vmax.f32 %v6041_v40, %v6051_v5  ;;  %v1340_v34 = vld [vmem:[#allocation2 + $0x1e8] sm:$0xff]  ;;  %v1616_v52 = vld [vmem:[#allocation2 + $0x1bc] sm:$0xff]  ;;  %v1458_v2 = vld [vmem:[#allocation2 + $0x1d2] sm:$0xff] }
 0x1ae   : > { %v1892_v50 = vmax.f32 %v1812_v29, %v6051_v5  ;;  %v1971_v58 = vmax.f32 %v1890_v3, %v6051_v5  ;;  %v6064_v42 = vmax.f32 %v1969_v39, %v6051_v5  ;;  %v1380_v26 = vld [vmem:[#allocation2 + $0x1e9] sm:$0xff]  ;;  %v1815_v47 = vmax.f32 %v1650_v11, %v6053_v15  ;;  %v1615_v29 = vld [vmem:[#allocation2 + $0x1b4] sm:$0xff] }
 0x1af   : > { %7138 = vst [vmem:[#allocation21_spill] sm:$0xff] %v6057_v54  ;;  %2089 = vst [vmem:[#allocation2 + $0x142] sm:$0xff] %v6057_v54  ;;  %v1893_v20 = vmax.f32 %v1813_v14, %v6053_v15  ;;  %v1972_v23 = vmax.f32 %v1891_v36, %v6053_v15  ;;  %v6071_v40 = vmax.f32 %v1970_v27, %v6053_v15  ;;  %v1537_v38 = vld [vmem:[#allocation2 + $0x1cb] sm:$0xff]  ;;  %v1459_v14 = vld [vmem:[#allocation2 + $0x1e2] sm:$0xff] }
 0x1b0   : > { %7139 = vst [vmem:[#allocation22_spill] sm:$0xff] %v6064_v42  ;;  %2090 = vst [vmem:[#allocation2 + $0x152] sm:$0xff] %v6064_v42  ;;  %v6074_v21 = vmax.f32 %v1573_v37, %v1613_v25  ;;  %v6076_v62 = vmax.f32 %v1574_v16, %v1614_v22  ;;  %v1575_v19 = vmax.f32 %v1495_v7, %v1535_v49  ;;  %v1460_v27 = vld [vmem:[#allocation2 + $0x1ea] sm:$0xff]  ;;  %v1341_v54 = vld [vmem:[#allocation2 + $0x1f8] sm:$0xff] }
 0x1b1   : > { %7140 = vst [vmem:[#allocation23_spill] sm:$0xff] %v6071_v40  ;;  %v1576_v46 = vmax.f32 %v1496_v63, %v1536_v61  ;;  %2091 = vst [vmem:[#allocation2 + $0x15a] sm:$0xff] %v6071_v40  ;;  %v1497_v3 = vmax.f32 %v1417_v28, %v1457_v41  ;;  %v1418_v39 = vmax.f32 %v1338_v35, %v1378_v56  ;;  %v1342_v7 = vld [vmem:[#allocation2 + $0x200] sm:$0xff] }
 0x1b2   : > { %v1419_v11 = vmax.f32 %v1339_v9, %v1379_v43  ;;  %v1420_v36 = vmax.f32 %v1340_v34, %v1380_v26  ;;  %v1816_v37 = vmax.f32 %v6051_v5, %v6074_v21  ;;  %v1894_v25 = vmax.f32 %v1814_v32, %v6074_v21  ;;  %v1381_v49 = vld [vmem:[#allocation2 + $0x1f9] sm:$0xff]  ;;  %v1382_v63 = vld [vmem:[#allocation2 + $0x201] sm:$0xff]  ;;  %v1617_v32 = vld [vmem:[#allocation2 + $0x1cc] sm:$0xff] }
 0x1b3   : > { %v1973_v22 = vmax.f32 %v1892_v50, %v6074_v21  ;;  %v6084_v16 = vmax.f32 %v1971_v58, %v6074_v21  ;;  %v1817_v61 = vmax.f32 %v6053_v15, %v6076_v62  ;;  %v1895_v35 = vmax.f32 %v1815_v47, %v6076_v62  ;;  %v1538_v58 = vld [vmem:[#allocation2 + $0x1d3] sm:$0xff]  ;;  %v1539_v34 = vld [vmem:[#allocation2 + $0x1e3] sm:$0xff]  ;;  %v1540_v26 = vld [vmem:[#allocation2 + $0x1eb] sm:$0xff] }
 0x1b4   : > { %v1974_v28 = vmax.f32 %v1893_v20, %v6076_v62  ;;  %v6091_v56 = vmax.f32 %v1972_v23, %v6076_v62  ;;  %v1655_v5 = vmax.f32 %v1575_v19, %v1615_v29  ;;  %v6094_v41 = vmax.f32 %v1576_v46, %v1616_v52  ;;  %v1461_v20 = vld [vmem:[#allocation2 + $0x1fa] sm:$0xff]  ;;  %v1462_v23 = vld [vmem:[#allocation2 + $0x202] sm:$0xff] }
 0x1b5   : > { %7141 = vst [vmem:[#allocation24_spill] sm:$0xff] %v6084_v16  ;;  %2092 = vst [vmem:[#allocation2 + $0x16a] sm:$0xff] %v6084_v16  ;;  %v1577_v9 = vmax.f32 %v1497_v3, %v1537_v38  ;;  %v1498_v50 = vmax.f32 %v1418_v39, %v1458_v2  ;;  %v1499_v15 = vmax.f32 %v1419_v11, %v1459_v14  ;;  %v1703_v46 = vld [vmem:[#allocation2 + $0x2] sm:$0xff]  ;;  %v1705_v52 = vld [vmem:[#allocation2 + $0x1a] sm:$0xff] }
 0x1b6   : > { %7142 = vst [vmem:[#allocation25_spill] sm:$0xff] %v6091_v56  ;;  %2093 = vst [vmem:[#allocation2 + $0x172] sm:$0xff] %v6091_v56  ;;  %v1500_v43 = vmax.f32 %v1420_v36, %v1460_v27  ;;  %v1421_v47 = vmax.f32 %v1341_v54, %v1381_v49  ;;  %v1422_v40 = vmax.f32 %v1342_v7, %v1382_v63  ;;  %v1707_v38 = vld [vmem:[#allocation2 + $0x32] sm:$0xff]  ;;  %v1619_v27 = vld [vmem:[#allocation2 + $0x1e4] sm:$0xff] }
 0x1b7   : > { %v1818_v42 = vmax.f32 %v6074_v21, %v1655_v5  ;;  %v1896_v16 = vmax.f32 %v1816_v37, %v1655_v5  ;;  %v1975_v29 = vmax.f32 %v1894_v25, %v1655_v5  ;;  %v2054_v19 = vmax.f32 %v1973_v22, %v1655_v5  ;;  %v1618_v11 = vld [vmem:[#allocation2 + $0x1d4] sm:$0xff]  ;;  %v1620_v25 = vld [vmem:[#allocation2 + $0x1ec] sm:$0xff] }
 0x1b8   : > { %v1819_v2 = vmax.f32 %v6076_v62, %v6094_v41  ;;  %v1897_v3 = vmax.f32 %v1817_v61, %v6094_v41  ;;  %v1976_v39 = vmax.f32 %v1895_v35, %v6094_v41  ;;  %v2055_v54 = vmax.f32 %v1974_v28, %v6094_v41  ;;  %v1541_v22 = vld [vmem:[#allocation2 + $0x1fb] sm:$0xff]  ;;  %v1542_v62 = vld [vmem:[#allocation2 + $0x203] sm:$0xff] }
 0x1b9   : > { %2094 = vst [vmem:[#allocation2 + $0x182] sm:$0xff] %v2054_v19  ;;  %v6103_v14 = vmax.f32 %v1577_v9, %v1617_v32  ;;  %v1578_v21 = vmax.f32 %v1498_v50, %v1538_v58  ;;  %v1579_v36 = vmax.f32 %v1499_v15, %v1539_v34  ;;  %v1580_v37 = vmax.f32 %v1500_v43, %v1540_v26 }
 0x1ba   : > { %2095 = vst [vmem:[#allocation2 + $0x18a] sm:$0xff] %v2055_v54  ;;  %v1501_v7 = vmax.f32 %v1421_v47, %v1461_v20  ;;  %v1502_v49 = vmax.f32 %v1422_v40, %v1462_v23  ;;  %v1784_v63 = vmax.f32 %v1703_v46, %v1705_v52  ;;  %v1786_v61 = vmax.f32 %v1705_v52, %v1707_v38  ;;  %v1621_v23 = vld [vmem:[#allocation2 + $0x1fc] sm:$0xff] }
 0x1bb   : > { %v1820_v35 = vmax.f32 %v1655_v5, %v6103_v14  ;;  %v1898_v28 = vmax.f32 %v1818_v42, %v6103_v14  ;;  %v1977_v19 = vmax.f32 %v1896_v16, %v6103_v14  ;;  %v2056_v9 = vmax.f32 %v1975_v29, %v6103_v14  ;;  %v1622_v16 = vld [vmem:[#allocation2 + $0x204] sm:$0xff] }
 0x1bc   : > { %v1658_v32 = vmax.f32 %v1578_v21, %v1618_v11  ;;  %v1659_v50 = vmax.f32 %v1579_v36, %v1619_v27  ;;  %v1660_v58 = vmax.f32 %v1580_v37, %v1620_v25  ;;  %v1581_v34 = vmax.f32 %v1501_v7, %v1541_v22  ;;  %v1704_v11 = vld [vmem:[#allocation2 + $0xa] sm:$0xff]  ;;  %v1706_v21 = vld [vmem:[#allocation2 + $0x22] sm:$0xff]  ;;  %v1708_v36 = vld [vmem:[#allocation2 + $0x3a] sm:$0xff] }
 0x1bd   : > { %2096 = vst [vmem:[#allocation2 + $0x19a] sm:$0xff] %v2056_v9  ;;  %v1582_v15 = vmax.f32 %v1502_v49, %v1542_v62  ;;  %v1788_v43 = vmax.f32 %v1707_v38, %v5858_v60  ;;  %v1864_v40 = vmax.f32 %v1784_v63, %v1707_v38  ;;  %v1866_v26 = vmax.f32 %v1786_v61, %v5858_v60 }
 0x1be   : > { %v1821_v47 = vmax.f32 %v6094_v41, %v1658_v32  ;;  %v1899_v5 = vmax.f32 %v1819_v2, %v1658_v32  ;;  %v1978_v20 = vmax.f32 %v1897_v3, %v1658_v32  ;;  %v2057_v42 = vmax.f32 %v1976_v39, %v1658_v32 }
 0x1bf   : > { %v1822_v29 = vmax.f32 %v6103_v14, %v1659_v50  ;;  %v1900_v46 = vmax.f32 %v1820_v35, %v1659_v50  ;;  %v1979_v52 = vmax.f32 %v1898_v28, %v1659_v50  ;;  %v2058_v54 = vmax.f32 %v1977_v19, %v1659_v50  ;;  %v2022_v28 = vld [vmem:[#allocation2 + $0x212] sm:$0xff]  ;;  %v2023_v19 = vld [vmem:[#allocation2 + $0x21a] sm:$0xff] }
 0x1c0   : > { %2097 = vst [vmem:[#allocation2 + $0x1a2] sm:$0xff] %v2057_v42  ;;  %v1823_v27 = vmax.f32 %v1658_v32, %v1660_v58  ;;  %v1901_v38 = vmax.f32 %v1821_v47, %v1660_v58  ;;  %v1980_v37 = vmax.f32 %v1899_v5, %v1660_v58  ;;  %v2059_v25 = vmax.f32 %v1978_v20, %v1660_v58  ;;  %v2024_v20 = vld [vmem:[#allocation2 + $0x22a] sm:$0xff]  ;;  %v2025_v42 = vld [vmem:[#allocation2 + $0x232] sm:$0xff] }
 0x1c1   : > { %2098 = vst [vmem:[#allocation2 + $0x1b2] sm:$0xff] %v2058_v54  ;;  %v1661_v41 = vmax.f32 %v1581_v34, %v1621_v23  ;;  %v1662_v2 = vmax.f32 %v1582_v15, %v1622_v16  ;;  %v1868_v3 = vmax.f32 %v1788_v43, %v5862_v18  ;;  %v1945_v39 = vmax.f32 %v1864_v40, %v5858_v60 }
 0x1c2   : > { %2099 = vst [vmem:[#allocation2 + $0x1ba] sm:$0xff] %v2059_v25  ;;  %v1947_v14 = vmax.f32 %v1866_v26, %v5862_v18  ;;  %v1785_v22 = vmax.f32 %v1704_v11, %v1706_v21  ;;  %v1787_v7 = vmax.f32 %v1706_v21, %v1708_v36  ;;  %v1789_v49 = vmax.f32 %v1708_v36, %v5860_v33 }
 0x1c3   : > { %v1981_v62 = vmax.f32 %v1900_v46, %v1661_v41  ;;  %v2060_v63 = vmax.f32 %v1979_v52, %v1661_v41  ;;  %v1982_v61 = vmax.f32 %v1901_v38, %v1662_v2  ;;  %v2061_v35 = vmax.f32 %v1980_v37, %v1662_v2 }
 0x1c4   : > { %v1949_v9 = vmax.f32 %v1868_v3, %v5870_v57  ;;  %v2026_v32 = vmax.f32 %v1945_v39, %v5862_v18  ;;  %v2028_v50 = vmax.f32 %v1947_v14, %v5870_v57  ;;  %v1865_v60 = vmax.f32 %v1785_v22, %v1708_v36 }
 0x1c5   : > { %v2062_v58 = vmax.f32 %v1981_v62, %v2022_v28  ;;  %2100 = vst [vmem:[#allocation2 + $0x1ca] sm:$0xff] %v2060_v63  ;;  %v2063_v34 = vmax.f32 %v1982_v61, %v2023_v19  ;;  %2101 = vst [vmem:[#allocation2 + $0x1d2] sm:$0xff] %v2061_v35  ;;  %v1867_v15 = vmax.f32 %v1787_v7, %v5860_v33 }
 0x1c6   : > { %v1869_v43 = vmax.f32 %v1789_v49, %v5864_v55  ;;  %v2030_v40 = vmax.f32 %v1949_v9, %v5880_v45  ;;  %2066 = vst [vmem:[#allocation2 + $0x32] sm:$0xff] %v2026_v32  ;;  %2068 = vst [vmem:[#allocation2 + $0x4a] sm:$0xff] %v2028_v50  ;;  %v1946_v26 = vmax.f32 %v1865_v60, %v5860_v33 }
 0x1c7   : > { %v1902_v47 = vmax.f32 %v1822_v29, %v1661_v41  ;;  %v1903_v5 = vmax.f32 %v1823_v27, %v1662_v2  ;;  %2102 = vst [vmem:[#allocation2 + $0x1e2] sm:$0xff] %v2062_v58  ;;  %2103 = vst [vmem:[#allocation2 + $0x1ea] sm:$0xff] %v2063_v34  ;;  %v1948_v18 = vmax.f32 %v1867_v15, %v5864_v55 }
 0x1c8   : > { %v1950_v57 = vmax.f32 %v1869_v43, %v5872_v53  ;;  %2070 = vst [vmem:[#allocation2 + $0x62] sm:$0xff] %v2030_v40  ;;  %v2027_v23 = vmax.f32 %v1946_v26, %v5864_v55 }
 0x1c9   : > { %v1983_v16 = vmax.f32 %v1902_v47, %v2022_v28  ;;  %v1984_v46 = vmax.f32 %v1903_v5, %v2023_v19  ;;  %v2029_v45 = vmax.f32 %v1948_v18, %v5872_v53  ;;  %2108 = sbr.rel (%p4602_p5) target bundleno = 469 (0x1d5), region = 60 }
 0x1ca   : > { %v2031_v52 = vmax.f32 %v1950_v57, %v5882_v0  ;;  %2067 = vst [vmem:[#allocation2 + $0x3a] sm:$0xff] %v2027_v23 }
 0x1cb   : > { %v2064_v33 = vmax.f32 %v1983_v16, %v2024_v20  ;;  %v2065_v29 = vmax.f32 %v1984_v46, %v2025_v42  ;;  %2069 = vst [vmem:[#allocation2 + $0x52] sm:$0xff] %v2029_v45 }
 0x1cc   : > { %2071 = vst [vmem:[#allocation2 + $0x6a] sm:$0xff] %v2031_v52 }
 0x1cd   : > { %2104 = vst [vmem:[#allocation2 + $0x1fa] sm:$0xff] %v2064_v33  ;;  %2105 = vst [vmem:[#allocation2 + $0x202] sm:$0xff] %v2065_v29 }
 0x1ce   : > { %v5396_v54 = vmov -1e+30  }
 0x1cf   : > { %2109 = vst [vmem:[#allocation2 + $0x32] sm:$0xff] %v5396_v54  ;;  %2110 = vst [vmem:[#allocation2 + $0x3a] sm:$0xff] %v5396_v54 }
 0x1d0   : > { %2111 = vst [vmem:[#allocation2 + $0x4a] sm:$0xff] %v5396_v54  ;;  %2112 = vst [vmem:[#allocation2 + $0x52] sm:$0xff] %v5396_v54 }
 0x1d1   : > { %2113 = vst [vmem:[#allocation2 + $0x62] sm:$0xff] %v5396_v54  ;;  %2114 = vst [vmem:[#allocation2 + $0x6a] sm:$0xff] %v5396_v54 }
 0x1d2   : > { %2115 = vst [vmem:[#allocation2 + $0x7a] sm:$0xff] %v5396_v54  ;;  %2116 = vst [vmem:[#allocation2 + $0x82] sm:$0xff] %v5396_v54 }
 0x1d3   : > { %2117 = vst [vmem:[#allocation2 + $0x92] sm:$0xff] %v5396_v54  ;;  %2118 = vst [vmem:[#allocation2 + $0x9a] sm:$0xff] %v5396_v54 }
 0x1d4   : > { %2119 = vst [vmem:[#allocation2 + $0xaa] sm:$0xff] %v5396_v54  ;;  %2120 = vst [vmem:[#allocation2 + $0xb2] sm:$0xff] %v5396_v54 }
 0x1d5 PF: > { %2123 = sbr.rel (%p4603_p6) target bundleno = 481 (0x1e1), region = 64 }
 0x1da   : > { %v5397_v55 = vmov -1e+30  }
 0x1db   : > { %2124 = vst [vmem:[#allocation2 + $0x182] sm:$0xff] %v5397_v55  ;;  %2125 = vst [vmem:[#allocation2 + $0x18a] sm:$0xff] %v5397_v55 }
 0x1dc   : > { %2126 = vst [vmem:[#allocation2 + $0x19a] sm:$0xff] %v5397_v55  ;;  %2127 = vst [vmem:[#allocation2 + $0x1a2] sm:$0xff] %v5397_v55 }
 0x1dd   : > { %2128 = vst [vmem:[#allocation2 + $0x1b2] sm:$0xff] %v5397_v55  ;;  %2129 = vst [vmem:[#allocation2 + $0x1ba] sm:$0xff] %v5397_v55 }
 0x1de   : > { %2130 = vst [vmem:[#allocation2 + $0x1ca] sm:$0xff] %v5397_v55  ;;  %2131 = vst [vmem:[#allocation2 + $0x1d2] sm:$0xff] %v5397_v55 }
 0x1df   : > { %2132 = vst [vmem:[#allocation2 + $0x1e2] sm:$0xff] %v5397_v55  ;;  %2133 = vst [vmem:[#allocation2 + $0x1ea] sm:$0xff] %v5397_v55 }
 0x1e0   : > { %2134 = vst [vmem:[#allocation2 + $0x1fa] sm:$0xff] %v5397_v55  ;;  %2135 = vst [vmem:[#allocation2 + $0x202] sm:$0xff] %v5397_v55 }
 0x1e1 PF: > { %v2136_v53 = vld [vmem:[#allocation2 + $0x30] sm:$0xff]  ;;  %v2137_v0 = vld [vmem:[#allocation2 + $0x38] sm:$0xff]  ;;  %v2138_v39 = vld [vmem:[#allocation2 + $0x48] sm:$0xff] }
 0x1e2   : > { %v2176_v11 = vld [vmem:[#allocation2 + $0x31] sm:$0xff]  ;;  %v2177_v21 = vld [vmem:[#allocation2 + $0x39] sm:$0xff]  ;;  %v2178_v7 = vld [vmem:[#allocation2 + $0x49] sm:$0xff] }
 0x1e3   : > { %v2216_v36 = vmax.f32 %v2136_v53, %v2176_v11  ;;  %v2256_v27 = vld [vmem:[#allocation2 + $0x32] sm:$0xff]  ;;  %v2217_v25 = vmax.f32 %v2137_v0, %v2177_v21  ;;  %v2257_v41 = vld [vmem:[#allocation2 + $0x3a] sm:$0xff]  ;;  %v2258_v62 = vld [vmem:[#allocation2 + $0x4a] sm:$0xff]  ;;  %v2218_v35 = vmax.f32 %v2138_v39, %v2178_v7 }
 0x1e4   : > { %v2336_v38 = vld [vmem:[#allocation2 + $0x33] sm:$0xff]  ;;  %v2337_v3 = vld [vmem:[#allocation2 + $0x3b] sm:$0xff]  ;;  %v2338_v28 = vld [vmem:[#allocation2 + $0x4b] sm:$0xff] }
 0x1e5   : > { %v2416_v37 = vld [vmem:[#allocation2 + $0x34] sm:$0xff]  ;;  %v2296_v2 = vmax.f32 %v2216_v36, %v2256_v27  ;;  %v2297_v22 = vmax.f32 %v2217_v25, %v2257_v41  ;;  %v2417_v61 = vld [vmem:[#allocation2 + $0x3c] sm:$0xff]  ;;  %v2418_v50 = vld [vmem:[#allocation2 + $0x4c] sm:$0xff]  ;;  %v2298_v15 = vmax.f32 %v2218_v35, %v2258_v62 }
 0x1e6   : > { %v2139_v14 = vld [vmem:[#allocation2 + $0x50] sm:$0xff]  ;;  %v2140_v58 = vld [vmem:[#allocation2 + $0x60] sm:$0xff]  ;;  %v2141_v40 = vld [vmem:[#allocation2 + $0x68] sm:$0xff] }
 0x1e7   : > { %v2179_v49 = vld [vmem:[#allocation2 + $0x51] sm:$0xff]  ;;  %v2376_v63 = vmax.f32 %v2296_v2, %v2336_v38  ;;  %v2377_v32 = vmax.f32 %v2297_v22, %v2337_v3  ;;  %v2180_v26 = vld [vmem:[#allocation2 + $0x61] sm:$0xff]  ;;  %v2181_v47 = vld [vmem:[#allocation2 + $0x69] sm:$0xff]  ;;  %v2378_v16 = vmax.f32 %v2298_v15, %v2338_v28 }
 0x1e8   : > { %v2219_v19 = vmax.f32 %v2139_v14, %v2179_v49  ;;  %v2259_v9 = vld [vmem:[#allocation2 + $0x52] sm:$0xff]  ;;  %v2220_v57 = vmax.f32 %v2140_v58, %v2180_v26  ;;  %v2260_v20 = vld [vmem:[#allocation2 + $0x62] sm:$0xff]  ;;  %v2221_v23 = vmax.f32 %v2141_v40, %v2181_v47  ;;  %v2261_v52 = vld [vmem:[#allocation2 + $0x6a] sm:$0xff] }
 0x1e9   : > { %v2339_v60 = vld [vmem:[#allocation2 + $0x53] sm:$0xff]  ;;  %v2456_v34 = vmax.f32 %v2376_v63, %v2416_v37  ;;  %v2457_v5 = vmax.f32 %v2377_v32, %v2417_v61  ;;  %v2340_v42 = vld [vmem:[#allocation2 + $0x63] sm:$0xff]  ;;  %v2341_v33 = vld [vmem:[#allocation2 + $0x6b] sm:$0xff]  ;;  %v6133_v11 = vmax.f32 %v2378_v16, %v2418_v50 }
 0x1ea   : > { %v2299_v43 = vmax.f32 %v2219_v19, %v2259_v9  ;;  %v2419_v18 = vld [vmem:[#allocation2 + $0x54] sm:$0xff]  ;;  %v2420_v45 = vld [vmem:[#allocation2 + $0x64] sm:$0xff]  ;;  %v2300_v29 = vmax.f32 %v2220_v57, %v2260_v20  ;;  %v2301_v54 = vmax.f32 %v2221_v23, %v2261_v52  ;;  %v2421_v21 = vld [vmem:[#allocation2 + $0x6c] sm:$0xff] }
 0x1eb   : > { %2496 = vst [vmem:[#allocation2 + $0x32] sm:$0xff] %v2456_v34  ;;  %2497 = vst [vmem:[#allocation2 + $0x3a] sm:$0xff] %v2457_v5  ;;  %v2142_v55 = vld [vmem:[#allocation2 + $0x78] sm:$0xff]  ;;  %v2143_v53 = vld [vmem:[#allocation2 + $0x80] sm:$0xff] }
 0x1ec   : > { %v2379_v46 = vmax.f32 %v2299_v43, %v2339_v60  ;;  %v2182_v0 = vld [vmem:[#allocation2 + $0x79] sm:$0xff]  ;;  %v2183_v36 = vld [vmem:[#allocation2 + $0x81] sm:$0xff]  ;;  %v2380_v25 = vmax.f32 %v2300_v29, %v2340_v42  ;;  %v2381_v41 = vmax.f32 %v2301_v54, %v2341_v33  ;;  %v2144_v49 = vld [vmem:[#allocation2 + $0x90] sm:$0xff] }
 0x1ed   : > { %v2222_v27 = vmax.f32 %v2142_v55, %v2182_v0  ;;  %v2262_v38 = vld [vmem:[#allocation2 + $0x7a] sm:$0xff]  ;;  %v2223_v39 = vmax.f32 %v2143_v53, %v2183_v36  ;;  %v2263_v14 = vld [vmem:[#allocation2 + $0x82] sm:$0xff]  ;;  %v2184_v28 = vld [vmem:[#allocation2 + $0x91] sm:$0xff] }
 0x1ee   : > { %v6135_v37 = vmax.f32 %v2379_v46, %v2419_v18  ;;  %v2342_v2 = vld [vmem:[#allocation2 + $0x7b] sm:$0xff]  ;;  %v2343_v7 = vld [vmem:[#allocation2 + $0x83] sm:$0xff]  ;;  %v6137_v63 = vmax.f32 %v2380_v25, %v2420_v45  ;;  %v6139_v61 = vmax.f32 %v2381_v41, %v2421_v21  ;;  %v2264_v9 = vld [vmem:[#allocation2 + $0x92] sm:$0xff]  ;;  %v2224_v60 = vmax.f32 %v2144_v49, %v2184_v28 }
 0x1ef   : > { %v2422_v3 = vld [vmem:[#allocation2 + $0x7c] sm:$0xff]  ;;  %v2302_v22 = vmax.f32 %v2222_v27, %v2262_v38  ;;  %v2303_v35 = vmax.f32 %v2223_v39, %v2263_v14  ;;  %v2423_v50 = vld [vmem:[#allocation2 + $0x84] sm:$0xff]  ;;  %v2344_v26 = vld [vmem:[#allocation2 + $0x93] sm:$0xff] }
 0x1f0   : > { %v2145_v62 = vld [vmem:[#allocation2 + $0x98] sm:$0xff]  ;;  %v2622_v15 = vmax.f32 %v6133_v11, %v6137_v63  ;;  %v2623_v43 = vmax.f32 %v6135_v37, %v6139_v61  ;;  %v2146_v5 = vld [vmem:[#allocation2 + $0xa8] sm:$0xff]  ;;  %v2304_v57 = vmax.f32 %v2224_v60, %v2264_v9  ;;  %v2147_v42 = vld [vmem:[#allocation2 + $0xb0] sm:$0xff] }
 0x1f1   : > { %v2185_v19 = vld [vmem:[#allocation2 + $0x99] sm:$0xff]  ;;  %v2382_v32 = vmax.f32 %v2302_v22, %v2342_v2  ;;  %v2383_v40 = vmax.f32 %v2303_v35, %v2343_v7  ;;  %v2186_v23 = vld [vmem:[#allocation2 + $0xa9] sm:$0xff]  ;;  %v2187_v16 = vld [vmem:[#allocation2 + $0xb1] sm:$0xff] }
 0x1f2   : > { %v2225_v58 = vmax.f32 %v2145_v62, %v2185_v19  ;;  %v2265_v34 = vld [vmem:[#allocation2 + $0x9a] sm:$0xff]  ;;  %v2226_v33 = vmax.f32 %v2146_v5, %v2186_v23  ;;  %v2266_v29 = vld [vmem:[#allocation2 + $0xaa] sm:$0xff]  ;;  %v2227_v54 = vmax.f32 %v2147_v42, %v2187_v16  ;;  %v2384_v0 = vmax.f32 %v2304_v57, %v2344_v26  ;;  %v2267_v27 = vld [vmem:[#allocation2 + $0xb2] sm:$0xff] }
 0x1f3   : > { %v2345_v47 = vld [vmem:[#allocation2 + $0x9b] sm:$0xff]  ;;  %v6145_v18 = vmax.f32 %v2382_v32, %v2422_v3  ;;  %v6147_v46 = vmax.f32 %v2383_v40, %v2423_v50  ;;  %v2346_v36 = vld [vmem:[#allocation2 + $0xab] sm:$0xff]  ;;  %v2347_v38 = vld [vmem:[#allocation2 + $0xb3] sm:$0xff] }
 0x1f4   : > { %v2305_v20 = vmax.f32 %v2225_v58, %v2265_v34  ;;  %v2424_v45 = vld [vmem:[#allocation2 + $0x94] sm:$0xff]  ;;  %v2425_v52 = vld [vmem:[#allocation2 + $0x9c] sm:$0xff]  ;;  %v2306_v2 = vmax.f32 %v2226_v33, %v2266_v29  ;;  %v2307_v3 = vmax.f32 %v2227_v54, %v2267_v27  ;;  %v2149_v14 = vld [vmem:[#allocation2 + $0xc8] sm:$0xff] }
 0x1f5   : > { %v2624_v55 = vmax.f32 %v6137_v63, %v6145_v18  ;;  %v2702_v53 = vmax.f32 %v2622_v15, %v6145_v18  ;;  %v2625_v25 = vmax.f32 %v6139_v61, %v6147_v46  ;;  %v2703_v41 = vmax.f32 %v2623_v43, %v6147_v46  ;;  %v2148_v39 = vld [vmem:[#allocation2 + $0xc0] sm:$0xff]  ;;  %v2426_v62 = vld [vmem:[#allocation2 + $0xac] sm:$0xff]  ;;  %v2427_v35 = vld [vmem:[#allocation2 + $0xb4] sm:$0xff] }
 0x1f6   : > { %v2385_v21 = vmax.f32 %v2305_v20, %v2345_v47  ;;  %v2188_v22 = vld [vmem:[#allocation2 + $0xc1] sm:$0xff]  ;;  %v6155_v7 = vmax.f32 %v2384_v0, %v2424_v45  ;;  %v2189_v28 = vld [vmem:[#allocation2 + $0xc9] sm:$0xff]  ;;  %v2386_v9 = vmax.f32 %v2306_v2, %v2346_v36  ;;  %v2387_v32 = vmax.f32 %v2307_v3, %v2347_v38  ;;  %v2150_v47 = vld [vmem:[#allocation2 + $0xd8] sm:$0xff] }
 0x1f7   : > { %v2228_v19 = vmax.f32 %v2148_v39, %v2188_v22  ;;  %v2268_v50 = vld [vmem:[#allocation2 + $0xc2] sm:$0xff]  ;;  %v2229_v60 = vmax.f32 %v2149_v14, %v2189_v28  ;;  %v2269_v58 = vld [vmem:[#allocation2 + $0xca] sm:$0xff]  ;;  %v2190_v45 = vld [vmem:[#allocation2 + $0xd9] sm:$0xff] }
 0x1f8   : > { %v6157_v49 = vmax.f32 %v2385_v21, %v2425_v52  ;;  %v2626_v34 = vmax.f32 %v6145_v18, %v6155_v7  ;;  %v2704_v15 = vmax.f32 %v2624_v55, %v6155_v7  ;;  %v2782_v43 = vmax.f32 %v2702_v53, %v6155_v7  ;;  %v2348_v26 = vld [vmem:[#allocation2 + $0xc3] sm:$0xff]  ;;  %v2349_v16 = vld [vmem:[#allocation2 + $0xcb] sm:$0xff]  ;;  %v2270_v0 = vld [vmem:[#allocation2 + $0xda] sm:$0xff] }
 0x1f9   : > { %v2151_v5 = vld [vmem:[#allocation2 + $0xe0] sm:$0xff]  ;;  %v6169_v42 = vmax.f32 %v2386_v9, %v2426_v62  ;;  %v6171_v23 = vmax.f32 %v2387_v32, %v2427_v35  ;;  %v2308_v33 = vmax.f32 %v2228_v19, %v2268_v50  ;;  %v2309_v54 = vmax.f32 %v2229_v60, %v2269_v58  ;;  %v2429_v55 = vld [vmem:[#allocation2 + $0xcc] sm:$0xff]  ;;  %v2153_v62 = vld [vmem:[#allocation2 + $0xf8] sm:$0xff] }
 0x1fa   : > { %v2627_v40 = vmax.f32 %v6147_v46, %v6157_v49  ;;  %v6166_v57 = vmax.f32 %v2625_v25, %v6157_v49  ;;  %v2783_v20 = vmax.f32 %v2703_v41, %v6157_v49  ;;  %v2191_v52 = vld [vmem:[#allocation2 + $0xe1] sm:$0xff]  ;;  %v2230_v53 = vmax.f32 %v2150_v47, %v2190_v45  ;;  %v2152_v2 = vld [vmem:[#allocation2 + $0xf0] sm:$0xff]  ;;  %v2193_v28 = vld [vmem:[#allocation2 + $0xf9] sm:$0xff] }
 0x1fb   : > { %v2428_v29 = vld [vmem:[#allocation2 + $0xc4] sm:$0xff]  ;;  %v2231_v21 = vmax.f32 %v2151_v5, %v2191_v52  ;;  %v2628_v27 = vmax.f32 %v6155_v7, %v6169_v42  ;;  %v2862_v38 = vmax.f32 %v2782_v43, %v6169_v42  ;;  %v2350_v25 = vld [vmem:[#allocation2 + $0xdb] sm:$0xff]  ;;  %v6177_v3 = vmax.f32 %v2626_v34, %v6169_v42  ;;  %v2192_v35 = vld [vmem:[#allocation2 + $0xf1] sm:$0xff] }
 0x1fc   : > { %v2271_v36 = vld [vmem:[#allocation2 + $0xe2] sm:$0xff]  ;;  %v2784_v39 = vmax.f32 %v2704_v15, %v6169_v42  ;;  %v2629_v14 = vmax.f32 %v6157_v49, %v6171_v23  ;;  %v2863_v22 = vmax.f32 %v2783_v20, %v6171_v23  ;;  %v2388_v19 = vmax.f32 %v2308_v33, %v2348_v26  ;;  %v2272_v60 = vld [vmem:[#allocation2 + $0xf2] sm:$0xff]  ;;  %v2273_v47 = vld [vmem:[#allocation2 + $0xfa] sm:$0xff] }
 0x1fd   : > { %v2351_v41 = vld [vmem:[#allocation2 + $0xe3] sm:$0xff]  ;;  %2902 = vst [vmem:[#allocation2 + $0x7a] sm:$0xff] %v2862_v38  ;;  %v2389_v9 = vmax.f32 %v2309_v54, %v2349_v16  ;;  %v2310_v32 = vmax.f32 %v2230_v53, %v2270_v0  ;;  %v2311_v50 = vmax.f32 %v2231_v21, %v2271_v36  ;;  %v2707_v58 = vmax.f32 %v2627_v40, %v6171_v23  ;;  %v2352_v0 = vld [vmem:[#allocation2 + $0xf3] sm:$0xff]  ;;  %v2353_v21 = vld [vmem:[#allocation2 + $0xfb] sm:$0xff] }
 0x1fe   : > { %v2785_v34 = vmax.f32 %v6166_v57, %v6171_v23  ;;  %2903 = vst [vmem:[#allocation2 + $0x82] sm:$0xff] %v2863_v22  ;;  %v2232_v15 = vmax.f32 %v2152_v2, %v2192_v35  ;;  %v2233_v43 = vmax.f32 %v2153_v62, %v2193_v28  ;;  %v6186_v5 = vmax.f32 %v2388_v19, %v2428_v29  ;;  %v2430_v52 = vld [vmem:[#allocation2 + $0xdc] sm:$0xff]  ;;  %v2154_v16 = vld [vmem:[#allocation2 + $0x108] sm:$0xff] }
 0x1ff   : > { %v6188_v20 = vmax.f32 %v2389_v9, %v2429_v55  ;;  %v2390_v45 = vmax.f32 %v2310_v32, %v2350_v25  ;;  %v2391_v26 = vmax.f32 %v2311_v50, %v2351_v41  ;;  %v2194_v33 = vld [vmem:[#allocation2 + $0x109] sm:$0xff]  ;;  %v2195_v41 = vld [vmem:[#allocation2 + $0x111] sm:$0xff]  ;;  %v2196_v50 = vld [vmem:[#allocation2 + $0x121] sm:$0xff] }
 0x200   : > { %v2431_v54 = vld [vmem:[#allocation2 + $0xe4] sm:$0xff]  ;;  %v2312_v53 = vmax.f32 %v2232_v15, %v2272_v60  ;;  %v2313_v40 = vmax.f32 %v2233_v43, %v2273_v47  ;;  %v2234_v36 = vmax.f32 %v2154_v16, %v2194_v33  ;;  %v2630_v57 = vmax.f32 %v6169_v42, %v6186_v5  ;;  %v2155_v25 = vld [vmem:[#allocation2 + $0x110] sm:$0xff]  ;;  %v2281_v56 = vld [vmem:[#allocation2 + $0x15a] sm:$0xff] }
 0x201   : > { %v2708_v38 = vmax.f32 %v2628_v27, %v6186_v5  ;;  %v2786_v29 = vmax.f32 %v6177_v3, %v6186_v5  ;;  %v2864_v55 = vmax.f32 %v2784_v39, %v6186_v5  ;;  %v2274_v2 = vld [vmem:[#allocation2 + $0x10a] sm:$0xff]  ;;  %v2631_v22 = vmax.f32 %v6171_v23, %v6188_v20  ;;  %v2156_v42 = vld [vmem:[#allocation2 + $0x120] sm:$0xff]  ;;  %v2432_v9 = vld [vmem:[#allocation2 + $0xf4] sm:$0xff] }
 0x202   : > { %v2709_v62 = vmax.f32 %v2629_v14, %v6188_v20  ;;  %v2787_v35 = vmax.f32 %v2707_v58, %v6188_v20  ;;  %v2865_v28 = vmax.f32 %v2785_v34, %v6188_v20  ;;  %v2157_v19 = vld [vmem:[#allocation2 + $0x128] sm:$0xff]  ;;  %v6201_v27 = vmax.f32 %v2390_v45, %v2430_v52  ;;  %v2433_v23 = vld [vmem:[#allocation2 + $0xfc] sm:$0xff]  ;;  %v2275_v58 = vld [vmem:[#allocation2 + $0x112] sm:$0xff] }
 0x203   : > { %2904 = vst [vmem:[#allocation2 + $0x92] sm:$0xff] %v2864_v55  ;;  %v6203_v3 = vmax.f32 %v2391_v26, %v2431_v54  ;;  %v2392_v39 = vmax.f32 %v2312_v53, %v2352_v0  ;;  %v2393_v32 = vmax.f32 %v2313_v40, %v2353_v21  ;;  %v2197_v60 = vld [vmem:[#allocation2 + $0x129] sm:$0xff]  ;;  %v2314_v15 = vmax.f32 %v2234_v36, %v2274_v2  ;;  %v2158_v53 = vld [vmem:[#allocation2 + $0x138] sm:$0xff]  ;;  %v2159_v36 = vld [vmem:[#allocation2 + $0x140] sm:$0xff] }
 0x204   : > { %2905 = vst [vmem:[#allocation2 + $0x9a] sm:$0xff] %v2865_v28  ;;  %v2354_v14 = vld [vmem:[#allocation2 + $0x10b] sm:$0xff]  ;;  %v2235_v43 = vmax.f32 %v2155_v25, %v2195_v41  ;;  %v2236_v47 = vmax.f32 %v2156_v42, %v2196_v50  ;;  %v2237_v34 = vmax.f32 %v2157_v19, %v2197_v60  ;;  %v2632_v16 = vmax.f32 %v6186_v5, %v6201_v27  ;;  %v2276_v33 = vld [vmem:[#allocation2 + $0x122] sm:$0xff]  ;;  %v2355_v28 = vld [vmem:[#allocation2 + $0x113] sm:$0xff] }
 0x205   : > { %v6208_v45 = vmax.f32 %v2630_v57, %v6201_v27  ;;  %v2788_v52 = vmax.f32 %v2708_v38, %v6201_v27  ;;  %v2866_v26 = vmax.f32 %v2786_v29, %v6201_v27  ;;  %v2277_v54 = vld [vmem:[#allocation2 + $0x12a] sm:$0xff]  ;;  %v2633_v0 = vmax.f32 %v6188_v20, %v6203_v3  ;;  %v2198_v57 = vld [vmem:[#allocation2 + $0x139] sm:$0xff]  ;;  %v2199_v55 = vld [vmem:[#allocation2 + $0x141] sm:$0xff] }
 0x206   : > { %v6215_v40 = vmax.f32 %v2631_v22, %v6203_v3  ;;  %v2789_v21 = vmax.f32 %v2709_v62, %v6203_v3  ;;  %v2867_v5 = vmax.f32 %v2787_v35, %v6203_v3  ;;  %v6219_v38 = vmax.f32 %v2392_v39, %v2432_v9  ;;  %v2434_v41 = vld [vmem:[#allocation2 + $0x10c] sm:$0xff]  ;;  %v2356_v20 = vld [vmem:[#allocation2 + $0x123] sm:$0xff]  ;;  %v2278_v50 = vld [vmem:[#allocation2 + $0x13a] sm:$0xff] }
 0x207   : > { %2906 = vst [vmem:[#allocation2 + $0xaa] sm:$0xff] %v2866_v26  ;;  %v6221_v29 = vmax.f32 %v2393_v32, %v2433_v23  ;;  %v2394_v25 = vmax.f32 %v2314_v15, %v2354_v14  ;;  %v2315_v2 = vmax.f32 %v2235_v43, %v2275_v58  ;;  %v2316_v22 = vmax.f32 %v2236_v47, %v2276_v33  ;;  %v2357_v19 = vld [vmem:[#allocation2 + $0x12b] sm:$0xff]  ;;  %v2279_v60 = vld [vmem:[#allocation2 + $0x142] sm:$0xff]  ;;  %v2161_v15 = vld [vmem:[#allocation2 + $0x158] sm:$0xff] }
 0x208   : > { %2907 = vst [vmem:[#allocation2 + $0xb2] sm:$0xff] %v2867_v5  ;;  %v2317_v42 = vmax.f32 %v2237_v34, %v2277_v54  ;;  %v2238_v62 = vmax.f32 %v2158_v53, %v2198_v57  ;;  %v2239_v35 = vmax.f32 %v2159_v36, %v2199_v55  ;;  %v2634_v26 = vmax.f32 %v6201_v27, %v6219_v38  ;;  %v2160_v23 = vld [vmem:[#allocation2 + $0x150] sm:$0xff]  ;;  %v2359_v36 = vld [vmem:[#allocation2 + $0x143] sm:$0xff] }
 0x209   : > { %v2712_v39 = vmax.f32 %v2632_v16, %v6219_v38  ;;  %v2790_v9 = vmax.f32 %v6208_v45, %v6219_v38  ;;  %v6229_v32 = vmax.f32 %v2788_v52, %v6219_v38  ;;  %v2200_v14 = vld [vmem:[#allocation2 + $0x151] sm:$0xff]  ;;  %v2635_v43 = vmax.f32 %v6203_v3, %v6221_v29  ;;  %v2436_v16 = vld [vmem:[#allocation2 + $0x124] sm:$0xff]  ;;  %v2201_v45 = vld [vmem:[#allocation2 + $0x159] sm:$0xff] }
 0x20a   : > { %v2713_v58 = vmax.f32 %v2633_v0, %v6221_v29  ;;  %v2791_v47 = vmax.f32 %v6215_v40, %v6221_v29  ;;  %v6237_v27 = vmax.f32 %v2789_v21, %v6221_v29  ;;  %v2435_v34 = vld [vmem:[#allocation2 + $0x114] sm:$0xff]  ;;  %v6240_v52 = vmax.f32 %v2394_v25, %v2434_v41  ;;  %v2437_v5 = vld [vmem:[#allocation2 + $0x12c] sm:$0xff] }
 0x20b   : > { %7143 = vst [vmem:[#allocation26_spill] sm:$0xff] %v6229_v32  ;;  %2908 = vst [vmem:[#allocation2 + $0xc2] sm:$0xff] %v6229_v32  ;;  %v2395_v33 = vmax.f32 %v2315_v2, %v2355_v28  ;;  %v2396_v54 = vmax.f32 %v2316_v22, %v2356_v20  ;;  %v2397_v53 = vmax.f32 %v2317_v42, %v2357_v19  ;;  %v2358_v3 = vld [vmem:[#allocation2 + $0x13b] sm:$0xff]  ;;  %v2280_v21 = vld [vmem:[#allocation2 + $0x152] sm:$0xff] }
 0x20c   : > { %7144 = vst [vmem:[#allocation27_spill] sm:$0xff] %v6237_v27  ;;  %2909 = vst [vmem:[#allocation2 + $0xca] sm:$0xff] %v6237_v27  ;;  %v2318_v0 = vmax.f32 %v2238_v62, %v2278_v50  ;;  %v2319_v40 = vmax.f32 %v2239_v35, %v2279_v60  ;;  %v2240_v57 = vmax.f32 %v2160_v23, %v2200_v14  ;;  %v2162_v12 = vld [vmem:[#allocation2 + $0x168] sm:$0xff]  ;;  %v2438_v62 = vld [vmem:[#allocation2 + $0x13c] sm:$0xff] }
 0x20d   : > { %v2241_v55 = vmax.f32 %v2161_v15, %v2201_v45  ;;  %v2636_v32 = vmax.f32 %v6219_v38, %v6240_v52  ;;  %v2714_v25 = vmax.f32 %v2634_v26, %v6240_v52  ;;  %v2792_v41 = vmax.f32 %v2712_v39, %v6240_v52  ;;  %v2202_v28 = vld [vmem:[#allocation2 + $0x169] sm:$0xff]  ;;  %v2360_v60 = vld [vmem:[#allocation2 + $0x153] sm:$0xff]  ;;  %v2361_v23 = vld [vmem:[#allocation2 + $0x15b] sm:$0xff] }
 0x20e   : > { %v6248_v2 = vmax.f32 %v2790_v9, %v6240_v52  ;;  %v2475_v20 = vmax.f32 %v2395_v33, %v2435_v34  ;;  %v6250_v22 = vmax.f32 %v2396_v54, %v2436_v16  ;;  %v6252_v42 = vmax.f32 %v2397_v53, %v2437_v5  ;;  %v2439_v50 = vld [vmem:[#allocation2 + $0x144] sm:$0xff]  ;;  %v2163_v39 = vld [vmem:[#allocation2 + $0x170] sm:$0xff] }
 0x20f   : > { %v2398_v19 = vmax.f32 %v2318_v0, %v2358_v3  ;;  %v2399_v35 = vmax.f32 %v2319_v40, %v2359_v36  ;;  %v2320_v38 = vmax.f32 %v2240_v57, %v2280_v21  ;;  %v2321_v26 = vmax.f32 %v2241_v55, %v2281_v56  ;;  %v2203_v45 = vld [vmem:[#allocation2 + $0x171] sm:$0xff]  ;;  %v2164_v54 = vld [vmem:[#allocation2 + $0x180] sm:$0xff]  ;;  %v2170_v27 = vld [vmem:[#allocation2 + $0x1c8] sm:$0xff] }
 0x210   : > { %7145 = vst [vmem:[#allocation28_spill] sm:$0xff] %v6248_v2  ;;  %2910 = vst [vmem:[#allocation2 + $0xda] sm:$0xff] %v6248_v2  ;;  %v2242_v15 = vmax.f32 %v2162_v12, %v2202_v28  ;;  %v2637_v9 = vmax.f32 %v6221_v29, %v2475_v20  ;;  %v2715_v14 = vmax.f32 %v2635_v43, %v2475_v20  ;;  %v2282_v33 = vld [vmem:[#allocation2 + $0x16a] sm:$0xff]  ;;  %v2204_v36 = vld [vmem:[#allocation2 + $0x181] sm:$0xff] }
 0x211   : > { %v2793_v34 = vmax.f32 %v2713_v58, %v2475_v20  ;;  %v6256_v16 = vmax.f32 %v2791_v47, %v2475_v20  ;;  %v2638_v53 = vmax.f32 %v6240_v52, %v6250_v22  ;;  %v2716_v5 = vmax.f32 %v2636_v32, %v6250_v22  ;;  %v2165_v12 = vld [vmem:[#allocation2 + $0x188] sm:$0xff]  ;;  %v2440_v32 = vld [vmem:[#allocation2 + $0x154] sm:$0xff]  ;;  %v2441_v55 = vld [vmem:[#allocation2 + $0x15c] sm:$0xff] }
 0x212   : > { %v2794_v3 = vmax.f32 %v2714_v25, %v6250_v22  ;;  %v6263_v56 = vmax.f32 %v2792_v41, %v6250_v22  ;;  %v2205_v29 = vld [vmem:[#allocation2 + $0x189] sm:$0xff]  ;;  %v2639_v43 = vmax.f32 %v2475_v20, %v6252_v42  ;;  %v2717_v58 = vmax.f32 %v2637_v9, %v6252_v42  ;;  %v2283_v41 = vld [vmem:[#allocation2 + $0x172] sm:$0xff] }
 0x213   : > { %7146 = vst [vmem:[#allocation29_spill] sm:$0xff] %v6256_v16  ;;  %2911 = vst [vmem:[#allocation2 + $0xe2] sm:$0xff] %v6256_v16  ;;  %v2795_v47 = vmax.f32 %v2715_v14, %v6252_v42  ;;  %v6270_v52 = vmax.f32 %v2793_v34, %v6252_v42  ;;  %v6273_v0 = vmax.f32 %v2398_v19, %v2438_v62  ;;  %v2362_v25 = vld [vmem:[#allocation2 + $0x16b] sm:$0xff]  ;;  %v2284_v14 = vld [vmem:[#allocation2 + $0x182] sm:$0xff] }
 0x214   : > { %7147 = vst [vmem:[#allocation30_spill] sm:$0xff] %v6263_v56  ;;  %2912 = vst [vmem:[#allocation2 + $0xf2] sm:$0xff] %v6263_v56  ;;  %v6275_v40 = vmax.f32 %v2399_v35, %v2439_v50  ;;  %v2400_v57 = vmax.f32 %v2320_v38, %v2360_v60  ;;  %v2401_v21 = vmax.f32 %v2321_v26, %v2361_v23  ;;  %v2285_v16 = vld [vmem:[#allocation2 + $0x18a] sm:$0xff]  ;;  %v2166_v2 = vld [vmem:[#allocation2 + $0x198] sm:$0xff] }
 0x215   : > { %7148 = vst [vmem:[#allocation31_spill] sm:$0xff] %v6270_v52  ;;  %2913 = vst [vmem:[#allocation2 + $0xfa] sm:$0xff] %v6270_v52  ;;  %v2322_v28 = vmax.f32 %v2242_v15, %v2282_v33  ;;  %v2243_v20 = vmax.f32 %v2163_v39, %v2203_v45  ;;  %v2244_v9 = vmax.f32 %v2164_v54, %v2204_v36  ;;  %v2167_v38 = vld [vmem:[#allocation2 + $0x1a0] sm:$0xff]  ;;  %v2442_v45 = vld [vmem:[#allocation2 + $0x16c] sm:$0xff] }
 0x216   : > { %v2245_v34 = vmax.f32 %v2165_v12, %v2205_v29  ;;  %v2640_v19 = vmax.f32 %v6250_v22, %v6273_v0  ;;  %v2718_v62 = vmax.f32 %v2638_v53, %v6273_v0  ;;  %v2796_v50 = vmax.f32 %v2716_v5, %v6273_v0  ;;  %v2206_v60 = vld [vmem:[#allocation2 + $0x199] sm:$0xff]  ;;  %v2207_v26 = vld [vmem:[#allocation2 + $0x1a1] sm:$0xff]  ;;  %v2168_v56 = vld [vmem:[#allocation2 + $0x1b0] sm:$0xff] }
 0x217   : > { %v6283_v35 = vmax.f32 %v2794_v3, %v6273_v0  ;;  %v2641_v23 = vmax.f32 %v6252_v42, %v6275_v40  ;;  %v6288_v39 = vmax.f32 %v2639_v43, %v6275_v40  ;;  %v2797_v15 = vmax.f32 %v2717_v58, %v6275_v40  ;;  %v2363_v3 = vld [vmem:[#allocation2 + $0x173] sm:$0xff]  ;;  %v2364_v12 = vld [vmem:[#allocation2 + $0x183] sm:$0xff]  ;;  %v2365_v42 = vld [vmem:[#allocation2 + $0x18b] sm:$0xff] }
 0x218   : > { %v6292_v22 = vmax.f32 %v2795_v47, %v6275_v40  ;;  %v6295_v33 = vmax.f32 %v2400_v57, %v2440_v32  ;;  %v6297_v54 = vmax.f32 %v2401_v21, %v2441_v55  ;;  %v2402_v53 = vmax.f32 %v2322_v28, %v2362_v25  ;;  %v2286_v58 = vld [vmem:[#allocation2 + $0x19a] sm:$0xff]  ;;  %v2287_v52 = vld [vmem:[#allocation2 + $0x1a2] sm:$0xff] }
 0x219   : > { %7149 = vst [vmem:[#allocation32_spill] sm:$0xff] %v6283_v35  ;;  %2914 = vst [vmem:[#allocation2 + $0x10a] sm:$0xff] %v6283_v35  ;;  %v2323_v5 = vmax.f32 %v2243_v20, %v2283_v41  ;;  %v2324_v36 = vmax.f32 %v2244_v9, %v2284_v14  ;;  %v2325_v29 = vmax.f32 %v2245_v34, %v2285_v16  ;;  %v2169_v25 = vld [vmem:[#allocation2 + $0x1b8] sm:$0xff]  ;;  %v2444_v14 = vld [vmem:[#allocation2 + $0x184] sm:$0xff] }
 0x21a   : > { %7150 = vst [vmem:[#allocation33_spill] sm:$0xff] %v6292_v22  ;;  %2915 = vst [vmem:[#allocation2 + $0x112] sm:$0xff] %v6292_v22  ;;  %v2246_v43 = vmax.f32 %v2166_v2, %v2206_v60  ;;  %v2247_v47 = vmax.f32 %v2167_v38, %v2207_v26  ;;  %v2642_v32 = vmax.f32 %v6273_v0, %v6295_v33  ;;  %v2208_v41 = vld [vmem:[#allocation2 + $0x1b1] sm:$0xff]  ;;  %v2209_v28 = vld [vmem:[#allocation2 + $0x1b9] sm:$0xff] }
 0x21b   : > { %v2720_v57 = vmax.f32 %v2640_v19, %v6295_v33  ;;  %v2798_v21 = vmax.f32 %v2718_v62, %v6295_v33  ;;  %v6305_v55 = vmax.f32 %v2796_v50, %v6295_v33  ;;  %v2643_v2 = vmax.f32 %v6275_v40, %v6297_v54  ;;  %v2443_v9 = vld [vmem:[#allocation2 + $0x174] sm:$0xff]  ;;  %v2445_v34 = vld [vmem:[#allocation2 + $0x18c] sm:$0xff]  ;;  %v2367_v40 = vld [vmem:[#allocation2 + $0x1a3] sm:$0xff] }
 0x21c   : > { %v2721_v16 = vmax.f32 %v2641_v23, %v6297_v54  ;;  %v2799_v20 = vmax.f32 %v6288_v39, %v6297_v54  ;;  %v6313_v0 = vmax.f32 %v2797_v15, %v6297_v54  ;;  %v6316_v19 = vmax.f32 %v2402_v53, %v2442_v45  ;;  %v2366_v60 = vld [vmem:[#allocation2 + $0x19b] sm:$0xff]  ;;  %v2288_v26 = vld [vmem:[#allocation2 + $0x1b2] sm:$0xff]  ;;  %v2210_v48 = vld [vmem:[#allocation2 + $0x1c9] sm:$0xff] }
 0x21d   : > { %7151 = vst [vmem:[#allocation34_spill] sm:$0xff] %v6305_v55  ;;  %2916 = vst [vmem:[#allocation2 + $0x122] sm:$0xff] %v6305_v55  ;;  %v2403_v62 = vmax.f32 %v2323_v5, %v2363_v3  ;;  %v2404_v50 = vmax.f32 %v2324_v36, %v2364_v12  ;;  %v2405_v38 = vmax.f32 %v2325_v29, %v2365_v42  ;;  %v2289_v35 = vld [vmem:[#allocation2 + $0x1ba] sm:$0xff]  ;;  %v2447_v36 = vld [vmem:[#allocation2 + $0x1a4] sm:$0xff] }
 0x21e   : > { %2917 = vst [vmem:[#allocation2 + $0x12a] sm:$0xff] %v6313_v0  ;;  %v2326_v23 = vmax.f32 %v2246_v43, %v2286_v58  ;;  %v2327_v39 = vmax.f32 %v2247_v47, %v2287_v52  ;;  %v2248_v22 = vmax.f32 %v2168_v56, %v2208_v41  ;;  %v2249_v15 = vmax.f32 %v2169_v25, %v2209_v28  ;;  %v2446_v52 = vld [vmem:[#allocation2 + $0x19c] sm:$0xff] }
 0x21f   : > { %v2644_v55 = vmax.f32 %v6295_v33, %v6316_v19  ;;  %v2722_v45 = vmax.f32 %v2642_v32, %v6316_v19  ;;  %v2800_v53 = vmax.f32 %v2720_v57, %v6316_v19  ;;  %v6324_v5 = vmax.f32 %v2798_v21, %v6316_v19  ;;  %v2368_v33 = vld [vmem:[#allocation2 + $0x1b3] sm:$0xff]  ;;  %v2369_v47 = vld [vmem:[#allocation2 + $0x1bb] sm:$0xff] }
 0x220   : > { %v2483_v3 = vmax.f32 %v2403_v62, %v2443_v9  ;;  %v6326_v12 = vmax.f32 %v2404_v50, %v2444_v14  ;;  %v6328_v42 = vmax.f32 %v2405_v38, %v2445_v34  ;;  %v2406_v56 = vmax.f32 %v2326_v23, %v2366_v60  ;;  %v2171_v32 = vld [vmem:[#allocation2 + $0x1d0] sm:$0xff]  ;;  %v2172_v34 = vld [vmem:[#allocation2 + $0x1e0] sm:$0xff] }
 0x221   : > { %2918 = vst [vmem:[#allocation2 + $0x13a] sm:$0xff] %v6324_v5  ;;  %v2407_v29 = vmax.f32 %v2327_v39, %v2367_v40  ;;  %v2328_v43 = vmax.f32 %v2248_v22, %v2288_v26  ;;  %v2329_v58 = vmax.f32 %v2249_v15, %v2289_v35  ;;  %v2250_v57 = vmax.f32 %v2170_v27, %v2210_v48  ;;  %v2211_v9 = vld [vmem:[#allocation2 + $0x1d1] sm:$0xff]  ;;  %v2173_v48 = vld [vmem:[#allocation2 + $0x1e8] sm:$0xff]  ;;  %v2449_v23 = vld [vmem:[#allocation2 + $0x1bc] sm:$0xff] }
 0x222   : > { %v2645_v21 = vmax.f32 %v6297_v54, %v2483_v3  ;;  %v2723_v25 = vmax.f32 %v2643_v2, %v2483_v3  ;;  %v2801_v41 = vmax.f32 %v2721_v16, %v2483_v3  ;;  %v6332_v28 = vmax.f32 %v2799_v20, %v2483_v3  ;;  %v2290_v14 = vld [vmem:[#allocation2 + $0x1ca] sm:$0xff]  ;;  %v2212_v27 = vld [vmem:[#allocation2 + $0x1e1] sm:$0xff]  ;;  %v2291_v15 = vld [vmem:[#allocation2 + $0x1d2] sm:$0xff] }
 0x223   : > { %v2646_v62 = vmax.f32 %v6316_v19, %v6326_v12  ;;  %v2724_v50 = vmax.f32 %v2644_v55, %v6326_v12  ;;  %v2802_v22 = vmax.f32 %v2722_v45, %v6326_v12  ;;  %v6339_v35 = vmax.f32 %v2800_v53, %v6326_v12  ;;  %v2213_v54 = vld [vmem:[#allocation2 + $0x1e9] sm:$0xff]  ;;  %v2448_v55 = vld [vmem:[#allocation2 + $0x1b4] sm:$0xff] }
 0x224   : > { %7152 = vst [vmem:[#allocation35_spill] sm:$0xff] %v6332_v28  ;;  %2919 = vst [vmem:[#allocation2 + $0x142] sm:$0xff] %v6332_v28  ;;  %v2647_v2 = vmax.f32 %v2483_v3, %v6328_v42  ;;  %v2725_v16 = vmax.f32 %v2645_v21, %v6328_v42  ;;  %v2803_v20 = vmax.f32 %v2723_v25, %v6328_v42  ;;  %v2370_v39 = vld [vmem:[#allocation2 + $0x1cb] sm:$0xff]  ;;  %v2292_v21 = vld [vmem:[#allocation2 + $0x1e2] sm:$0xff] }
 0x225   : > { %7153 = vst [vmem:[#allocation36_spill] sm:$0xff] %v6339_v35  ;;  %v6346_v19 = vmax.f32 %v2801_v41, %v6328_v42  ;;  %2920 = vst [vmem:[#allocation2 + $0x152] sm:$0xff] %v6339_v35  ;;  %v6349_v38 = vmax.f32 %v2406_v56, %v2446_v52  ;;  %v6351_v60 = vmax.f32 %v2407_v29, %v2447_v36  ;;  %v2293_v41 = vld [vmem:[#allocation2 + $0x1ea] sm:$0xff]  ;;  %v2174_v28 = vld [vmem:[#allocation2 + $0x1f8] sm:$0xff] }
 0x226   : > { %v2408_v40 = vmax.f32 %v2328_v43, %v2368_v33  ;;  %v2409_v26 = vmax.f32 %v2329_v58, %v2369_v47  ;;  %v2330_v45 = vmax.f32 %v2250_v57, %v2290_v14  ;;  %v2251_v53 = vmax.f32 %v2171_v32, %v2211_v9  ;;  %v2175_v43 = vld [vmem:[#allocation2 + $0x200] sm:$0xff] }
 0x227   : > { %7154 = vst [vmem:[#allocation37_spill] sm:$0xff] %v6346_v19  ;;  %2921 = vst [vmem:[#allocation2 + $0x15a] sm:$0xff] %v6346_v19  ;;  %v2252_v3 = vmax.f32 %v2172_v34, %v2212_v27  ;;  %v2253_v25 = vmax.f32 %v2173_v48, %v2213_v54  ;;  %v2648_v56 = vmax.f32 %v6326_v12, %v6349_v38  ;;  %v2214_v33 = vld [vmem:[#allocation2 + $0x1f9] sm:$0xff]  ;;  %v2215_v58 = vld [vmem:[#allocation2 + $0x201] sm:$0xff] }
 0x228   : > { %v2726_v52 = vmax.f32 %v2646_v62, %v6349_v38  ;;  %v2804_v36 = vmax.f32 %v2724_v50, %v6349_v38  ;;  %v6359_v29 = vmax.f32 %v2802_v22, %v6349_v38  ;;  %v2649_v47 = vmax.f32 %v6328_v42, %v6351_v60  ;;  %v2450_v62 = vld [vmem:[#allocation2 + $0x1cc] sm:$0xff]  ;;  %v2372_v48 = vld [vmem:[#allocation2 + $0x1e3] sm:$0xff] }
 0x229   : > { %v2727_v32 = vmax.f32 %v2647_v2, %v6351_v60  ;;  %v2805_v57 = vmax.f32 %v2725_v16, %v6351_v60  ;;  %v6366_v9 = vmax.f32 %v2803_v20, %v6351_v60  ;;  %v2488_v12 = vmax.f32 %v2408_v40, %v2448_v55  ;;  %v2371_v22 = vld [vmem:[#allocation2 + $0x1d3] sm:$0xff]  ;;  %v2373_v54 = vld [vmem:[#allocation2 + $0x1eb] sm:$0xff]  ;;  %v2295_v20 = vld [vmem:[#allocation2 + $0x202] sm:$0xff] }
 0x22a   : > { %7155 = vst [vmem:[#allocation38_spill] sm:$0xff] %v6359_v29  ;;  %2922 = vst [vmem:[#allocation2 + $0x16a] sm:$0xff] %v6359_v29  ;;  %v6369_v14 = vmax.f32 %v2409_v26, %v2449_v23  ;;  %v2410_v34 = vmax.f32 %v2330_v45, %v2370_v39  ;;  %v2331_v50 = vmax.f32 %v2251_v53, %v2291_v15  ;;  %v2294_v16 = vld [vmem:[#allocation2 + $0x1fa] sm:$0xff]  ;;  %v2536_v26 = vld [vmem:[#allocation2 + $0x2] sm:$0xff] }
 0x22b   : > { %2923 = vst [vmem:[#allocation2 + $0x172] sm:$0xff] %v6366_v9  ;;  %v2332_v42 = vmax.f32 %v2252_v3, %v2292_v21  ;;  %v2333_v27 = vmax.f32 %v2253_v25, %v2293_v41  ;;  %v2254_v2 = vmax.f32 %v2174_v28, %v2214_v33  ;;  %v2255_v19 = vmax.f32 %v2175_v43, %v2215_v58  ;;  %v2538_v23 = vld [vmem:[#allocation2 + $0x1a] sm:$0xff]  ;;  %v2540_v39 = vld [vmem:[#allocation2 + $0x32] sm:$0xff]  ;;  %v2452_v41 = vld [vmem:[#allocation2 + $0x1e4] sm:$0xff] }
 0x22c   : > { %v2650_v35 = vmax.f32 %v6349_v38, %v2488_v12  ;;  %v2728_v29 = vmax.f32 %v2648_v56, %v2488_v12  ;;  %v2806_v55 = vmax.f32 %v2726_v52, %v2488_v12  ;;  %v2884_v40 = vmax.f32 %v2804_v36, %v2488_v12  ;;  %v2451_v3 = vld [vmem:[#allocation2 + $0x1d4] sm:$0xff]  ;;  %v2453_v52 = vld [vmem:[#allocation2 + $0x1ec] sm:$0xff] }
 0x22d   : > { %v2651_v15 = vmax.f32 %v6351_v60, %v6369_v14  ;;  %v2729_v45 = vmax.f32 %v2649_v47, %v6369_v14  ;;  %v2807_v53 = vmax.f32 %v2727_v32, %v6369_v14  ;;  %v2885_v28 = vmax.f32 %v2805_v57, %v6369_v14  ;;  %v2374_v36 = vld [vmem:[#allocation2 + $0x1fb] sm:$0xff]  ;;  %v2375_v60 = vld [vmem:[#allocation2 + $0x203] sm:$0xff] }
 0x22e   : > { %2924 = vst [vmem:[#allocation2 + $0x182] sm:$0xff] %v2884_v40  ;;  %v6378_v21 = vmax.f32 %v2410_v34, %v2450_v62  ;;  %v2411_v38 = vmax.f32 %v2331_v50, %v2371_v22  ;;  %v2412_v25 = vmax.f32 %v2332_v42, %v2372_v48  ;;  %v2413_v56 = vmax.f32 %v2333_v27, %v2373_v54 }
 0x22f   : > { %2925 = vst [vmem:[#allocation2 + $0x18a] sm:$0xff] %v2885_v28  ;;  %v2334_v43 = vmax.f32 %v2254_v2, %v2294_v16  ;;  %v2335_v33 = vmax.f32 %v2255_v19, %v2295_v20  ;;  %v2616_v58 = vmax.f32 %v2536_v26, %v2538_v23  ;;  %v2618_v47 = vmax.f32 %v2538_v23, %v2540_v39  ;;  %v2454_v20 = vld [vmem:[#allocation2 + $0x1fc] sm:$0xff] }
 0x230   : > { %v2652_v32 = vmax.f32 %v2488_v12, %v6378_v21  ;;  %v2730_v57 = vmax.f32 %v2650_v35, %v6378_v21  ;;  %v2808_v40 = vmax.f32 %v2728_v29, %v6378_v21  ;;  %v2886_v34 = vmax.f32 %v2806_v55, %v6378_v21  ;;  %v2455_v29 = vld [vmem:[#allocation2 + $0x204] sm:$0xff] }
 0x231   : > { %v2491_v62 = vmax.f32 %v2411_v38, %v2451_v3  ;;  %v2492_v50 = vmax.f32 %v2412_v25, %v2452_v41  ;;  %v2493_v22 = vmax.f32 %v2413_v56, %v2453_v52  ;;  %v2414_v48 = vmax.f32 %v2334_v43, %v2374_v36  ;;  %v2537_v3 = vld [vmem:[#allocation2 + $0xa] sm:$0xff]  ;;  %v2539_v38 = vld [vmem:[#allocation2 + $0x22] sm:$0xff]  ;;  %v2541_v25 = vld [vmem:[#allocation2 + $0x3a] sm:$0xff] }
 0x232   : > { %2926 = vst [vmem:[#allocation2 + $0x19a] sm:$0xff] %v2886_v34  ;;  %v2415_v42 = vmax.f32 %v2335_v33, %v2375_v60  ;;  %v2620_v27 = vmax.f32 %v2540_v39, %v6133_v11  ;;  %v2696_v19 = vmax.f32 %v2616_v58, %v2540_v39  ;;  %v2698_v54 = vmax.f32 %v2618_v47, %v6133_v11 }
 0x233   : > { %v2653_v2 = vmax.f32 %v6369_v14, %v2491_v62  ;;  %v2731_v12 = vmax.f32 %v2651_v15, %v2491_v62  ;;  %v2809_v16 = vmax.f32 %v2729_v45, %v2491_v62  ;;  %v2887_v35 = vmax.f32 %v2807_v53, %v2491_v62 }
 0x234   : > { %v2654_v55 = vmax.f32 %v6378_v21, %v2492_v50  ;;  %v2732_v26 = vmax.f32 %v2652_v32, %v2492_v50  ;;  %v2810_v23 = vmax.f32 %v2730_v57, %v2492_v50  ;;  %v2888_v28 = vmax.f32 %v2808_v40, %v2492_v50  ;;  %v2852_v57 = vld [vmem:[#allocation2 + $0x212] sm:$0xff]  ;;  %v2853_v40 = vld [vmem:[#allocation2 + $0x21a] sm:$0xff] }
 0x235   : > { %2927 = vst [vmem:[#allocation2 + $0x1a2] sm:$0xff] %v2887_v35  ;;  %v2655_v41 = vmax.f32 %v2491_v62, %v2493_v22  ;;  %v2733_v39 = vmax.f32 %v2653_v2, %v2493_v22  ;;  %v2811_v56 = vmax.f32 %v2731_v12, %v2493_v22  ;;  %v2889_v52 = vmax.f32 %v2809_v16, %v2493_v22  ;;  %v2854_v16 = vld [vmem:[#allocation2 + $0x22a] sm:$0xff]  ;;  %v2855_v35 = vld [vmem:[#allocation2 + $0x232] sm:$0xff] }
 0x236   : > { %2928 = vst [vmem:[#allocation2 + $0x1b2] sm:$0xff] %v2888_v28  ;;  %v2494_v14 = vmax.f32 %v2414_v48, %v2454_v20  ;;  %v2495_v15 = vmax.f32 %v2415_v42, %v2455_v29  ;;  %v2700_v45 = vmax.f32 %v2620_v27, %v6137_v63  ;;  %v2776_v53 = vmax.f32 %v2696_v19, %v6133_v11 }
 0x237   : > { %2929 = vst [vmem:[#allocation2 + $0x1ba] sm:$0xff] %v2889_v52  ;;  %v2778_v21 = vmax.f32 %v2698_v54, %v6137_v63  ;;  %v2617_v36 = vmax.f32 %v2537_v3, %v2539_v38  ;;  %v2619_v43 = vmax.f32 %v2539_v38, %v2541_v25  ;;  %v2621_v33 = vmax.f32 %v2541_v25, %v6135_v37 }
 0x238   : > { %v2812_v60 = vmax.f32 %v2732_v26, %v2494_v14  ;;  %v2890_v58 = vmax.f32 %v2810_v23, %v2494_v14  ;;  %v2813_v47 = vmax.f32 %v2733_v39, %v2495_v15  ;;  %v2891_v32 = vmax.f32 %v2811_v56, %v2495_v15 }
 0x239   : > { %v2780_v34 = vmax.f32 %v2700_v45, %v6145_v18  ;;  %v2856_v62 = vmax.f32 %v2776_v53, %v6137_v63  ;;  %v2858_v50 = vmax.f32 %v2778_v21, %v6145_v18  ;;  %v2697_v11 = vmax.f32 %v2617_v36, %v2541_v25 }
 0x23a   : > { %v2892_v22 = vmax.f32 %v2812_v60, %v2852_v57  ;;  %2930 = vst [vmem:[#allocation2 + $0x1ca] sm:$0xff] %v2890_v58  ;;  %v2893_v48 = vmax.f32 %v2813_v47, %v2853_v40  ;;  %2931 = vst [vmem:[#allocation2 + $0x1d2] sm:$0xff] %v2891_v32  ;;  %v2699_v42 = vmax.f32 %v2619_v43, %v6135_v37 }
 0x23b   : > { %v2701_v27 = vmax.f32 %v2621_v33, %v6139_v61  ;;  %v2860_v19 = vmax.f32 %v2780_v34, %v6155_v7  ;;  %2896 = vst [vmem:[#allocation2 + $0x32] sm:$0xff] %v2856_v62  ;;  %2898 = vst [vmem:[#allocation2 + $0x4a] sm:$0xff] %v2858_v50  ;;  %v2777_v54 = vmax.f32 %v2697_v11, %v6135_v37 }
 0x23c   : > { %v2734_v2 = vmax.f32 %v2654_v55, %v2494_v14  ;;  %v2735_v12 = vmax.f32 %v2655_v41, %v2495_v15  ;;  %2932 = vst [vmem:[#allocation2 + $0x1e2] sm:$0xff] %v2892_v22  ;;  %2933 = vst [vmem:[#allocation2 + $0x1ea] sm:$0xff] %v2893_v48  ;;  %v2779_v63 = vmax.f32 %v2699_v42, %v6139_v61 }
 0x23d   : > { %v2781_v18 = vmax.f32 %v2701_v27, %v6147_v46  ;;  %2900 = vst [vmem:[#allocation2 + $0x62] sm:$0xff] %v2860_v19  ;;  %v2857_v20 = vmax.f32 %v2777_v54, %v6139_v61 }
 0x23e   : > { %v2814_v29 = vmax.f32 %v2734_v2, %v2852_v57  ;;  %v2815_v26 = vmax.f32 %v2735_v12, %v2853_v40  ;;  %v2859_v7 = vmax.f32 %v2779_v63, %v6147_v46  ;;  %2938 = sbr.rel (%p4602_p5) target bundleno = 586 (0x24a), region = 68 }
 0x23f   : > { %v2861_v23 = vmax.f32 %v2781_v18, %v6157_v49  ;;  %2897 = vst [vmem:[#allocation2 + $0x3a] sm:$0xff] %v2857_v20 }
 0x240   : > { %v2894_v37 = vmax.f32 %v2814_v29, %v2854_v16  ;;  %v2895_v55 = vmax.f32 %v2815_v26, %v2855_v35  ;;  %2899 = vst [vmem:[#allocation2 + $0x52] sm:$0xff] %v2859_v7 }
 0x241   : > { %2901 = vst [vmem:[#allocation2 + $0x6a] sm:$0xff] %v2861_v23 }
 0x242   : > { %2934 = vst [vmem:[#allocation2 + $0x1fa] sm:$0xff] %v2894_v37  ;;  %2935 = vst [vmem:[#allocation2 + $0x202] sm:$0xff] %v2895_v55 }
 0x243   : > { %v5398_v28 = vmov -1e+30  }
 0x244   : > { %2939 = vst [vmem:[#allocation2 + $0x32] sm:$0xff] %v5398_v28  ;;  %2940 = vst [vmem:[#allocation2 + $0x3a] sm:$0xff] %v5398_v28 }
 0x245   : > { %2941 = vst [vmem:[#allocation2 + $0x4a] sm:$0xff] %v5398_v28  ;;  %2942 = vst [vmem:[#allocation2 + $0x52] sm:$0xff] %v5398_v28 }
 0x246   : > { %2943 = vst [vmem:[#allocation2 + $0x62] sm:$0xff] %v5398_v28  ;;  %2944 = vst [vmem:[#allocation2 + $0x6a] sm:$0xff] %v5398_v28 }
 0x247   : > { %2945 = vst [vmem:[#allocation2 + $0x7a] sm:$0xff] %v5398_v28  ;;  %2946 = vst [vmem:[#allocation2 + $0x82] sm:$0xff] %v5398_v28 }
 0x248   : > { %2947 = vst [vmem:[#allocation2 + $0x92] sm:$0xff] %v5398_v28  ;;  %2948 = vst [vmem:[#allocation2 + $0x9a] sm:$0xff] %v5398_v28 }
 0x249   : > { %2949 = vst [vmem:[#allocation2 + $0xaa] sm:$0xff] %v5398_v28  ;;  %2950 = vst [vmem:[#allocation2 + $0xb2] sm:$0xff] %v5398_v28 }
 0x24a PF: > { %2953 = sbr.rel (%p4603_p6) target bundleno = 598 (0x256), region = 72 }
 0x24f   : > { %v5399_v61 = vmov -1e+30  }
 0x250   : > { %2954 = vst [vmem:[#allocation2 + $0x182] sm:$0xff] %v5399_v61  ;;  %2955 = vst [vmem:[#allocation2 + $0x18a] sm:$0xff] %v5399_v61 }
 0x251   : > { %2956 = vst [vmem:[#allocation2 + $0x19a] sm:$0xff] %v5399_v61  ;;  %2957 = vst [vmem:[#allocation2 + $0x1a2] sm:$0xff] %v5399_v61 }
 0x252   : > { %2958 = vst [vmem:[#allocation2 + $0x1b2] sm:$0xff] %v5399_v61  ;;  %2959 = vst [vmem:[#allocation2 + $0x1ba] sm:$0xff] %v5399_v61 }
 0x253   : > { %2960 = vst [vmem:[#allocation2 + $0x1ca] sm:$0xff] %v5399_v61  ;;  %2961 = vst [vmem:[#allocation2 + $0x1d2] sm:$0xff] %v5399_v61 }
 0x254   : > { %2962 = vst [vmem:[#allocation2 + $0x1e2] sm:$0xff] %v5399_v61  ;;  %2963 = vst [vmem:[#allocation2 + $0x1ea] sm:$0xff] %v5399_v61 }
 0x255   : > { %2964 = vst [vmem:[#allocation2 + $0x1fa] sm:$0xff] %v5399_v61  ;;  %2965 = vst [vmem:[#allocation2 + $0x202] sm:$0xff] %v5399_v61 }
 0x256 PF: > { %v3534_v46 = vpack.c.bf16 %v5962_v17, %v5954_v6  ;;  %v3510_v49 = vpack.c.bf16 %v5690_v31, %v5667_v4  ;;  %v2966_v3 = vld [vmem:[#allocation2 + $0x30] sm:$0xff]  ;;  %v2967_v38 = vld [vmem:[#allocation2 + $0x38] sm:$0xff]  ;;  %v6412_v39 = vld [vmem:[#allocation2 + $0x48] sm:$0xff]  ;;  %s4659_s27 = sshll.u32 %s5379_s28, 5  ;;  %s4385_s28 = sshll.u32 %s5850_s3, 4  ;;  %s6991_s28 = int_to_ptr.vmem [resolvable:$true] %s4385_s28 }
 0x257   : > { %v3006_v25 = vld [vmem:[#allocation2 + $0x31] sm:$0xff]  ;;  %v3007_v41 = vld [vmem:[#allocation2 + $0x39] sm:$0xff]  ;;  %v3008_v14 = vld [vmem:[#allocation2 + $0x49] sm:$0xff]  ;;  %s4382_s23 = sadd.s32 %s4659_s27, %s5524_s9  ;;  %s7201_s10 = sand.u32 1, %s5367_s25  }
 0x258   : > { %4812 = vmatprep.mubr.bf16.mxu0 %v3534_v46  ;;  %4844 = vmatprep.mubr.bf16.mxu1 %v3510_v49  ;;  %v6414_v56 = vld [vmem:[#allocation2 + $0x50] sm:$0xff]  ;;  %v6416_v52 = vld [vmem:[#allocation2 + $0x60] sm:$0xff]  ;;  %v2971_v53 = vld [vmem:[#allocation2 + $0x68] sm:$0xff]  ;;  %v3046_v27 = vmax.f32 %v2966_v3, %v3006_v25  ;;  %v3047_v19 = vmax.f32 %v2967_v38, %v3007_v41  ;;  %v3048_v2 = vmax.f32 %v6412_v39, %v3008_v14  ;;  %s4660_s21 = sshll.u32 %s4382_s23, 7  ;;  %s6998_s20 = scalar_lea.sflag [#allocation4], %s7201_s10 }
 0x259   : > { %v3009_v15 = vld [vmem:[#allocation2 + $0x51] sm:$0xff]  ;;  %v3010_v45 = vld [vmem:[#allocation2 + $0x61] sm:$0xff]  ;;  %v3011_v4 = vld [vmem:[#allocation2 + $0x69] sm:$0xff]  ;;  %s6989_s22 = scalar_lea.hbm %s7056_s7, %s4660_s21  ;;  %s5299_s13 = scalar_lea.vmem %s6991_s28, 2048 }
 0x25a   : > { %v2972_v6 = vld [vmem:[#allocation2 + $0x78] sm:$0xff]  ;;  %v2973_v17 = vld [vmem:[#allocation2 + $0x80] sm:$0xff]  ;;  %v2998_v21 = vld [vmem:[#allocation2 + $0x1b0] sm:$0xff]  ;;  %v3049_v12 = vmax.f32 %v6414_v56, %v3009_v15  ;;  %v3050_v63 = vmax.f32 %v6416_v52, %v3010_v45  ;;  %v3051_v20 = vmax.f32 %v2971_v53, %v3011_v4  ;;  %p5300_p7 = scmp.ne.s32.totalorder %s6991_s28, %s5299_s13  ;;  %s5400_s18 = smov [#allocation3]  }
 0x25b   : > { %v3012_v31 = vld [vmem:[#allocation2 + $0x79] sm:$0xff]  ;;  %v3013_v36 = vld [vmem:[#allocation2 + $0x81] sm:$0xff]  ;;  %v3001_v60 = vld [vmem:[#allocation2 + $0x1d0] sm:$0xff]  ;;  %s5303_s12 = sshll.u32 %s5400_s18, 4  ;;  %s5304_s12 = int_to_ptr.vmem [resolvable:$false] %s5303_s12 }
 0x25c   : > { %v2999_v43 = vld [vmem:[#allocation2 + $0x1b8] sm:$0xff]  ;;  %v3000_v33 = vld [vmem:[#allocation2 + $0x1c8] sm:$0xff]  ;;  %v3002_v58 = vld [vmem:[#allocation2 + $0x1e0] sm:$0xff]  ;;  %v3052_v29 = vmax.f32 %v2972_v6, %v3012_v31  ;;  %v3053_v26 = vmax.f32 %v2973_v17, %v3013_v36  ;;  %p5301_p9 = pnand %p5300_p7, %p5494_p3  ;;  %s5305_s16 = scalar_lea.vmem %s5304_s12, 4096 }
 0x25d   : > { %v3038_v47 = vld [vmem:[#allocation2 + $0x1b1] sm:$0xff]  ;;  %v3039_v32 = vld [vmem:[#allocation2 + $0x1b9] sm:$0xff]  ;;  %v3040_v57 = vld [vmem:[#allocation2 + $0x1c9] sm:$0xff]  ;;  %p5306_p11 = scmp.lt.s32.totalorder %s6991_s28, %s5304_s12  ;;  %p5307_p12 = scmp.lt.s32.totalorder %s5305_s16, %s5299_s13 }
 0x25e   : > { %v3003_v40 = vld [vmem:[#allocation2 + $0x1e8] sm:$0xff]  ;;  %v3004_v34 = vld [vmem:[#allocation2 + $0x1f8] sm:$0xff]  ;;  %v3005_v22 = vld [vmem:[#allocation2 + $0x200] sm:$0xff]  ;;  %v3078_v7 = vmax.f32 %v2998_v21, %v3038_v47  ;;  %v3079_v28 = vmax.f32 %v2999_v43, %v3039_v32  ;;  %v3080_v61 = vmax.f32 %v3000_v33, %v3040_v57  ;;  %p5302_p10 = pneg %p5301_p9 }
 0x25f   : > { %v3041_v62 = vld [vmem:[#allocation2 + $0x1d1] sm:$0xff]  ;;  %v3042_v50 = vld [vmem:[#allocation2 + $0x1e1] sm:$0xff]  ;;  %v3043_v11 = vld [vmem:[#allocation2 + $0x1e9] sm:$0xff]  ;;  %p5308_p13 = por %p5307_p12, %p5306_p11 }
 0x260   : > { %v3044_v48 = vld [vmem:[#allocation2 + $0x1f9] sm:$0xff]  ;;  %v3045_v42 = vld [vmem:[#allocation2 + $0x201] sm:$0xff]  ;;  %v3088_v16 = vld [vmem:[#allocation2 + $0x4a] sm:$0xff]  ;;  %v3081_v46 = vmax.f32 %v3001_v60, %v3041_v62  ;;  %v3082_v49 = vmax.f32 %v3002_v58, %v3042_v50  ;;  %v3083_v41 = vmax.f32 %v3003_v40, %v3043_v11 }
 0x261   : > { %v3086_v54 = vld [vmem:[#allocation2 + $0x32] sm:$0xff]  ;;  %v3087_v18 = vld [vmem:[#allocation2 + $0x3a] sm:$0xff]  ;;  %v3090_v23 = vld [vmem:[#allocation2 + $0x62] sm:$0xff]  ;;  %v3084_v39 = vmax.f32 %v3004_v34, %v3044_v48  ;;  %v3085_v53 = vmax.f32 %v3005_v22, %v3045_v42  ;;  %v3128_v4 = vmax.f32 %v3048_v2, %v3088_v16  ;;  %p5309_p0 = pnand %p5308_p13, %p5302_p10 }
 0x262   : > { %v3089_v35 = vld [vmem:[#allocation2 + $0x52] sm:$0xff]  ;;  %v3091_v37 = vld [vmem:[#allocation2 + $0x6a] sm:$0xff]  ;;  %v3092_v55 = vld [vmem:[#allocation2 + $0x7a] sm:$0xff]  ;;  %v3126_v15 = vmax.f32 %v3046_v27, %v3086_v54  ;;  %v3127_v45 = vmax.f32 %v3047_v19, %v3087_v18  ;;  %v3130_v36 = vmax.f32 %v3050_v63, %v3090_v23 }
 0x263   : > { %v3093_v3 = vld [vmem:[#allocation2 + $0x82] sm:$0xff]  ;;  %v3118_v38 = vld [vmem:[#allocation2 + $0x1b2] sm:$0xff]  ;;  %v3119_v25 = vld [vmem:[#allocation2 + $0x1ba] sm:$0xff]  ;;  %v3129_v31 = vmax.f32 %v3049_v12, %v3089_v35  ;;  %v3131_v43 = vmax.f32 %v3051_v20, %v3091_v37  ;;  %v3132_v33 = vmax.f32 %v3052_v29, %v3092_v55 }
 0x264   : > { %v3120_v56 = vld [vmem:[#allocation2 + $0x1ca] sm:$0xff]  ;;  %v3121_v52 = vld [vmem:[#allocation2 + $0x1d2] sm:$0xff]  ;;  %v3122_v14 = vld [vmem:[#allocation2 + $0x1e2] sm:$0xff]  ;;  %v3133_v60 = vmax.f32 %v3053_v26, %v3093_v3  ;;  %v6421_v58 = vmax.f32 %v3078_v7, %v3118_v38  ;;  %v3159_v40 = vmax.f32 %v3079_v28, %v3119_v25 }
 0x265   : > { %v3123_v6 = vld [vmem:[#allocation2 + $0x1ea] sm:$0xff]  ;;  %v3124_v17 = vld [vmem:[#allocation2 + $0x1fa] sm:$0xff]  ;;  %v3125_v21 = vld [vmem:[#allocation2 + $0x202] sm:$0xff]  ;;  %v3160_v34 = vmax.f32 %v3080_v61, %v3120_v56  ;;  %v6423_v62 = vmax.f32 %v3081_v46, %v3121_v52  ;;  %v6425_v50 = vmax.f32 %v3082_v49, %v3122_v14 }
 0x266   : > { %v3166_v47 = vld [vmem:[#allocation2 + $0x33] sm:$0xff]  ;;  %v3167_v32 = vld [vmem:[#allocation2 + $0x3b] sm:$0xff]  ;;  %v3168_v57 = vld [vmem:[#allocation2 + $0x4b] sm:$0xff]  ;;  %v6427_v42 = vmax.f32 %v3083_v41, %v3123_v6  ;;  %v6429_v27 = vmax.f32 %v3084_v39, %v3124_v17  ;;  %v3165_v18 = vmax.f32 %v3085_v53, %v3125_v21 }
 0x267   : > { %v3169_v11 = vld [vmem:[#allocation2 + $0x53] sm:$0xff]  ;;  %v3170_v22 = vld [vmem:[#allocation2 + $0x63] sm:$0xff]  ;;  %v3171_v48 = vld [vmem:[#allocation2 + $0x6b] sm:$0xff]  ;;  %v3206_v12 = vmax.f32 %v3126_v15, %v3166_v47  ;;  %v3207_v63 = vmax.f32 %v3127_v45, %v3167_v32  ;;  %v3208_v29 = vmax.f32 %v3128_v4, %v3168_v57 }
 0x268   : > { %v3172_v19 = vld [vmem:[#allocation2 + $0x7b] sm:$0xff]  ;;  %v3173_v54 = vld [vmem:[#allocation2 + $0x83] sm:$0xff]  ;;  %v3198_v2 = vld [vmem:[#allocation2 + $0x1b3] sm:$0xff]  ;;  %v3209_v26 = vmax.f32 %v3129_v31, %v3169_v11  ;;  %v3210_v7 = vmax.f32 %v3130_v36, %v3170_v22  ;;  %v3211_v28 = vmax.f32 %v3131_v43, %v3171_v48 }
 0x269   : > { %v3199_v16 = vld [vmem:[#allocation2 + $0x1bb] sm:$0xff]  ;;  %v3200_v35 = vld [vmem:[#allocation2 + $0x1cb] sm:$0xff]  ;;  %v3201_v20 = vld [vmem:[#allocation2 + $0x1d3] sm:$0xff]  ;;  %v3212_v61 = vmax.f32 %v3132_v33, %v3172_v19  ;;  %v3213_v46 = vmax.f32 %v3133_v60, %v3173_v54  ;;  %v3238_v49 = vmax.f32 %v6421_v58, %v3198_v2 }
 0x26a   : > { %v3202_v23 = vld [vmem:[#allocation2 + $0x1e3] sm:$0xff]  ;;  %v3203_v37 = vld [vmem:[#allocation2 + $0x1eb] sm:$0xff]  ;;  %v3204_v55 = vld [vmem:[#allocation2 + $0x1fb] sm:$0xff]  ;;  %v3239_v38 = vmax.f32 %v3159_v40, %v3199_v16  ;;  %v3240_v25 = vmax.f32 %v3160_v34, %v3200_v35  ;;  %v3241_v41 = vmax.f32 %v6423_v62, %v3201_v20 }
 0x26b   : > { %v3205_v3 = vld [vmem:[#allocation2 + $0x203] sm:$0xff]  ;;  %v3242_v39 = vmax.f32 %v6425_v50, %v3202_v23  ;;  %v3246_v56 = vld [vmem:[#allocation2 + $0x34] sm:$0xff]  ;;  %v3243_v14 = vmax.f32 %v6427_v42, %v3203_v37  ;;  %v3244_v15 = vmax.f32 %v6429_v27, %v3204_v55  ;;  %v3248_v45 = vld [vmem:[#allocation2 + $0x4c] sm:$0xff] }
 0x26c   : > { %v3247_v52 = vld [vmem:[#allocation2 + $0x3c] sm:$0xff]  ;;  %v3249_v53 = vld [vmem:[#allocation2 + $0x54] sm:$0xff]  ;;  %v3250_v6 = vld [vmem:[#allocation2 + $0x64] sm:$0xff]  ;;  %v3286_v17 = vmax.f32 %v3206_v12, %v3246_v56  ;;  %v3245_v4 = vmax.f32 %v3165_v18, %v3205_v3  ;;  %v3288_v33 = vmax.f32 %v3208_v29, %v3248_v45 }
 0x26d   : > { %v3287_v21 = vmax.f32 %v3207_v63, %v3247_v52  ;;  %v3251_v31 = vld [vmem:[#allocation2 + $0x6c] sm:$0xff]  ;;  %v3252_v36 = vld [vmem:[#allocation2 + $0x7c] sm:$0xff]  ;;  %v3253_v43 = vld [vmem:[#allocation2 + $0x84] sm:$0xff]  ;;  %v3289_v60 = vmax.f32 %v3209_v26, %v3249_v53  ;;  %v3290_v58 = vmax.f32 %v3210_v7, %v3250_v6  ;;  %v3535_v52 = vpack.c.bf16 %v5981_v30, %v5973_v10 }
 0x26e   : > { %v3278_v47 = vld [vmem:[#allocation2 + $0x1b4] sm:$0xff]  ;;  %v3279_v32 = vld [vmem:[#allocation2 + $0x1bc] sm:$0xff]  ;;  %v3280_v57 = vld [vmem:[#allocation2 + $0x1cc] sm:$0xff]  ;;  %v3291_v40 = vmax.f32 %v3211_v28, %v3251_v31  ;;  %v3292_v34 = vmax.f32 %v3212_v61, %v3252_v36  ;;  %v3293_v62 = vmax.f32 %v3213_v46, %v3253_v43  ;;  %3326 = vst [vmem:[#allocation2 + $0x32] sm:$0xff] %v3286_v17  ;;  %v3536_v53 = vpack.c.bf16 %v5995_v1, %v5988_v24 }
 0x26f   : > { %3327 = vst [vmem:[#allocation2 + $0x3a] sm:$0xff] %v3287_v21  ;;  %v3281_v50 = vld [vmem:[#allocation2 + $0x1d4] sm:$0xff]  ;;  %v3282_v11 = vld [vmem:[#allocation2 + $0x1e4] sm:$0xff]  ;;  %v3283_v22 = vld [vmem:[#allocation2 + $0x1ec] sm:$0xff]  ;;  %v3318_v48 = vmax.f32 %v3238_v49, %v3278_v47  ;;  %v3319_v42 = vmax.f32 %v3239_v38, %v3279_v32  ;;  %v3320_v27 = vmax.f32 %v3240_v25, %v3280_v57 }
 0x270   : > { %3328 = vst [vmem:[#allocation2 + $0x4a] sm:$0xff] %v3288_v33  ;;  %3329 = vst [vmem:[#allocation2 + $0x52] sm:$0xff] %v3289_v60  ;;  %v3284_v19 = vld [vmem:[#allocation2 + $0x1fc] sm:$0xff]  ;;  %v3285_v54 = vld [vmem:[#allocation2 + $0x204] sm:$0xff]  ;;  %v3321_v2 = vmax.f32 %v3241_v41, %v3281_v50  ;;  %v3322_v12 = vmax.f32 %v3242_v39, %v3282_v11  ;;  %v3323_v63 = vmax.f32 %v3243_v14, %v3283_v22 }
 0x271   : > { %3330 = vst [vmem:[#allocation2 + $0x62] sm:$0xff] %v3290_v58  ;;  %3331 = vst [vmem:[#allocation2 + $0x6a] sm:$0xff] %v3291_v40  ;;  %v3324_v18 = vmax.f32 %v3244_v15, %v3284_v19  ;;  %v3325_v16 = vmax.f32 %v3245_v4, %v3285_v54  ;;  %v5203_v35 = vld [vmem:[%s7054_s5 + $0x78] sm:$0xff]   ;;  %v5205_v29 = vld [vmem:[%s7054_s5 + $0x70] sm:$0xff]   ;;  %v3511_v14 = vpack.c.bf16 %v5677_v13, %v5657_v59 }
 0x272   : > { %3332 = vst [vmem:[#allocation2 + $0x7a] sm:$0xff] %v3292_v34  ;;  %3333 = vst [vmem:[#allocation2 + $0x82] sm:$0xff] %v3293_v62  ;;  %v5204_v20 = vld [vmem:[%s7054_s5 + $0x38] sm:$0xff]   ;;  %4796 = vmatprep.subr.bf16.mxu0 %v5203_v35  ;;  %v5206_v26 = vld [vmem:[%s7054_s5 + $0x30] sm:$0xff]   ;;  %v3512_v13 = vpack.c.bf16 %v5739_v8, %v5717_v44 }
 0x273   : > { %3358 = vst [vmem:[#allocation2 + $0x1b2] sm:$0xff] %v3318_v48  ;;  %3359 = vst [vmem:[#allocation2 + $0x1ba] sm:$0xff] %v3319_v42  ;;  %4828 = vmatprep.subr.bf16.mxu1 %v5204_v20  ;;  %4797 = vmatpush3.bf16.msra.mxu0 %v5203_v35  ;;  %v5207_v7 = vld [vmem:[%s7054_s5 + $0x68] sm:$0xff]   ;;  %v5209_v37 = vld [vmem:[%s7054_s5 + $0x60] sm:$0xff]  }
 0x274   : > { %3360 = vst [vmem:[#allocation2 + $0x1ca] sm:$0xff] %v3320_v27  ;;  %3361 = vst [vmem:[#allocation2 + $0x1d2] sm:$0xff] %v3321_v2  ;;  %4829 = vmatpush3.bf16.msra.mxu1 %v5204_v20  ;;  %4798 = vmatprep.subr.bf16.mxu0 %v5205_v29  ;;  %v5208_v23 = vld [vmem:[%s7054_s5 + $0x28] sm:$0xff]   ;;  %v5210_v55 = vld [vmem:[%s7054_s5 + $0x20] sm:$0xff]  }
 0x275   : > { %3362 = vst [vmem:[#allocation2 + $0x1e2] sm:$0xff] %v3322_v12  ;;  %3363 = vst [vmem:[#allocation2 + $0x1ea] sm:$0xff] %v3323_v63  ;;  %4830 = vmatprep.subr.bf16.mxu1 %v5206_v26  ;;  %v5211_v28 = vld [vmem:[%s7054_s5 + $0x58] sm:$0xff]   ;;  %v5213_v46 = vld [vmem:[%s7054_s5 + $0x50] sm:$0xff]  }
 0x276   : > { %3364 = vst [vmem:[#allocation2 + $0x1fa] sm:$0xff] %v3324_v18  ;;  %3365 = vst [vmem:[#allocation2 + $0x202] sm:$0xff] %v3325_v16  ;;  %v5212_v61 = vld [vmem:[%s7054_s5 + $0x18] sm:$0xff]   ;;  %v5214_v49 = vld [vmem:[%s7054_s5 + $0x10] sm:$0xff]  }
 0x277   : > { %4799 = vmatpush3.bf16.msra.mxu0 %v5205_v29  ;;  %v5215_v3 = vld [vmem:[%s7054_s5 + $0x48] sm:$0xff]   ;;  %v5217_v25 = vld [vmem:[%s7054_s5 + $0x40] sm:$0xff]   ;;  %v5219_v39 = vld [vmem:[%s7054_s5 + $0xb8] sm:$0xff]  }
 0x278   : > { %4831 = vmatpush3.bf16.msra.mxu1 %v5206_v26  ;;  %4800 = vmatprep.subr.bf16.mxu0 %v5207_v7  ;;  %v5216_v38 = vld [vmem:[%s7054_s5 + $0x8] sm:$0xff]   ;;  %v5218_v41 = vld [vmem:[%s7054_s5] sm:$0xff]   ;;  %v6490_v56 = vld [vmem:[%s7054_s5 + $0xf8] sm:$0xff]  }
 0x279   : > { %4832 = vmatprep.subr.bf16.mxu1 %v5208_v23  ;;  %v5220_v15 = vld [vmem:[%s7054_s5 + $0xb0] sm:$0xff]   ;;  %v6499_v45 = vld [vmem:[#allocation2 + $0xc0] sm:$0xff]  ;;  %v2979_v10 = vld [vmem:[#allocation2 + $0xc8] sm:$0xff] }
 0x27a   : > { %v6506_v6 = vld [vmem:[%s7054_s5 + $0xf0] sm:$0xff]   ;;  %v6508_v30 = vld [vmem:[#allocation2 + $0xd8] sm:$0xff]  ;;  %v6510_v59 = vld [vmem:[#allocation2 + $0xe0] sm:$0xff] }
 0x27b   : > { %4801 = vmatpush3.bf16.msra.mxu0 %v5207_v7  ;;  %v7156_v17 = vld [vmem:[#allocation17_spill] sm:$0xff]  ;;  %v7157_v4 = vld [vmem:[#allocation7_spill] sm:$0xff]  ;;  %v7158_v31 = vld [vmem:[#allocation8_spill] sm:$0xff] }
 0x27c   : > { %4833 = vmatpush3.bf16.msra.mxu1 %v5208_v23  ;;  %4802 = vmatprep.subr.bf16.mxu0 %v5209_v37  ;;  %v3537_v21 = vpack.c.bf16 %v7156_v17, %v6008_v51  ;;  %v3513_v36 = vpack.c.bf16 %v7158_v31, %v7157_v4  ;;  %v6519_v24 = vld [vmem:[#allocation2 + $0xf0] sm:$0xff]  ;;  %v6521_v1 = vld [vmem:[#allocation2 + $0xf8] sm:$0xff]  ;;  %v6523_v43 = vld [vmem:[#allocation2 + $0x108] sm:$0xff] }
 0x27d   : > { %4834 = vmatprep.subr.bf16.mxu1 %v5210_v55  ;;  %v6528_v33 = vld [vmem:[%s7054_s5 + $0xa8] sm:$0xff]   ;;  %v7159_v44 = vld [vmem:[#allocation18_spill] sm:$0xff]  ;;  %v7160_v8 = vld [vmem:[#allocation19_spill] sm:$0xff] }
 0x27e   : > { %v7161_v58 = vld [vmem:[#allocation10_spill] sm:$0xff]  ;;  %v7162_v47 = vld [vmem:[#allocation12_spill] sm:$0xff]  ;;  %v7164_v40 = vld [vmem:[#allocation21_spill] sm:$0xff] }
 0x27f   : > { %4803 = vmatpush3.bf16.msra.mxu0 %v5209_v37  ;;  %v7163_v57 = vld [vmem:[#allocation20_spill] sm:$0xff]  ;;  %v7165_v62 = vld [vmem:[#allocation9_spill] sm:$0xff]  ;;  %v7166_v50 = vld [vmem:[#allocation11_spill] sm:$0xff] }
 0x280   : > { %4835 = vmatpush3.bf16.msra.mxu1 %v5210_v55  ;;  %4804 = vmatprep.subr.bf16.mxu0 %v5211_v28  ;;  %v2985_v22 = vld [vmem:[#allocation2 + $0x110] sm:$0xff]  ;;  %v6538_v48 = vld [vmem:[#allocation2 + $0x120] sm:$0xff]  ;;  %v6540_v42 = vld [vmem:[#allocation2 + $0x128] sm:$0xff] }
 0x281   : > { %4836 = vmatprep.subr.bf16.mxu1 %v5212_v61  ;;  %v7167_v27 = vld [vmem:[#allocation22_spill] sm:$0xff]  ;;  %v7168_v19 = vld [vmem:[#allocation23_spill] sm:$0xff]  ;;  %v7170_v12 = vld [vmem:[#allocation16_spill] sm:$0xff] }
 0x282   : > { %v7169_v2 = vld [vmem:[#allocation14_spill] sm:$0xff]  ;;  %v7171_v18 = vld [vmem:[#allocation24_spill] sm:$0xff]  ;;  %v7172_v16 = vld [vmem:[#allocation25_spill] sm:$0xff] }
 0x283   : > { %4805 = vmatpush3.bf16.msra.mxu0 %v5211_v28  ;;  %v3018_v20 = vld [vmem:[#allocation2 + $0xc1] sm:$0xff]  ;;  %v3019_v29 = vld [vmem:[#allocation2 + $0xc9] sm:$0xff]  ;;  %v3020_v26 = vld [vmem:[#allocation2 + $0xd9] sm:$0xff] }
 0x284   : > { %4837 = vmatpush3.bf16.msra.mxu1 %v5212_v61  ;;  %4806 = vmatprep.subr.bf16.mxu0 %v5213_v46  ;;  %v6551_v7 = vld [vmem:[%s7054_s5 + $0xe8] sm:$0xff]   ;;  %v3022_v37 = vld [vmem:[#allocation2 + $0xf1] sm:$0xff]  ;;  %v3023_v55 = vld [vmem:[#allocation2 + $0xf9] sm:$0xff]  ;;  %v3058_v28 = vmax.f32 %v6499_v45, %v3018_v20  ;;  %v3059_v61 = vmax.f32 %v2979_v10, %v3019_v29 }
 0x285   : > { %4838 = vmatprep.subr.bf16.mxu1 %v5214_v49  ;;  %v3021_v23 = vld [vmem:[#allocation2 + $0xe1] sm:$0xff]  ;;  %v3027_v10 = vld [vmem:[#allocation2 + $0x129] sm:$0xff]  ;;  %v3102_v35 = vld [vmem:[#allocation2 + $0xf2] sm:$0xff] }
 0x286   : > { %v7174_v45 = vld [vmem:[#allocation15_spill] sm:$0xff]  ;;  %v3182_v51 = vld [vmem:[#allocation2 + $0xf3] sm:$0xff] }
 0x287   : > { %4807 = vmatpush3.bf16.msra.mxu0 %v5213_v46  ;;  %v3060_v46 = vmax.f32 %v6508_v30, %v3020_v26  ;;  %v3098_v20 = vld [vmem:[#allocation2 + $0xc2] sm:$0xff]  ;;  %v3185_v4 = vld [vmem:[#allocation2 + $0x113] sm:$0xff] }
 0x288   : > { %4839 = vmatpush3.bf16.msra.mxu1 %v5214_v49  ;;  %4808 = vmatprep.subr.bf16.mxu0 %v5215_v3  ;;  %v3024_v49 = vld [vmem:[#allocation2 + $0x109] sm:$0xff]  ;;  %v7176_v29 = vld [vmem:[#allocation27_spill] sm:$0xff]  ;;  %v3138_v63 = vmax.f32 %v3058_v28, %v3098_v20  ;;  %v7179_v28 = vld [vmem:[#allocation30_spill] sm:$0xff] }
 0x289   : > { %4840 = vmatprep.subr.bf16.mxu1 %v5216_v38  ;;  %v3064_v30 = vmax.f32 %v6523_v43, %v3024_v49  ;;  %v6576_v43 = vld [vmem:[%s7054_s5 + $0xe0] sm:$0xff]   ;;  %v2993_v20 = vld [vmem:[#allocation2 + $0x170] sm:$0xff] }
 0x28a   : > { %v3103_v49 = vld [vmem:[#allocation2 + $0xfa] sm:$0xff]  ;;  %v3178_v60 = vld [vmem:[#allocation2 + $0xc3] sm:$0xff] }
 0x28b   : > { %4809 = vmatpush3.bf16.msra.mxu0 %v5215_v3  ;;  %v3025_v3 = vld [vmem:[#allocation2 + $0x111] sm:$0xff]  ;;  %v3183_v17 = vld [vmem:[#allocation2 + $0xfb] sm:$0xff]  ;;  %v3186_v31 = vld [vmem:[#allocation2 + $0x123] sm:$0xff] }
 0x28c   : > { %4841 = vmatpush3.bf16.msra.mxu1 %v5216_v38  ;;  %4810 = vmatprep.subr.bf16.mxu0 %v5217_v25  ;;  %v3026_v38 = vld [vmem:[#allocation2 + $0x121] sm:$0xff] }
 0x28d   : > { %4842 = vmatprep.subr.bf16.mxu1 %v5218_v41 }
 0x28f   : > { %4811 = vmatpush3.bf16.msra.mxu0 %v5217_v25  ;;  %v3061_v25 = vmax.f32 %v6510_v59, %v3021_v23  ;;  %v3066_v59 = vmax.f32 %v6538_v48, %v3026_v38  ;;  %v3067_v23 = vmax.f32 %v6540_v42, %v3027_v10  ;;  %v7178_v48 = vld [vmem:[#allocation29_spill] sm:$0xff] }
 0x290   : > { %4843 = vmatpush3.bf16.msra.mxu1 %v5218_v41  ;;  %4860 = vmatprep.subr.bf16.mxu0 %v5219_v39  ;;  %v3062_v41 = vmax.f32 %v6519_v24, %v3022_v37  ;;  %v3099_v24 = vld [vmem:[#allocation2 + $0xca] sm:$0xff]  ;;  %v3100_v37 = vld [vmem:[#allocation2 + $0xda] sm:$0xff]  ;;  %v3105_v38 = vld [vmem:[#allocation2 + $0x112] sm:$0xff] }
 0x291   : > { %4924 = vmatprep.subr.bf16.mxu1 %v6490_v56  ;;  %v3139_v54 = vmax.f32 %v3059_v61, %v3099_v24  ;;  %v3140_v26 = vmax.f32 %v3060_v46, %v3100_v37  ;;  %v7180_v61 = vld [vmem:[#allocation31_spill] sm:$0xff]  ;;  %v6589_v46 = vld [vmem:[%s7054_s5 + $0x98] sm:$0xff]  }
 0x292   : > { %4813 = vmatmul.mubr.bf16.vlgmr.msra.gmra.mxu0 %v3535_v52  ;;  %v6562_v52 = vld [vmem:[%s7054_s5 + $0xa0] sm:$0xff]   ;;  %v3142_v10 = vmax.f32 %v3062_v41, %v3102_v35  ;;  %v3179_v41 = vld [vmem:[#allocation2 + $0xcb] sm:$0xff] }
 0x293   : > { %4845 = vmatmul.mubr.bf16.vlgmr.msra.gmra.mxu1 %v3511_v14  ;;  %4861 = vmatpush3.bf16.msra.mxu0 %v5219_v39  ;;  %v3063_v39 = vmax.f32 %v6521_v1, %v3023_v55  ;;  %v7173_v14 = vld [vmem:[#allocation13_spill] sm:$0xff]  ;;  %v7175_v1 = vld [vmem:[#allocation26_spill] sm:$0xff]  ;;  %v3101_v55 = vld [vmem:[#allocation2 + $0xe2] sm:$0xff] }
 0x294   : > { %4862 = vmatprep.subr.bf16.mxu0 %v5220_v15  ;;  %4816 = vmatprep.mubr.bf16.mxu0 %v3536_v53  ;;  %v3141_v42 = vmax.f32 %v3061_v25, %v3101_v55  ;;  %v3106_v24 = vld [vmem:[#allocation2 + $0x122] sm:$0xff]  ;;  %v3107_v53 = vld [vmem:[#allocation2 + $0x12a] sm:$0xff] }
 0x295   : > { %4848 = vmatprep.mubr.bf16.mxu1 %v3512_v13  ;;  %4932 = vmatpush3.bf16.msra.mxu1 %v6490_v56  ;;  %v3065_v13 = vmax.f32 %v2985_v22, %v3025_v3  ;;  %v7177_v22 = vld [vmem:[#allocation28_spill] sm:$0xff]  ;;  %v3143_v11 = vmax.f32 %v3063_v39, %v3103_v49  ;;  %v3146_v35 = vmax.f32 %v3066_v59, %v3106_v24  ;;  %v3180_v37 = vld [vmem:[#allocation2 + $0xdb] sm:$0xff] }
 0x296   : > { %4925 = vmatprep.subr.bf16.mxu1 %v6506_v6  ;;  %v3104_v3 = vld [vmem:[#allocation2 + $0x10a] sm:$0xff]  ;;  %v3147_v25 = vmax.f32 %v3067_v23, %v3107_v53  ;;  %v3218_v39 = vmax.f32 %v3138_v63, %v3178_v60  ;;  %v7181_v53 = vpack.c.bf16 %v7160_v8, %v7159_v44  ;;  %v6603_v60 = vld [vmem:[%s7054_s5 + $0xd8] sm:$0xff]  }
 0x297   : > { %4863 = vmatpush3.bf16.msra.mxu0 %v5220_v15  ;;  %v3144_v34 = vmax.f32 %v3064_v30, %v3104_v3  ;;  %v3145_v32 = vmax.f32 %v3065_v13, %v3105_v38  ;;  %v3181_v55 = vld [vmem:[#allocation2 + $0xe3] sm:$0xff]  ;;  %v3219_v30 = vmax.f32 %v3139_v54, %v3179_v41  ;;  %v3220_v13 = vmax.f32 %v3140_v26, %v3180_v37  ;;  %v3259_v3 = vld [vmem:[#allocation2 + $0xcc] sm:$0xff]  ;;  %v3265_v37 = vld [vmem:[#allocation2 + $0x114] sm:$0xff] }
 0x298   : > { %4864 = vmatprep.subr.bf16.mxu0 %v6528_v33  ;;  %v3221_v49 = vmax.f32 %v3141_v42, %v3181_v55  ;;  %v3223_v63 = vmax.f32 %v3143_v11, %v3183_v17  ;;  %v7182_v54 = vpack.c.bf16 %v7162_v47, %v7161_v58  ;;  %v3226_v44 = vmax.f32 %v3146_v35, %v3186_v31  ;;  %v3258_v23 = vld [vmem:[#allocation2 + $0xc4] sm:$0xff]  ;;  %v3260_v38 = vld [vmem:[#allocation2 + $0xdc] sm:$0xff]  ;;  %v6612_v42 = vld [vmem:[%s7054_s5 + $0x90] sm:$0xff]  }
 0x299   : > { %4933 = vmatpush3.bf16.msra.mxu1 %v6506_v6  ;;  %v3225_v26 = vmax.f32 %v3145_v32, %v3185_v4  ;;  %v7184_v11 = vld [vmem:[#allocation33_spill] sm:$0xff]  ;;  %v3261_v58 = vld [vmem:[#allocation2 + $0xe4] sm:$0xff]  ;;  %v3263_v24 = vld [vmem:[#allocation2 + $0xfc] sm:$0xff]  ;;  %v6617_v41 = vmax.f32 %v3218_v39, %v3258_v23  ;;  %v6619_v32 = vmax.f32 %v3219_v30, %v3259_v3  ;;  %v6621_v35 = vmax.f32 %v3220_v13, %v3260_v38 }
 0x29a   : > { %4817 = vmatmul.mubr.bf16.gmra.mxu0 %v3537_v21  ;;  %4926 = vmatprep.subr.bf16.mxu1 %v6551_v7  ;;  %v3184_v21 = vld [vmem:[#allocation2 + $0x10b] sm:$0xff]  ;;  %v3262_v47 = vld [vmem:[#allocation2 + $0xf4] sm:$0xff] }
 0x29b   : > { %4849 = vmatmul.mubr.bf16.gmra.mxu1 %v3513_v36  ;;  %4865 = vmatpush3.bf16.msra.mxu0 %v6528_v33  ;;  %v3187_v36 = vld [vmem:[#allocation2 + $0x12b] sm:$0xff]  ;;  %v3222_v33 = vmax.f32 %v3142_v10, %v3182_v51  ;;  %v3224_v59 = vmax.f32 %v3144_v34, %v3184_v21  ;;  %v6624_v51 = vmax.f32 %v3221_v49, %v3261_v58  ;;  %v2988_v31 = vld [vmem:[#allocation2 + $0x138] sm:$0xff] }
 0x29c   : > { %4866 = vmatprep.subr.bf16.mxu0 %v6562_v52  ;;  %4820 = vmatprep.mubr.bf16.mxu0 %v7181_v53  ;;  %v3227_v8 = vmax.f32 %v3147_v25, %v3187_v36  ;;  %v7183_v34 = vld [vmem:[#allocation32_spill] sm:$0xff]  ;;  %v6628_v21 = vmax.f32 %v3223_v63, %v3263_v24  ;;  %v7185_v53 = vld [vmem:[#allocation34_spill] sm:$0xff]  ;;  %v6635_v13 = vmax.f32 %v3225_v26, %v3265_v37  ;;  %v2989_v36 = vld [vmem:[#allocation2 + $0x140] sm:$0xff] }
 0x29d   : > { %4852 = vmatprep.mubr.bf16.mxu1 %v7182_v54  ;;  %4934 = vmatpush3.bf16.msra.mxu1 %v6551_v7  ;;  %v3264_v25 = vld [vmem:[#allocation2 + $0x10c] sm:$0xff]  ;;  %v3266_v55 = vld [vmem:[#allocation2 + $0x124] sm:$0xff]  ;;  %v6626_v17 = vmax.f32 %v3222_v33, %v3262_v47  ;;  %3338 = vst [vmem:[#allocation2 + $0xc2] sm:$0xff] %v6617_v41  ;;  %3339 = vst [vmem:[#allocation2 + $0xca] sm:$0xff] %v6619_v32  ;;  %v3402_v49 = vmax.f32 %v6617_v41, %v6621_v35 }
 0x29e   : > { %4927 = vmatprep.subr.bf16.mxu1 %v6576_v43  ;;  %v3267_v39 = vld [vmem:[#allocation2 + $0x12c] sm:$0xff]  ;;  %v6633_v30 = vmax.f32 %v3224_v59, %v3264_v25  ;;  %3340 = vst [vmem:[#allocation2 + $0xda] sm:$0xff] %v6621_v35  ;;  %3341 = vst [vmem:[#allocation2 + $0xe2] sm:$0xff] %v6624_v51  ;;  %v3403_v63 = vmax.f32 %v6619_v32, %v6624_v51  ;;  %v3028_v59 = vld [vmem:[#allocation2 + $0x139] sm:$0xff]  ;;  %v3405_v23 = vmax.f32 %v6624_v51, %v6628_v21 }
 0x29f   : > { %4867 = vmatpush3.bf16.msra.mxu0 %v6562_v52  ;;  %v6637_v52 = vmax.f32 %v3226_v44, %v3266_v55  ;;  %v6645_v33 = vmax.f32 %v3227_v8, %v3267_v39  ;;  %3342 = vst [vmem:[#allocation2 + $0xf2] sm:$0xff] %v6626_v17  ;;  %3343 = vst [vmem:[#allocation2 + $0xfa] sm:$0xff] %v6628_v21  ;;  %v3029_v54 = vld [vmem:[#allocation2 + $0x141] sm:$0xff]  ;;  %v3404_v44 = vmax.f32 %v6621_v35, %v6626_v17  ;;  %v6668_v38 = vld [vmem:[%s7054_s5 + $0xd0] sm:$0xff]  }
 0x2a0   : > { %4868 = vmatprep.subr.bf16.mxu0 %v6589_v46  ;;  %v3108_v26 = vld [vmem:[#allocation2 + $0x13a] sm:$0xff]  ;;  %v7186_v8 = vpack.c.bf16 %v7164_v40, %v7163_v57  ;;  %v6662_v3 = vld [vmem:[%s7054_s5 + $0x88] sm:$0xff]   ;;  %3344 = vst [vmem:[#allocation2 + $0x10a] sm:$0xff] %v6633_v30  ;;  %3345 = vst [vmem:[#allocation2 + $0x112] sm:$0xff] %v6635_v13  ;;  %v3434_v57 = vmax.f32 %v3402_v49, %v6626_v17  ;;  %v3068_v40 = vmax.f32 %v2988_v31, %v3028_v59 }
 0x2a1   : > { %4935 = vmatpush3.bf16.msra.mxu1 %v6576_v43  ;;  %3346 = vst [vmem:[#allocation2 + $0x122] sm:$0xff] %v6637_v52  ;;  %v3069_v58 = vmax.f32 %v2989_v36, %v3029_v54  ;;  %v3109_v47 = vld [vmem:[#allocation2 + $0x142] sm:$0xff]  ;;  %v7187_v24 = vpack.c.bf16 %v7166_v50, %v7165_v62  ;;  %3347 = vst [vmem:[#allocation2 + $0x12a] sm:$0xff] %v6645_v33  ;;  %v3435_v25 = vmax.f32 %v3403_v63, %v6628_v21  ;;  %v2990_v49 = vld [vmem:[#allocation2 + $0x150] sm:$0xff] }
 0x2a2   : > { %4821 = vmatmul.mubr.bf16.gmra.mxu0 %v7186_v8  ;;  %4928 = vmatprep.subr.bf16.mxu1 %v6603_v60  ;;  %v3188_v37 = vld [vmem:[#allocation2 + $0x13b] sm:$0xff]  ;;  %v3189_v55 = vld [vmem:[#allocation2 + $0x143] sm:$0xff]  ;;  %v3436_v39 = vmax.f32 %v3404_v44, %v6633_v30  ;;  %v3437_v8 = vmax.f32 %v3405_v23, %v6635_v13  ;;  %v7188_v31 = vpack.c.bf16 %v7168_v19, %v7167_v27  ;;  %v3030_v59 = vld [vmem:[#allocation2 + $0x151] sm:$0xff] }
 0x2a3   : > { %4853 = vmatmul.mubr.bf16.gmra.mxu1 %v7187_v24  ;;  %4869 = vmatpush3.bf16.msra.mxu0 %v6589_v46  ;;  %v3466_v62 = vmax.f32 %v3434_v57, %v6633_v30  ;;  %v3148_v50 = vmax.f32 %v3068_v40, %v3108_v26  ;;  %v3149_v46 = vmax.f32 %v3069_v58, %v3109_v47  ;;  %v2991_v36 = vld [vmem:[#allocation2 + $0x158] sm:$0xff]  ;;  %v3269_v24 = vld [vmem:[#allocation2 + $0x144] sm:$0xff] }
 0x2a4   : > { %4870 = vmatprep.subr.bf16.mxu0 %v6612_v42  ;;  %4824 = vmatprep.mubr.bf16.mxu0 %v7188_v31  ;;  %v3031_v63 = vld [vmem:[#allocation2 + $0x159] sm:$0xff]  ;;  %v7189_v54 = vpack.c.bf16 %v7170_v12, %v7169_v2  ;;  %v3467_v44 = vmax.f32 %v3435_v25, %v6635_v13  ;;  %v3468_v27 = vmax.f32 %v3436_v39, %v6637_v52  ;;  %v6698_v26 = vld [vmem:[%s7054_s5 + $0xc8] sm:$0xff]   ;;  %v3033_v15 = vld [vmem:[#allocation2 + $0x171] sm:$0xff] }
 0x2a5   : > { %4936 = vmatpush3.bf16.msra.mxu1 %v6603_v60  ;;  %v3268_v23 = vld [vmem:[#allocation2 + $0x13c] sm:$0xff]  ;;  %v3469_v19 = vmax.f32 %v3437_v8, %v6645_v33  ;;  %v3110_v57 = vld [vmem:[#allocation2 + $0x152] sm:$0xff]  ;;  %v3498_v2 = vmax.f32 %v3466_v62, %v6637_v52  ;;  %v3228_v12 = vmax.f32 %v3148_v50, %v3188_v37  ;;  %v3229_v40 = vmax.f32 %v3149_v46, %v3189_v55  ;;  %v2992_v4 = vld [vmem:[#allocation2 + $0x168] sm:$0xff] }
 0x2a6   : > { %4856 = vmatprep.mubr.bf16.mxu1 %v7189_v54  ;;  %4929 = vmatprep.subr.bf16.mxu1 %v6668_v38  ;;  %v3070_v58 = vmax.f32 %v2990_v49, %v3030_v59  ;;  %v3111_v47 = vld [vmem:[#allocation2 + $0x15a] sm:$0xff]  ;;  %v3499_v25 = vmax.f32 %v3467_v44, %v6645_v33  ;;  %v3071_v39 = vmax.f32 %v2991_v36, %v3031_v63  ;;  %v3032_v10 = vld [vmem:[#allocation2 + $0x169] sm:$0xff] }
 0x2a7   : > { %4871 = vmatpush3.bf16.msra.mxu0 %v6612_v42  ;;  %v3190_v8 = vld [vmem:[#allocation2 + $0x153] sm:$0xff]  ;;  %v3406_v31 = vmax.f32 %v6626_v17, %v6633_v30  ;;  %v3407_v54 = vmax.f32 %v6628_v21, %v6635_v13  ;;  %v5231_v37 = vld [vmem:[%s7054_s5 + $0x80] sm:$0xff]   ;;  %v6711_v55 = vmax.f32 %v3228_v12, %v3268_v23  ;;  %v6713_v42 = vmax.f32 %v3229_v40, %v3269_v24 }
 0x2a8   : > { %4872 = vmatprep.subr.bf16.mxu0 %v6662_v3  ;;  %v3150_v49 = vmax.f32 %v3070_v58, %v3110_v57  ;;  %v3191_v62 = vld [vmem:[#allocation2 + $0x15b] sm:$0xff]  ;;  %v3072_v50 = vmax.f32 %v2992_v4, %v3032_v10  ;;  %v4035_v46 = vpack.c.bf16 %v3499_v25, %v3498_v2  ;;  %v3151_v36 = vmax.f32 %v3071_v39, %v3111_v47  ;;  %v3113_v47 = vld [vmem:[#allocation2 + $0x172] sm:$0xff] }
 0x2a9   : > { %4937 = vmatpush3.bf16.msra.mxu1 %v6668_v38  ;;  %v3270_v59 = vld [vmem:[#allocation2 + $0x154] sm:$0xff]  ;;  %v3438_v63 = vmax.f32 %v3406_v31, %v6637_v52  ;;  %v3439_v44 = vmax.f32 %v3407_v54, %v6645_v33  ;;  %v7190_v23 = vpack.c.bf16 %v7172_v16, %v7171_v18  ;;  %v6725_v10 = vld [vmem:[%s7054_s5 + $0xc0] sm:$0xff]   ;;  %3348 = vst [vmem:[#allocation2 + $0x13a] sm:$0xff] %v6711_v55  ;;  %3349 = vst [vmem:[#allocation2 + $0x142] sm:$0xff] %v6713_v42 }
 0x2aa   : > { %4930 = vmatprep.subr.bf16.mxu1 %v6698_v26  ;;  %v6730_v4 = vmax.f32 %v3468_v27, %v6711_v55  ;;  %v6733_v24 = vmax.f32 %v3469_v19, %v6713_v42  ;;  %v3230_v57 = vmax.f32 %v3150_v49, %v3190_v8  ;;  %v3271_v18 = vld [vmem:[#allocation2 + $0x15c] sm:$0xff]  ;;  %v3112_v16 = vld [vmem:[#allocation2 + $0x16a] sm:$0xff]  ;;  %v7191_v2 = vpack.c.bf16 %v7174_v45, %v7173_v14 }
 0x2ab   : > { %4825 = vmatmul.mubr.bf16.gmra.mxu0 %v7190_v23  ;;  %v3231_v12 = vmax.f32 %v3151_v36, %v3191_v62  ;;  %v3470_v40 = vmax.f32 %v3438_v63, %v6711_v55  ;;  %v3471_v58 = vmax.f32 %v3439_v44, %v6713_v42  ;;  %v2994_v27 = vld [vmem:[#allocation2 + $0x180] sm:$0xff]  ;;  %v7192_v19 = vpack.c.bf16 %v7176_v29, %v7175_v1  ;;  %v2995_v8 = vld [vmem:[#allocation2 + $0x188] sm:$0xff]  ;;  %v3193_v62 = vld [vmem:[#allocation2 + $0x173] sm:$0xff] }
 0x2ac   : > { %4857 = vmatmul.mubr.bf16.gmra.mxu1 %v7191_v2  ;;  %4873 = vmatpush3.bf16.msra.mxu0 %v6662_v3  ;;  %v3034_v25 = vld [vmem:[#allocation2 + $0x181] sm:$0xff]  ;;  %v4036_v39 = vpack.c.bf16 %v6733_v24, %v6730_v4  ;;  %v6746_v14 = vmax.f32 %v3230_v57, %v3270_v59  ;;  %v3073_v45 = vmax.f32 %v2993_v20, %v3033_v15  ;;  %v3192_v3 = vld [vmem:[#allocation2 + $0x16b] sm:$0xff]  ;;  %v3273_v23 = vld [vmem:[#allocation2 + $0x174] sm:$0xff] }
 0x2ad   : > { %4874 = vmatprep.subr.bf16.mxu0 %v5231_v37  ;;  %4876 = vmatprep.mubr.bf16.mxu0 %v7192_v19  ;;  %v3035_v31 = vld [vmem:[#allocation2 + $0x189] sm:$0xff]  ;;  %v6749_v54 = vmax.f32 %v3231_v12, %v3271_v18  ;;  %v3152_v49 = vmax.f32 %v3072_v50, %v3112_v16  ;;  %v3408_v1 = vmax.f32 %v6633_v30, %v6637_v52 }
 0x2ae   : > { %4938 = vmatpush3.bf16.msra.mxu1 %v6698_v26  ;;  %4912 = vmatprep.mubr.bf16.mxu1 %v4035_v46  ;;  %v3114_v29 = vld [vmem:[#allocation2 + $0x182] sm:$0xff]  ;;  %3350 = vst [vmem:[#allocation2 + $0x152] sm:$0xff] %v6746_v14  ;;  %v3502_v15 = vmax.f32 %v3470_v40, %v6746_v14  ;;  %v3153_v20 = vmax.f32 %v3073_v45, %v3113_v47  ;;  %v3272_v36 = vld [vmem:[#allocation2 + $0x16c] sm:$0xff]  ;;  %v2996_v45 = vld [vmem:[#allocation2 + $0x198] sm:$0xff] }
 0x2af   : > { %4931 = vmatprep.subr.bf16.mxu1 %v6725_v10  ;;  %v3409_v59 = vmax.f32 %v6635_v13, %v6645_v33  ;;  %v3074_v46 = vmax.f32 %v2994_v27, %v3034_v25  ;;  %v3115_v63 = vld [vmem:[#allocation2 + $0x18a] sm:$0xff]  ;;  %3351 = vst [vmem:[#allocation2 + $0x15a] sm:$0xff] %v6749_v54  ;;  %v3503_v50 = vmax.f32 %v3471_v58, %v6749_v54 }
 0x2b0   : > { %4875 = vmatpush3.bf16.msra.mxu0 %v5231_v37  ;;  %v3232_v44 = vmax.f32 %v3152_v49, %v3192_v3  ;;  %v3440_v4 = vmax.f32 %v3408_v1, %v6711_v55  ;;  %v3075_v24 = vmax.f32 %v2995_v8, %v3035_v31  ;;  %v3194_v57 = vld [vmem:[#allocation2 + $0x183] sm:$0xff]  ;;  %v3233_v18 = vmax.f32 %v3153_v20, %v3193_v62  ;;  %v3195_v12 = vld [vmem:[#allocation2 + $0x18b] sm:$0xff]  ;;  %v3036_v1 = vld [vmem:[#allocation2 + $0x199] sm:$0xff] }
 0x2b1   : > { %4892 = vmatprep.subr.bf16.mxu0 %v6490_v56  ;;  %v3441_v16 = vmax.f32 %v3409_v59, %v6713_v42  ;;  %v3154_v2 = vmax.f32 %v3074_v46, %v3114_v29  ;;  %v3410_v37 = vmax.f32 %v6637_v52, %v6711_v55  ;;  %v4037_v40 = vpack.c.bf16 %v3503_v50, %v3502_v15  ;;  %v3274_v25 = vld [vmem:[#allocation2 + $0x184] sm:$0xff]  ;;  %v3275_v19 = vld [vmem:[#allocation2 + $0x18c] sm:$0xff] }
 0x2b2   : > { %4939 = vmatpush3.bf16.msra.mxu1 %v6725_v10  ;;  %v3312_v58 = vmax.f32 %v3232_v44, %v3272_v36  ;;  %v3472_v47 = vmax.f32 %v3440_v4, %v6746_v14  ;;  %v3155_v27 = vmax.f32 %v3075_v24, %v3115_v63  ;;  %v7193_v3 = vpack.c.bf16 %v7178_v48, %v7177_v22  ;;  %v2997_v62 = vld [vmem:[#allocation2 + $0x1a0] sm:$0xff]  ;;  %v3014_v50 = vld [vmem:[#allocation2 + $0x91] sm:$0xff] }
 0x2b3   : > { %v3313_v8 = vmax.f32 %v3233_v18, %v3273_v23  ;;  %v3473_v31 = vmax.f32 %v3441_v16, %v6749_v54  ;;  %v3234_v49 = vmax.f32 %v3154_v2, %v3194_v57  ;;  %v3411_v52 = vmax.f32 %v6645_v33, %v6713_v42  ;;  %v3037_v29 = vld [vmem:[#allocation2 + $0x1a1] sm:$0xff]  ;;  %v2975_v57 = vld [vmem:[#allocation2 + $0x98] sm:$0xff] }
 0x2b4   : > { %4877 = vmatmul.mubr.bf16.vlgmr.msra.gmra.mxu0 %v7193_v3  ;;  %v7194_v15 = vpack.c.bf16 %v7180_v61, %v7179_v28  ;;  %3352 = vst [vmem:[#allocation2 + $0x16a] sm:$0xff] %v3312_v58  ;;  %v6777_v20 = vmax.f32 %v3472_v47, %v3312_v58  ;;  %v3235_v22 = vmax.f32 %v3155_v27, %v3195_v12  ;;  %v3116_v36 = vld [vmem:[#allocation2 + $0x19a] sm:$0xff]  ;;  %v3117_v59 = vld [vmem:[#allocation2 + $0x1a2] sm:$0xff]  ;;  %v2974_v61 = vld [vmem:[#allocation2 + $0x90] sm:$0xff] }
 0x2b5   : > { %4893 = vmatpush3.bf16.msra.mxu0 %v6490_v56  ;;  %v3442_v48 = vmax.f32 %v3410_v37, %v6746_v14  ;;  %4913 = vmatmul.mubr.bf16.vlgmr.msra.gmra.mxu1 %v4036_v39  ;;  %3353 = vst [vmem:[#allocation2 + $0x172] sm:$0xff] %v3313_v8  ;;  %v3505_v33 = vmax.f32 %v3473_v31, %v3313_v8  ;;  %v3196_v63 = vld [vmem:[#allocation2 + $0x19b] sm:$0xff]  ;;  %v3197_v28 = vld [vmem:[#allocation2 + $0x1a3] sm:$0xff]  ;;  %v2977_v47 = vld [vmem:[#allocation2 + $0xb0] sm:$0xff] }
 0x2b6   : > { %4880 = vmatprep.mubr.bf16.mxu0 %v7194_v15  ;;  %4894 = vmatprep.subr.bf16.mxu0 %v6506_v6  ;;  %v6781_v46 = vmax.f32 %v3234_v49, %v3274_v25  ;;  %v3443_v56 = vmax.f32 %v3411_v52, %v6749_v54  ;;  %v3315_v44 = vmax.f32 %v3235_v22, %v3275_v19  ;;  %v2976_v18 = vld [vmem:[#allocation2 + $0xa8] sm:$0xff]  ;;  %v3015_v16 = vld [vmem:[#allocation2 + $0x99] sm:$0xff]  ;;  %v3017_v27 = vld [vmem:[#allocation2 + $0xb1] sm:$0xff] }
 0x2b7   : > { %4916 = vmatprep.mubr.bf16.mxu1 %v4037_v40  ;;  %v3474_v23 = vmax.f32 %v3442_v48, %v3312_v58  ;;  %v3076_v4 = vmax.f32 %v2996_v45, %v3036_v1  ;;  %v3077_v24 = vmax.f32 %v2997_v62, %v3037_v29  ;;  %v4038_v39 = vpack.c.bf16 %v3505_v33, %v6777_v20  ;;  %v3016_v40 = vld [vmem:[#allocation2 + $0xa9] sm:$0xff]  ;;  %v3094_v31 = vld [vmem:[#allocation2 + $0x92] sm:$0xff]  ;;  %v3276_v52 = vld [vmem:[#allocation2 + $0x19c] sm:$0xff] }
 0x2b8   : > { %3354 = vst [vmem:[#allocation2 + $0x182] sm:$0xff] %v6781_v46  ;;  %v3475_v2 = vmax.f32 %v3443_v56, %v3313_v8  ;;  %v3412_v12 = vmax.f32 %v6711_v55, %v6746_v14  ;;  %v3413_v37 = vmax.f32 %v6713_v42, %v6749_v54  ;;  %3355 = vst [vmem:[#allocation2 + $0x18a] sm:$0xff] %v3315_v44  ;;  %v3277_v55 = vld [vmem:[#allocation2 + $0x1a4] sm:$0xff]  ;;  %v3095_v54 = vld [vmem:[#allocation2 + $0x9a] sm:$0xff] }
 0x2b9   : > { %4895 = vmatpush3.bf16.msra.mxu0 %v6506_v6  ;;  %v3506_v25 = vmax.f32 %v3474_v23, %v6781_v46  ;;  %v3156_v19 = vmax.f32 %v3076_v4, %v3116_v36  ;;  %v3157_v45 = vmax.f32 %v3077_v24, %v3117_v59  ;;  %v3054_v3 = vmax.f32 %v2974_v61, %v3014_v50  ;;  %v3096_v20 = vld [vmem:[#allocation2 + $0xaa] sm:$0xff]  ;;  %v3097_v22 = vld [vmem:[#allocation2 + $0xb2] sm:$0xff] }
 0x2ba   : > { %4896 = vmatprep.subr.bf16.mxu0 %v6551_v7  ;;  %v3507_v49 = vmax.f32 %v3475_v2, %v3315_v44  ;;  %v3444_v14 = vmax.f32 %v3412_v12, %v3312_v58  ;;  %v3445_v62 = vmax.f32 %v3413_v37, %v3313_v8  ;;  %v3055_v42 = vmax.f32 %v2975_v57, %v3015_v16  ;;  %v3174_v48 = vld [vmem:[#allocation2 + $0x93] sm:$0xff]  ;;  %v3175_v58 = vld [vmem:[#allocation2 + $0x9b] sm:$0xff]  ;;  %v3176_v23 = vld [vmem:[#allocation2 + $0xab] sm:$0xff] }
 0x2bb   : > { %v3236_v1 = vmax.f32 %v3156_v19, %v3196_v63  ;;  %v3237_v29 = vmax.f32 %v3157_v45, %v3197_v28  ;;  %v3056_v15 = vmax.f32 %v2976_v18, %v3016_v40  ;;  %v3057_v6 = vmax.f32 %v2977_v47, %v3017_v27  ;;  %v3177_v4 = vld [vmem:[#allocation2 + $0xb3] sm:$0xff]  ;;  %v7197_v16 = vld [vmem:[#allocation35_spill] sm:$0xff] }
 0x2bc   : > { %v7195_v36 = vpack.c.bf16 %v7184_v11, %v7183_v34  ;;  %v4039_v59 = vpack.c.bf16 %v3507_v49, %v3506_v25  ;;  %v3476_v33 = vmax.f32 %v3444_v14, %v6781_v46  ;;  %v3477_v56 = vmax.f32 %v3445_v62, %v3315_v44  ;;  %v3254_v24 = vld [vmem:[#allocation2 + $0x94] sm:$0xff]  ;;  %v3255_v44 = vld [vmem:[#allocation2 + $0x9c] sm:$0xff] }
 0x2bd   : > { %v3134_v61 = vmax.f32 %v3054_v3, %v3094_v31  ;;  %4897 = vmatpush3.bf16.msra.mxu0 %v6551_v7  ;;  %v7196_v8 = vpack.c.bf16 %v6313_v0, %v7185_v53  ;;  %v3316_v63 = vmax.f32 %v3236_v1, %v3276_v52  ;;  %v3317_v28 = vmax.f32 %v3237_v29, %v3277_v55  ;;  %v3256_v53 = vld [vmem:[#allocation2 + $0xac] sm:$0xff]  ;;  %v3257_v18 = vld [vmem:[#allocation2 + $0xb4] sm:$0xff] }
 0x2be   : > { %4881 = vmatmul.mubr.bf16.gmra.mxu0 %v7195_v36  ;;  %v3135_v50 = vmax.f32 %v3055_v42, %v3095_v54  ;;  %4898 = vmatprep.subr.bf16.mxu0 %v6576_v43  ;;  %v3136_v34 = vmax.f32 %v3056_v15, %v3096_v20  ;;  %v3137_v11 = vmax.f32 %v3057_v6, %v3097_v22  ;;  %v7199_v40 = vld [vmem:[#allocation37_spill] sm:$0xff]  ;;  %v7200_v42 = vld [vmem:[#allocation38_spill] sm:$0xff] }
 0x2bf   : > { %4884 = vmatprep.mubr.bf16.mxu0 %v7196_v8  ;;  %4917 = vmatmul.mubr.bf16.gmra.mxu1 %v4038_v39  ;;  %v3214_v46 = vmax.f32 %v3134_v61, %v3174_v48  ;;  %3356 = vst [vmem:[#allocation2 + $0x19a] sm:$0xff] %v3316_v63  ;;  %3357 = vst [vmem:[#allocation2 + $0x1a2] sm:$0xff] %v3317_v28  ;;  %v3508_v7 = vmax.f32 %v3476_v33, %v3316_v63  ;;  %v7198_v39 = vld [vmem:[#allocation36_spill] sm:$0xff] }
 0x2c0   : > { %4920 = vmatprep.mubr.bf16.mxu1 %v4039_v59  ;;  %v3509_v57 = vmax.f32 %v3477_v56, %v3317_v28  ;;  %v3215_v0 = vmax.f32 %v3135_v50, %v3175_v58  ;;  %v3853_v2 = vpack.c.bf16 %v7197_v16, %v6324_v5  ;;  %v3216_v12 = vmax.f32 %v3136_v34, %v3176_v23 }
 0x2c1   : > { %v3217_v37 = vmax.f32 %v3137_v11, %v3177_v4  ;;  %v3294_v47 = vmax.f32 %v3214_v46, %v3254_v24  ;;  %4899 = vmatpush3.bf16.msra.mxu0 %v6576_v43  ;;  %v3854_v27 = vpack.c.bf16 %v7199_v40, %v7198_v39  ;;  %v3855_v54 = vpack.c.bf16 %v6366_v9, %v7200_v42 }
 0x2c2   : > { %v3295_v25 = vmax.f32 %v3215_v0, %v3255_v44  ;;  %4900 = vmatprep.subr.bf16.mxu0 %v6603_v60  ;;  %v4040_v19 = vpack.c.bf16 %v3509_v57, %v3508_v7  ;;  %v3296_v45 = vmax.f32 %v3216_v12, %v3256_v53 }
 0x2c3   : > { %v3297_v3 = vmax.f32 %v3217_v37, %v3257_v18  ;;  %3334 = vst [vmem:[#allocation2 + $0x92] sm:$0xff] %v3294_v47 }
 0x2c4   : > { %3335 = vst [vmem:[#allocation2 + $0x9a] sm:$0xff] %v3295_v25  ;;  %3336 = vst [vmem:[#allocation2 + $0xaa] sm:$0xff] %v3296_v45  ;;  %v3398_v5 = vmax.f32 %v3294_v47, %v3296_v45  ;;  %v3400_v49 = vmax.f32 %v3296_v45, %v6617_v41 }
 0x2c5   : > { %3337 = vst [vmem:[#allocation2 + $0xb2] sm:$0xff] %v3297_v3  ;;  %v3399_v31 = vmax.f32 %v3295_v25, %v3297_v3  ;;  %v3401_v43 = vmax.f32 %v3297_v3, %v6619_v32  ;;  %4901 = vmatpush3.bf16.msra.mxu0 %v6603_v60 }
 0x2c6   : > { %4885 = vmatmul.mubr.bf16.gmra.mxu0 %v3853_v2  ;;  %4902 = vmatprep.subr.bf16.mxu0 %v6668_v38  ;;  %v3430_v52 = vmax.f32 %v3398_v5, %v6617_v41  ;;  %v3432_v14 = vmax.f32 %v3400_v49, %v6621_v35 }
 0x2c7   : > { %4888 = vmatprep.mubr.bf16.mxu0 %v3854_v27  ;;  %4921 = vmatmul.mubr.bf16.gmra.mxu1 %v4040_v19  ;;  %v3431_v55 = vmax.f32 %v3399_v31, %v6619_v32  ;;  %v3433_v62 = vmax.f32 %v3401_v43, %v6624_v51  ;;  %v6870_v31 = vld [vmem:[%s7055_s6] ss:$0 sm:$0xff] }
 0x2c8   : > { %v3462_v1 = vmax.f32 %v3430_v52, %v6621_v35  ;;  %v3464_v60 = vmax.f32 %v3432_v14, %v6626_v17 }
 0x2c9   : > { %v3463_v29 = vmax.f32 %v3431_v55, %v6624_v51  ;;  %4903 = vmatpush3.bf16.msra.mxu0 %v6668_v38  ;;  %v3465_v15 = vmax.f32 %v3433_v62, %v6628_v21 }
 0x2ca   : > { %4904 = vmatprep.subr.bf16.mxu0 %v6698_v26  ;;  %v3494_v41 = vmax.f32 %v3462_v1, %v6626_v17  ;;  %v3496_v9 = vmax.f32 %v3464_v60, %v6633_v30 }
 0x2cb   : > { %v3495_v32 = vmax.f32 %v3463_v29, %v6628_v21  ;;  %v3497_v35 = vmax.f32 %v3465_v15, %v6635_v13 }
 0x2cd   : > { %v4033_v6 = vpack.c.bf16 %v3495_v32, %v3494_v41  ;;  %4905 = vmatpush3.bf16.msra.mxu0 %v6698_v26  ;;  %v4034_v51 = vpack.c.bf16 %v3497_v35, %v3496_v9 }
 0x2ce   : > { %4889 = vmatmul.mubr.bf16.gmra.mxu0 %v3855_v54  ;;  %4906 = vmatprep.subr.bf16.mxu0 %v6725_v10 }
 0x2cf   : > { %4908 = vmatprep.mubr.bf16.mxu0 %v4033_v6 }
 0x2d1   : > { %4907 = vmatpush3.bf16.msra.mxu0 %v6725_v10 }
 0x2d6   : > { %4909 = vmatmul.mubr.bf16.vlgmr.msra.gmra.mxu0 %v4034_v51 }
 0x352   : > { %v6831_v38 = vpop.f32.mrf.mxu0 }
 0x353   : > { %v6833_v17 = vpop.f32.mrf.mxu1 }
 0x354   : > { %v6835_v21 = vpop.f32.mrf.mxu0 }
 0x355   : > { %v6837_v20 = vpop.f32.mrf.mxu1 }
 0x356   : > { %v6839_v30 = vpop.f32.mrf.mxu0 }
 0x357   : > { %v6841_v13 = vpop.f32.mrf.mxu1 }
 0x358   : > { %v6843_v26 = vpop.f32.mrf.mxu0 }
 0x359   : > { %v6845_v22 = vpop.f32.mrf.mxu1 }
 0x35a   : > { %v4818_v48 = vpop.f32.mrf.mxu0 }
 0x35b   : > { %v4850_v36 = vpop.f32.mrf.mxu1 }
 0x35c   : > { %v3656_v10 = vpop.f32.mrf.mxu0  ;;  %v3810_v27 = vadd.f32 %v4850_v36, %v4818_v48 }
 0x35d   : > { %v3801_v59 = vpop.f32.mrf.mxu1 }
 0x35e   : > { %v4819_v33 = vpop.f32.mrf.mxu0  ;;  %v3802_v45 = vadd.f32 %v3801_v59, %v3656_v10 }
 0x35f   : > { %v4851_v56 = vpop.f32.mrf.mxu1 }
 0x360   : > { %v3659_v61 = vpop.f32.mrf.mxu0  ;;  %v3813_v43 = vadd.f32 %v4851_v56, %v4819_v33 }
 0x361   : > { %v3804_v58 = vpop.f32.mrf.mxu1 }
 0x362   : > { %v4822_v8 = vpop.f32.mrf.mxu0  ;;  %v3805_v42 = vadd.f32 %v3804_v58, %v3659_v61 }
 0x363   : > { %v4854_v63 = vpop.f32.mrf.mxu1 }
 0x364   : > { %v3672_v28 = vpop.f32.mrf.mxu0  ;;  %v3826_v60 = vadd.f32 %v4854_v63, %v4822_v8 }
 0x365   : > { %v3817_v50 = vpop.f32.mrf.mxu1 }
 0x366   : > { %v4823_v23 = vpop.f32.mrf.mxu0  ;;  %v3818_v51 = vadd.f32 %v3817_v50, %v3672_v28 }
 0x367   : > { %v4855_v4 = vpop.f32.mrf.mxu1 }
 0x368   : > { %v3675_v24 = vpop.f32.mrf.mxu0  ;;  %v3829_v56 = vadd.f32 %v4855_v4, %v4823_v23 }
 0x369   : > { %v3820_v34 = vpop.f32.mrf.mxu1 }
 0x36b   : > { %v4826_v11 = vpop.f32.mrf.mxu0 }
 0x36c   : > { %v4858_v46 = vpop.f32.mrf.mxu1 }
 0x36d   : > { %v6847_v44 = vpop.f32.mrf.mxu0  ;;  %v3842_v23 = vadd.f32 %v4858_v46, %v4826_v11 }
 0x36e   : > { %v6849_v7 = vpop.f32.mrf.mxu1 }
 0x36f   : > { %v6851_v57 = vpop.f32.mrf.mxu0 }
 0x370   : > { %v6853_v0 = vpop.f32.mrf.mxu1 }
 0x371   : > { %v6855_v53 = vpop.f32.mrf.mxu0 }
 0x372   : > { %v6857_v18 = vpop.f32.mrf.mxu1 }
 0x374   : > { %v6859_v16 = vpop.f32.mrf.mxu0 }
 0x375   : > { %v4914_v12 = vpop.f32.mrf.mxu1 }
 0x376   : > { %v6861_v2 = vpop.f32.mrf.mxu0 }
 0x377   : > { %v4155_v47 = vpop.f32.mrf.mxu1 }
 0x378   : > { %v6863_v37 = vpop.f32.mrf.mxu0 }
 0x379   : > { %v4915_v40 = vpop.f32.mrf.mxu1 }
 0x37a   : > { %v6865_v39 = vpop.f32.mrf.mxu0 }
 0x37b   : > { %v4158_v19 = vpop.f32.mrf.mxu1 }
 0x37e   : > { %v4882_v25 = vpop.f32.mrf.mxu0 }
 0x37f   : > { %v4023_v3 = vadd.f32 %v4882_v25, %v3810_v27  ;;  %v4918_v49 = vpop.f32.mrf.mxu1 }
 0x380   : > { %v3970_v5 = vpop.f32.mrf.mxu0 }
 0x381   : > { %v4021_v52 = vadd.f32 %v3970_v5, %v3802_v45  ;;  %v4208_v55 = vadd.f32 %v4914_v12, %v4023_v3  ;;  %v4171_v62 = vpop.f32.mrf.mxu1 }
 0x382   : > { %v4883_v14 = vpop.f32.mrf.mxu0 }
 0x383   : > { %v6873_v54 = vadd.f32 %v6870_v31, %v4208_v55  ;;  %v4024_v1 = vadd.f32 %v4883_v14, %v3813_v43  ;;  %v4206_v29 = vadd.f32 %v4155_v47, %v4021_v52  ;;  %v4919_v41 = vpop.f32.mrf.mxu1  ;;  %v3834_v43 = vadd.f32 %v6849_v7, %v6847_v44 }
 0x384   : > { %v3973_v15 = vpop.f32.mrf.mxu0  ;;  %v3845_v14 = vadd.f32 %v6853_v0, %v6851_v57  ;;  %v3794_v7 = vadd.f32 %v6833_v17, %v6831_v38 }
 0x385   : > { %v4647_v32 = vmul.f32 -1.442695, %v6873_v54  ;;  %v6877_v6 = vadd.f32 %v6870_v31, %v4206_v29  ;;  %v4022_v9 = vadd.f32 %v3973_v15, %v3805_v42  ;;  %v4209_v35 = vadd.f32 %v4915_v40, %v4024_v1  ;;  %v4174_v36 = vpop.f32.mrf.mxu1 }
 0x386   : > { %v4886_v48 = vpop.f32.mrf.mxu0  ;;  %v3821_v40 = vadd.f32 %v3820_v34, %v3675_v24  ;;  %v3837_v15 = vadd.f32 %v6857_v18, %v6855_v53 }
 0x387   : > { %5235 = vpow2.f32 %v4647_v32  ;;  %v4645_v10 = vmul.f32 -1.442695, %v6877_v6  ;;  %v6881_v59 = vadd.f32 %v6870_v31, %v4209_v35  ;;  %v4027_v33 = vadd.f32 %v4886_v48, %v3826_v60  ;;  %v4922_v47 = vpop.f32.mrf.mxu1 }
 0x388   : > { %v4207_v61 = vadd.f32 %v4158_v19, %v4022_v9  ;;  %v3986_v58 = vpop.f32.mrf.mxu0  ;;  %v4019_v48 = vadd.f32 %v6859_v16, %v3794_v7 }
 0x389   : > { %5237 = vpow2.f32 %v4645_v10  ;;  %v4648_v8 = vmul.f32 -1.442695, %v6881_v59  ;;  %v4025_v63 = vadd.f32 %v3986_v58, %v3818_v51  ;;  %v4212_v12 = vadd.f32 %v4918_v49, %v4027_v33  ;;  %v4187_v49 = vpop.f32.mrf.mxu1 }
 0x38a   : > { %v6885_v28 = vadd.f32 %v6870_v31, %v4207_v61  ;;  %v4887_v50 = vpop.f32.mrf.mxu0  ;;  %v3786_v51 = vadd.f32 %v6837_v20, %v6835_v21  ;;  %v3797_v61 = vadd.f32 %v6841_v13, %v6839_v30 }
 0x38b   : > { %5239 = vpow2.f32 %v4648_v8  ;;  %v6888_v27 = vadd.f32 %v6870_v31, %v4212_v12  ;;  %v4028_v25 = vadd.f32 %v4887_v50, %v3829_v56  ;;  %v4210_v45 = vadd.f32 %v4171_v62, %v4025_v63  ;;  %v4923_v44 = vpop.f32.mrf.mxu1 }
 0x38c   : > { %v4646_v4 = vmul.f32 -1.442695, %v6885_v28  ;;  %v3989_v19 = vpop.f32.mrf.mxu0  ;;  %v4017_v58 = vadd.f32 %v6861_v2, %v3786_v51 }
 0x38d   : > { %v4651_v3 = vmul.f32 -1.442695, %v6888_v27  ;;  %v6893_v5 = vadd.f32 %v6870_v31, %v4210_v45  ;;  %v4026_v24 = vadd.f32 %v3989_v19, %v3821_v40  ;;  %v4213_v34 = vadd.f32 %v4919_v41, %v4028_v25  ;;  %v4190_v33 = vpop.f32.mrf.mxu1 }
 0x38e   : > { %5241 = vpow2.f32 %v4646_v4  ;;  %v4890_v52 = vpop.f32.mrf.mxu0  ;;  %v3789_v45 = vadd.f32 %v6845_v22, %v6843_v26 }
 0x38f   : > { %5243 = vpow2.f32 %v4651_v3  ;;  %v4649_v55 = vmul.f32 -1.442695, %v6893_v5  ;;  %v6899_v11 = vadd.f32 %v6870_v31, %v4213_v34  ;;  %v4031_v46 = vadd.f32 %v4890_v52, %v3842_v23 }
 0x390   : > { %v4211_v62 = vadd.f32 %v4174_v36, %v4026_v24  ;;  %v4002_v42 = vpop.f32.mrf.mxu0 }
 0x391   : > { %5245 = vpow2.f32 %v4649_v55  ;;  %v4652_v1 = vmul.f32 -1.442695, %v6899_v11  ;;  %v4029_v29 = vadd.f32 %v4002_v42, %v3834_v43  ;;  %v4216_v60 = vadd.f32 %v4922_v47, %v4031_v46 }
 0x392   : > { %v6909_v41 = vadd.f32 %v6870_v31, %v4211_v62  ;;  %v4891_v32 = vpop.f32.mrf.mxu0  ;;  %v4020_v47 = vadd.f32 %v6863_v37, %v3797_v61  ;;  %v4018_v43 = vadd.f32 %v6865_v39, %v3789_v45 }
 0x393   : > { %5247 = vpow2.f32 %v4652_v1  ;;  %v6912_v57 = vadd.f32 %v6870_v31, %v4216_v60  ;;  %v4032_v0 = vadd.f32 %v4891_v32, %v3845_v14  ;;  %v4214_v9 = vadd.f32 %v4187_v49, %v4029_v29 }
 0x394   : > { %v5236_v35 = vpop.eup %5235  ;;  %v4650_v38 = vmul.f32 -1.442695, %v6909_v41  ;;  %v4005_v17 = vpop.f32.mrf.mxu0 }
 0x395   : > { %v4295_v53 = vadd.f32 1.0, %v5236_v35  ;;  %v4655_v18 = vmul.f32 -1.442695, %v6912_v57  ;;  %v6920_v36 = vadd.f32 %v6870_v31, %v4214_v9  ;;  %v4030_v10 = vadd.f32 %v4005_v17, %v3837_v15 }
 0x396   : > { %v5238_v56 = vpop.eup %5237  ;;  %5249 = vpow2.f32 %v4650_v38  ;;  %v4217_v21 = vadd.f32 %v4923_v44, %v4032_v0  ;;  %v4910_v20 = vpop.f32.mrf.mxu0 }
 0x397   : > { %5251 = vrcp.f32 %v4295_v53  ;;  %v4293_v16 = vadd.f32 1.0, %v5238_v56  ;;  %v4653_v8 = vmul.f32 -1.442695, %v6920_v36  ;;  %v4204_v63 = vadd.f32 %v4910_v20, %v4019_v48 }
 0x398   : > { %v5240_v12 = vpop.eup %5239  ;;  %5253 = vpow2.f32 %v4655_v18  ;;  %v6928_v40 = vadd.f32 %v6870_v31, %v4217_v21  ;;  %v4215_v50 = vadd.f32 %v4190_v33, %v4030_v10  ;;  %v4139_v25 = vpop.f32.mrf.mxu0 }
 0x399   : > { %5255 = vrcp.f32 %v4293_v16  ;;  %v4296_v30 = vadd.f32 1.0, %v5240_v12  ;;  %v6931_v13 = vadd.f32 %v6870_v31, %v4204_v63  ;;  %v4202_v2 = vadd.f32 %v4139_v25, %v4017_v58 }
 0x39a   : > { %5257 = vpow2.f32 %v4653_v8  ;;  %v4656_v23 = vmul.f32 -1.442695, %v6928_v40  ;;  %v6937_v37 = vadd.f32 %v6870_v31, %v4215_v50  ;;  %v4911_v4 = vpop.f32.mrf.mxu0 }
 0x39b   : > { %v5242_v19 = vpop.eup %5241  ;;  %5259 = vrcp.f32 %v4296_v30  ;;  %v4643_v3 = vmul.f32 -1.442695, %v6931_v13  ;;  %v6941_v24 = vadd.f32 %v6870_v31, %v4202_v2  ;;  %v4205_v34 = vadd.f32 %v4911_v4, %v4020_v47 }
 0x39c   : > { %v5244_v49 = vpop.eup %5243  ;;  %v4294_v52 = vadd.f32 1.0, %v5242_v19  ;;  %5261 = vpow2.f32 %v4656_v23  ;;  %v4654_v26 = vmul.f32 -1.442695, %v6937_v37  ;;  %v4142_v22 = vpop.f32.mrf.mxu0 }
 0x39d   : > { %v4299_v55 = vadd.f32 1.0, %v5244_v49  ;;  %5263 = vpow2.f32 %v4643_v3  ;;  %v6946_v46 = vadd.f32 %v6870_v31, %v4205_v34  ;;  %v4641_v62 = vmul.f32 -1.442695, %v6941_v24 }
 0x39e   : > { %v5246_v14 = vpop.eup %5245  ;;  %5265 = vrcp.f32 %v4294_v52  ;;  %v4203_v42 = vadd.f32 %v4142_v22, %v4018_v43 }
 0x39f   : > { %5267 = vrcp.f32 %v4299_v55  ;;  %v4297_v1 = vadd.f32 1.0, %v5246_v14  ;;  %v4644_v39 = vmul.f32 -1.442695, %v6946_v46 }
 0x3a0   : > { %v5248_v29 = vpop.eup %5247  ;;  %5269 = vpow2.f32 %v4654_v26  ;;  %v6951_v60 = vadd.f32 %v6870_v31, %v4203_v42 }
 0x3a1   : > { %5271 = vrcp.f32 %v4297_v1  ;;  %v4300_v44 = vadd.f32 1.0, %v5248_v29 }
 0x3a2   : > { %5273 = vpow2.f32 %v4641_v62  ;;  %v4642_v7 = vmul.f32 -1.442695, %v6951_v60 }
 0x3a3   : > { %v5250_v15 = vpop.eup %5249  ;;  %5275 = vrcp.f32 %v4300_v44 }
 0x3a4   : > { %v5252_v32 = vpop.eup %5251  ;;  %v4298_v0 = vadd.f32 1.0, %v5250_v15  ;;  %5277 = vpow2.f32 %v4644_v39 }
 0x3a5   : > { %v5254_v9 = vpop.eup %5253  ;;  %v4343_v35 = vmul.f32 %v5252_v32, %v6873_v54  ;;  %5279 = vpow2.f32 %v4642_v7 }
 0x3a6   : > { %v5256_v51 = vpop.eup %5255  ;;  %5281 = vrcp.f32 %v4298_v0  ;;  %v4303_v31 = vadd.f32 1.0, %v5254_v9 }
 0x3a7   : > { %v5258_v48 = vpop.eup %5257  ;;  %4359 = vst [vmem:[%s5850_s3 + $0x30] sm:$0xff] %v4343_v35  ;;  %v4341_v38 = vmul.f32 %v5256_v51, %v6877_v6 }
 0x3a8   : > { %v5260_v17 = vpop.eup %5259  ;;  %5283 = vrcp.f32 %v4303_v31  ;;  %v4301_v53 = vadd.f32 1.0, %v5258_v48 }
 0x3a9   : > { %v5262_v18 = vpop.eup %5261  ;;  %4357 = vst [vmem:[%s5850_s3 + $0x20] sm:$0xff] %v4341_v38  ;;  %v4344_v10 = vmul.f32 %v5260_v17, %v6881_v59 }
 0x3aa   : > { %v5264_v33 = vpop.eup %5263  ;;  %5285 = vrcp.f32 %v4301_v53  ;;  %v4304_v54 = vadd.f32 1.0, %v5262_v18 }
 0x3ab   : > { %v5266_v56 = vpop.eup %5265  ;;  %4360 = vst [vmem:[%s5850_s3 + $0x38] sm:$0xff] %v4344_v10  ;;  %v4291_v61 = vadd.f32 1.0, %v5264_v33 }
 0x3ac   : > { %v5268_v58 = vpop.eup %5267  ;;  %v4342_v21 = vmul.f32 %v5266_v56, %v6885_v28  ;;  %5287 = vrcp.f32 %v4304_v54 }
 0x3ad   : > { %v5270_v6 = vpop.eup %5269  ;;  %v4347_v20 = vmul.f32 %v5268_v58, %v6888_v27  ;;  %5289 = vrcp.f32 %v4291_v61 }
 0x3ae   : > { %v5272_v16 = vpop.eup %5271  ;;  %4358 = vst [vmem:[%s5850_s3 + $0x28] sm:$0xff] %v4342_v21  ;;  %v4302_v59 = vadd.f32 1.0, %v5270_v6 }
 0x3af   : > { %v5274_v8 = vpop.eup %5273  ;;  %4363 = vst [vmem:[%s5850_s3 + $0x50] sm:$0xff] %v4347_v20  ;;  %v4345_v63 = vmul.f32 %v5272_v16, %v6893_v5 }
 0x3b0   : > { %v5276_v12 = vpop.eup %5275  ;;  %5291 = vrcp.f32 %v4302_v59  ;;  %v4289_v47 = vadd.f32 1.0, %v5274_v8 }
 0x3b1   : > { %v5278_v50 = vpop.eup %5277  ;;  %4361 = vst [vmem:[%s5850_s3 + $0x40] sm:$0xff] %v4345_v63  ;;  %v4348_v28 = vmul.f32 %v5276_v12, %v6899_v11 }
 0x3b2   : > { %v5280_v25 = vpop.eup %5279  ;;  %5293 = vrcp.f32 %v4289_v47  ;;  %v4292_v27 = vadd.f32 1.0, %v5278_v50 }
 0x3b3   : > { %v5282_v30 = vpop.eup %5281  ;;  %4364 = vst [vmem:[%s5850_s3 + $0x58] sm:$0xff] %v4348_v28  ;;  %v4290_v2 = vadd.f32 1.0, %v5280_v25 }
 0x3b4   : > { %v4346_v5 = vmul.f32 %v5282_v30, %v6909_v41  ;;  %5295 = vrcp.f32 %v4292_v27 }
 0x3b5   : > { %v5284_v45 = vpop.eup %5283  ;;  %5297 = vrcp.f32 %v4290_v2 }
 0x3b6   : > { %4362 = vst [vmem:[%s5850_s3 + $0x48] sm:$0xff] %v4346_v5  ;;  %v4351_v23 = vmul.f32 %v5284_v45, %v6912_v57 }
 0x3b7   : > { %v5286_v11 = vpop.eup %5285 }
 0x3b8   : > { %4367 = vst [vmem:[%s5850_s3 + $0x70] sm:$0xff] %v4351_v23  ;;  %v4349_v4 = vmul.f32 %v5286_v11, %v6920_v36 }
 0x3b9   : > { %v5288_v19 = vpop.eup %5287 }
 0x3ba   : > { %v5290_v3 = vpop.eup %5289  ;;  %4365 = vst [vmem:[%s5850_s3 + $0x60] sm:$0xff] %v4349_v4  ;;  %v4352_v41 = vmul.f32 %v5288_v19, %v6928_v40 }
 0x3bb   : > { %v4339_v34 = vmul.f32 %v5290_v3, %v6931_v13 }
 0x3bc   : > { %4368 = vst [vmem:[%s5850_s3 + $0x78] sm:$0xff] %v4352_v41 }
 0x3bd   : > { %v5292_v49 = vpop.eup %5291  ;;  %4355 = vst [vmem:[%s5850_s3 + $0x10] sm:$0xff] %v4339_v34 }
 0x3be   : > { %v4350_v57 = vmul.f32 %v5292_v49, %v6937_v37 }
 0x3bf   : > { %v5294_v43 = vpop.eup %5293 }
 0x3c0   : > { %4366 = vst [vmem:[%s5850_s3 + $0x68] sm:$0xff] %v4350_v57  ;;  %v4337_v36 = vmul.f32 %v5294_v43, %v6941_v24 }
 0x3c1   : > { %v5296_v52 = vpop.eup %5295 }
 0x3c2   : > { %v5298_v40 = vpop.eup %5297  ;;  %4353 = vst [vmem:[%s5850_s3] sm:$0xff] %v4337_v36  ;;  %v4340_v13 = vmul.f32 %v5296_v52, %v6946_v46 }
 0x3c3   : > { %v4338_v37 = vmul.f32 %v5298_v40, %v6951_v60 }
 0x3c4   : > { %4356 = vst [vmem:[%s5850_s3 + $0x18] sm:$0xff] %v4340_v13 }
 0x3c5   : > { %4354 = vst [vmem:[%s5850_s3 + $0x8] sm:$0xff] %v4338_v37 }
 0x3c6   : > { %5312 = shalt.err (!%p5309_p0)
}
 0x3c7   : > { %s5313_s3 = scalar_lea.hbm %s6989_s22, 2048  ;;  %s5317_s21 = scalar_lea.hbm %s7056_s7, 8192 }
 0x3c8   : > { %p5314_p1 = scmp.ne.s32.totalorder %s6989_s22, %s5313_s3  ;;  %p5318_p5 = scmp.lt.s32.totalorder %s6989_s22, %s7056_s7 }
 0x3c9   : > { %p5319_p6 = scmp.lt.s32.totalorder %s5317_s21, %s5313_s3 }
 0x3ca   : > { %p5315_p2 = pnand %p5314_p1, %p5494_p3 }
 0x3cb   : > { %p5320_p7 = por %p5319_p6, %p5318_p5 }
 0x3cc   : > { %p5316_p4 = pneg %p5315_p2 }
 0x3ce   : > { %p5321_p9 = pnand %p5320_p7, %p5316_p4 }
 0x3d0   : > { %5324 = shalt.err (!%p5321_p9)
}
 0x3d1   : > { %s5401_s10 = smov 128   ;;  %s5402_s13 = smov 8  }
 0x3d2   : > { %4943 = dma.vmem_to_hbm [thread:$0]  (%p5494_p3), %s6991_s28, 2048, %s6989_s22, %s6998_s20, %s5401_s10, %s5401_s10, %s5402_s13  }
 0x3d3 PF: > { %p4949_p10 = scmp.ge.s32.totalorder %s5391_s8, 2  ;;  %s4400_s18 = sand.u32 1, %s5363_s24  }
 0x3d4   : > { %s4401_s12 = scalar_lea.sflag [#allocation4], %s4400_s18 }
 0x3d5   : > { %p4946_p11 = pnand %p4949_p10, %p5503_p8 }
 0x3d7   : > { %p4947_p12 = pneg %p4946_p11 }
 0x3d9   : > { %5358 = dma.done.wait (%p4947_p12), %s4401_s12, 2048  }
 0x3da   : > { %5360 = vsyncadd (%p4947_p12), %s4401_s12, 4294965248  ;;  %s20_s8 = sadd.s32 1, %s5391_s8   ;;  %s7202_s14 = sld [smem:[#allocation6_spill]] }
 0x3db   : > { %p17_p13 = scmp.ge.s32.totalorder %s20_s8, 6   ;;  %s7203_s24 = smov %s5367_s25 }
 0x3dc   : > { %s7204_s25 = smov %s5371_s26  ;;  %s7205_s26 = smov %s5512_s19 }
 0x3dd   : > { %s7206_s27 = smov %s5383_s29  ;;  %s7207_s28 = smov %s5387_s30 }
 0x3de   : > { %s7208_s29 = smov %s7211_s11  ;;  %19 = sbr.rel (!%p17_p13) target bundleno = 7 (0x7), region = 120 }
 0x3e0   : > { %s7209_s30 = smov %s7202_s14 }
 0x3e3   :  { %4406 = vsyncpa [#allocation4], 1 }
 0x3e4   :  { %4408 = vsyncpa [#allocation4 + $0x1], 1 }

</bundles_post_ra>
